<compile_context>
chip_gen: v5e
topology: v5e:2x2
jax: 0.10.0
libtpu: 0.0.40
codegen_flags: <defaults>
</compile_context>

<pallas_src>
import jax
import jax.numpy as jnp
from jax.experimental import pallas as pl
from jax.experimental.pallas import tpu as pltpu


# ----------------------------------------------------------------------------
# Fused Pallas kernel
# ----------------------------------------------------------------------------
def _scatter_targets(r):
    """Targets for scattering a layer-1 output-parity slab into the
    redundantly-decimated padded activation A2.

    Layer-1 produces a1[n, 2u+r, 2v+s, :]; it must land at every A2 slot
    (a, p) with 2p + a == 2u + r + 1 (the +1 is the next layer's zero-pad
    offset).  Returns tuples (a, u0, u1, p0): slab rows u in [u0, u1) go to
    p in [p0, p0 + (u1 - u0)).
    """
    if r == 0:
        return ((1, 0, 4, 0), (3, 1, 4, 0))
    return ((2, 0, 4, 0), (0, 0, 3, 1))


def convnet_kernel(x6_ref, w1_ref, b1_ref, w2_ref, b2_ref, wl_ref, bl_ref,
                   o_ref, a1d_ref):
    """Entire ConvNet forward in one kernel.

    x6_ref : (6, 6, 4, 4N, C0) f32  redundant /4 decimation of padded input
    w1_ref : (9, C0, C1) f32 ; b1_ref : (1, C1) f32   (BatchNorm folded in)
    w2_ref : (9, C1, C2) f32 ; b2_ref : (1, C2) f32   (BatchNorm folded in)
    wl_ref : (16, C2, NC) f32 ; bl_ref: (1, NC) f32   (NCHW flatten folded in)
    o_ref  : (N, NC) f32 logits
    a1d_ref: (4, 4, 4, 4N, C1) f32 scratch - redundant /2 decimation of the
             zero-padded layer-1 output (next layer's implicit-GEMM operand).
    """
    n4 = x6_ref.shape[3]
    N = n4 // 4
    C0 = x6_ref.shape[4]
    C1 = w1_ref.shape[2]
    C2 = w2_ref.shape[2]
    NC = wl_ref.shape[2]
    B = 4 * 4 * N                      # rows per parity/phase block (= 32)

    # scratch holds the *padded* activation -> padding slots must be zero
    a1d_ref[...] = jnp.zeros(a1d_ref.shape, jnp.float32)

    # ---------------- layer 1: conv + BN + maxpool + ReLU -------------------
    # conv output position (y, x) = (4u + e, 4v + f); processed in two halves
    # over r = e // 2 so only a (256, C1) accumulator is live at a time.
    b1 = b1_ref[...]
    for r in range(2):
        acc = jnp.zeros((2 * 4 * B, C1), jnp.float32)   # rows (e-2r, f, u, v, n)
        for dh in range(3):
            for dw in range(3):
                xs = x6_ref[2 * r + dh:2 * r + dh + 2, dw:dw + 4, :, :, :]
                xs = xs.reshape(2 * 4 * B, C0)
                acc = acc + jnp.dot(xs, w1_ref[dh * 3 + dw],
                                    preferred_element_type=jnp.float32)
        for s in range(2):
            # pooled output (i, j) = (2u+r, 2v+s): max over the 4 blocks
            # (e - 2r, f) in {0,1} x {2s, 2s+1} of the accumulator.
            blk = [acc[(er * 4 + 2 * s + ds) * B:(er * 4 + 2 * s + ds) * B + B]
                   for er in (0, 1) for ds in (0, 1)]
            slab = jnp.maximum(jnp.maximum(blk[0], blk[1]),
                               jnp.maximum(blk[2], blk[3]))
            slab = jnp.maximum(slab + b1, 0.0)           # (B, C1), rows (u, v, n)
            slab3 = slab.reshape(4, 4 * N, C1)           # (u, v*N+n, C1)
            # replicated scatter into the decimated *padded* activation
            for (a, u0, u1, p0) in _scatter_targets(r):
                for (b, v0, v1, q0) in _scatter_targets(s):
                    a1d_ref[a, b, p0:p0 + (u1 - u0),
                            q0 * N:(q0 + (v1 - v0)) * N, :] = (
                                slab3[u0:u1, v0 * N:v1 * N, :])

    # ---------------- layer 2: conv + BN + maxpool + ReLU -------------------
    acc2 = jnp.zeros((4 * B, C2), jnp.float32)           # rows (ph, pw, p, q, n)
    for dh in range(3):
        for dw in range(3):
            xs = a1d_ref[dh:dh + 2, dw:dw + 2, :, :, :]
            xs = xs.reshape(4 * B, C1)
            acc2 = acc2 + jnp.dot(xs, w2_ref[dh * 3 + dw],
                                  preferred_element_type=jnp.float32)
    pooled = jnp.maximum(jnp.maximum(acc2[0:B], acc2[B:2 * B]),
                         jnp.maximum(acc2[2 * B:3 * B], acc2[3 * B:4 * B]))
    act2 = jnp.maximum(pooled + b2_ref[...], 0.0)        # (B, C2), rows (p, q, n)

    # ---------------- linear head (flatten folded into wl) ------------------
    out = jnp.zeros((N, NC), jnp.float32)
    for pos in range(16):                                # pos = p * 4 + q
        out = out + jnp.dot(act2[pos * N:(pos + 1) * N, :], wl_ref[pos],
                            preferred_element_type=jnp.float32)
    o_ref[...] = out + bl_ref[...]


# ----------------------------------------------------------------------------
# Host-side glue (tiny): input layout prep + pallas_call wrapper
# ----------------------------------------------------------------------------
def _build_x6(x_nchw):
    """(N, C0, 16, 16) NCHW -> X6[a, b, u, v*N+n, c] = xpad[n, 4u+a, 4v+b, c].

    Redundant mod-4 decimation of the zero-padded NHWC input, so every layer-1
    tap/parity slab inside the kernel is a static contiguous slice.
    """
    N, C0, H, W = x_nchw.shape
    x = jnp.transpose(x_nchw, (0, 2, 3, 1)).astype(jnp.float32)      # NHWC
    xp = jnp.pad(x, ((0, 0), (1, 1), (1, 1), (0, 0)))                # (N, 18, 18, C0)
    idx = jnp.arange(6)[:, None] + 4 * jnp.arange(4)[None, :]        # idx[a, u] = 4u + a
    t = xp[:, idx]                                                   # (N, 6, 4, 18, C0)
    t = t[:, :, :, idx]                                              # (N, 6, 4, 6, 4, C0)
    t = jnp.transpose(t, (1, 3, 2, 4, 0, 5))                         # (a, b, u, v, n, c)
    return t.reshape(6, 6, 4, 4 * N, C0)


def convnet_forward(x_nchw, params):
    N, Cin, H, W = x_nchw.shape
    C1 = params["w1"].shape[2]
    C2 = params["w2"].shape[2]
    NC = params["wl"].shape[2]
    # The kernel is specialised to the module's fixed geometry: 3-channel
    # 16x16 input, two conv blocks, 4*4*C2 == 512 features into the Linear.
    assert (H, W) == (16, 16), "kernel specialised to 16x16 inputs"
    assert Cin == params["w1"].shape[1] == 3
    assert params["wl"].shape[0] == 16 and C2 * 16 == 512

    x6 = _build_x6(x_nchw)
    return pl.pallas_call(
        convnet_kernel,
        out_shape=jax.ShapeDtypeStruct((N, NC), jnp.float32),
        scratch_shapes=[pltpu.VMEM((4, 4, 4, 4 * N, C1), jnp.float32)],
    )(x6, params["w1"], params["b1"], params["w2"], params["b2"],
      params["wl"], params["bl"])


convnet_forward_jit = jax.jit(convnet_forward)


# ----------------------------------------------------------------------------
# Parameter init (synthetic, deterministic) and init-time parameter prep
# ----------------------------------------------------------------------------
def init_params(key, hidden_layers, num_classes=10, in_channels=3):
    conv_params = []
    k = key
    c = in_channels
    for v in hidden_layers:
        k, k1, k2, k3, k4, k5, k6 = jax.random.split(k, 7)
        conv_params.append(dict(
            w=0.1 * jax.random.normal(k1, (3, 3, c, v), jnp.float32),   # HWIO
            b=0.1 * jax.random.normal(k2, (v,), jnp.float32),
            gamma=1.0 + 0.1 * jax.random.normal(k3, (v,), jnp.float32),
            beta=0.1 * jax.random.normal(k4, (v,), jnp.float32),
            rmean=0.1 * jax.random.normal(k5, (v,), jnp.float32),
            rvar=0.5 + jnp.abs(jax.random.normal(k6, (v,), jnp.float32)),
        ))
        c = v
    k, kw, kb = jax.random.split(k, 3)
    w_lin = 0.05 * jax.random.normal(kw, (hidden_layers[-1] * 16, num_classes),
                                     jnp.float32)
    b_lin = 0.05 * jax.random.normal(kb, (num_classes,), jnp.float32)
    return conv_params, (w_lin, b_lin)


def prepare_params(conv_params, w_lin, b_lin, eps=1e-5):
    """All parameter prep hoisted out of the jitted forward: fold BatchNorm
    (running stats) into conv weights/biases, reshape to per-tap matrices and
    fold the torch.flatten(NCHW) ordering into the linear weight."""
    assert len(conv_params) == 2, "kernel specialised to two conv blocks"
    folded = []
    for p in conv_params:
        inv_std = 1.0 / jnp.sqrt(p["rvar"].astype(jnp.float32) + eps)
        scale = p["gamma"].astype(jnp.float32) * inv_std
        shift = p["beta"].astype(jnp.float32) - p["rmean"].astype(jnp.float32) * scale
        cin, cout = p["w"].shape[2], p["w"].shape[3]
        wmat = (p["w"].astype(jnp.float32) * scale).reshape(9, cin, cout)
        bias = (p["b"].astype(jnp.float32) * scale + shift).reshape(1, cout)
        folded.append((wmat, bias))
    (w1, b1), (w2, b2) = folded
    C2 = w2.shape[2]
    nc = w_lin.shape[1]
    assert w_lin.shape[0] == C2 * 16, "Linear expects 512 = C2 * 4 * 4 features"
    # torch.flatten(NCHW): feature index = c * 16 + (i * 4 + j)  ->  (pos, c, k)
    wl3 = jnp.transpose(w_lin.astype(jnp.float32).reshape(C2, 16, nc), (1, 0, 2))
    bl = b_lin.astype(jnp.float32).reshape(1, nc)
    return dict(w1=w1, b1=b1, w2=w2, b2=b2, wl=wl3, bl=bl)


# ----------------------------------------------------------------------------
# Pure-JAX reference (eval-mode semantics of the PyTorch module)
# ----------------------------------------------------------------------------
def reference_forward(x_nchw, conv_params, linear_params, eps=1e-5):
    x = jnp.transpose(x_nchw, (0, 2, 3, 1)).astype(jnp.float32)      # NHWC
    for p in conv_params:
        y = jax.lax.conv_general_dilated(
            x, p["w"].astype(jnp.float32), (1, 1), ((1, 1), (1, 1)),
            dimension_numbers=("NHWC", "HWIO", "NHWC")) + p["b"]
        y = (y - p["rmean"]) * (p["gamma"] / jnp.sqrt(p["rvar"] + eps)) + p["beta"]
        y = jax.lax.reduce_window(y, -jnp.inf, jax.lax.max,
                                  (1, 2, 2, 1), (1, 2, 2, 1), "VALID")
        x = jnp.maximum(y, 0.0)          # Dropout is identity in eval mode
    N = x.shape[0]
    feat = jnp.transpose(x, (0, 3, 1, 2)).reshape(N, -1)   # torch.flatten(NCHW)
    w_lin, b_lin = linear_params
    return feat @ w_lin + b_lin


# ----------------------------------------------------------------------------
if __name__ == "__main__":
    key = jax.random.PRNGKey(0)
    k_in, k_par = jax.random.split(key)

    # Config consistent with the module: in_channels=3 (fixed by make_layers),
    # two hidden conv blocks [8, 32], 16x16 input so the final feature map is
    # 32 * 4 * 4 = 512 (the Linear(512, 10) input size).
    N, Cin, H, W = 2, 3, 16, 16
    hidden_layers = [8, 32]
    num_classes = 10

    x = jax.random.normal(k_in, (N, Cin, H, W), jnp.float32)
    conv_params, (w_lin, b_lin) = init_params(k_par, hidden_layers, num_classes)
    params = prepare_params(conv_params, w_lin, b_lin)

    out = convnet_forward_jit(x, params)
    out = jax.block_until_ready(out)

    assert out.shape == (N, num_classes), out.shape
    assert out.dtype == jnp.float32
    assert bool(jnp.all(jnp.isfinite(out)))

    ref = reference_forward(x, conv_params, (w_lin, b_lin))
    assert bool(jnp.allclose(out, ref, rtol=2e-3, atol=2e-3)), (
        "max abs err = %f" % float(jnp.max(jnp.abs(out - ref))))

    print("KERNEL_OK")
</pallas_src>

<mosaic_0001>
module attributes {stable_mosaic.version = 11 : i64} {
  func.func @convnet_kernel(%arg0: memref<6x6x4x8x3xf32, #tpu.memory_space<vmem>>, %arg1: memref<9x3x8xf32, #tpu.memory_space<vmem>>, %arg2: memref<1x8xf32, #tpu.memory_space<vmem>>, %arg3: memref<9x8x32xf32, #tpu.memory_space<vmem>>, %arg4: memref<1x32xf32, #tpu.memory_space<vmem>>, %arg5: memref<16x32x10xf32, #tpu.memory_space<vmem>>, %arg6: memref<1x10xf32, #tpu.memory_space<vmem>>, %arg7: memref<2x10xf32, #tpu.memory_space<vmem>>, %arg8: memref<4x4x4x8x8xf32, #tpu.memory_space<vmem>>) attributes {dimension_semantics = [], scalar_prefetch = 0 : i64, scratch_operands = 1 : i64, tpu.core_type = #tpu.core_type<tc>} {
    %cst = arith.constant 0.000000e+00 : f32
    %0 = vector.broadcast %cst : f32 to vector<4x4x4x8x8xf32>
    %c0 = arith.constant 0 : index
    %c0_0 = arith.constant 0 : index
    %c0_1 = arith.constant 0 : index
    %c0_2 = arith.constant 0 : index
    %c0_3 = arith.constant 0 : index
    %1 = vector.load %arg8[%c0, %c0_0, %c0_1, %c0_2, %c0_3] : memref<4x4x4x8x8xf32, #tpu.memory_space<vmem>>, vector<4x4x4x8x8xf32>
    tpu.vector_store %arg8[%c0, %c0_0, %c0_1, %c0_2, %c0_3], %0 {strides = array<i32>} : memref<4x4x4x8x8xf32, #tpu.memory_space<vmem>>, vector<4x4x4x8x8xf32>,
    %c0_4 = arith.constant 0 : index
    %c0_5 = arith.constant 0 : index
    %2 = vector.load %arg2[%c0_4, %c0_5] : memref<1x8xf32, #tpu.memory_space<vmem>>, vector<1x8xf32>
    %cst_6 = arith.constant 0.000000e+00 : f32
    %3 = vector.broadcast %cst_6 : f32 to vector<256x8xf32>
    %c0_7 = arith.constant 0 : index
    %c0_8 = arith.constant 0 : index
    %c0_9 = arith.constant 0 : index
    %c0_10 = arith.constant 0 : index
    %c0_11 = arith.constant 0 : index
    %4 = vector.load %arg0[%c0_7, %c0_8, %c0_9, %c0_10, %c0_11] : memref<6x6x4x8x3xf32, #tpu.memory_space<vmem>>, vector<2x4x4x8x3xf32>
    %5 = vector.shape_cast %4 : vector<2x4x4x8x3xf32> to vector<256x3xf32>
    %c0_12 = arith.constant 0 : index
    %c0_13 = arith.constant 0 : index
    %c0_14 = arith.constant 0 : index
    %6 = vector.load %arg1[%c0_12, %c0_13, %c0_14] : memref<9x3x8xf32, #tpu.memory_space<vmem>>, vector<1x3x8xf32>
    %7 = vector.shape_cast %6 : vector<1x3x8xf32> to vector<3x8xf32>
    %cst_15 = arith.constant dense<0.000000e+00> : vector<256x8xf32>
    %8 = tpu.matmul %5, %7, %cst_15 {dimension_numbers = #tpu.dot_dimension_numbers<[1], [0], [0], [1], [0, 0, 1, 1], [], []>} : vector<256x3xf32>, vector<3x8xf32>, vector<256x8xf32> -> vector<256x8xf32>
    %9 = arith.addf %3, %8 : vector<256x8xf32>
    %c0_16 = arith.constant 0 : index
    %c1 = arith.constant 1 : index
    %c0_17 = arith.constant 0 : index
    %c0_18 = arith.constant 0 : index
    %c0_19 = arith.constant 0 : index
    %10 = vector.load %arg0[%c0_16, %c1, %c0_17, %c0_18, %c0_19] : memref<6x6x4x8x3xf32, #tpu.memory_space<vmem>>, vector<2x4x4x8x3xf32>
    %11 = vector.shape_cast %10 : vector<2x4x4x8x3xf32> to vector<256x3xf32>
    %c1_20 = arith.constant 1 : index
    %c0_21 = arith.constant 0 : index
    %c0_22 = arith.constant 0 : index
    %12 = vector.load %arg1[%c1_20, %c0_21, %c0_22] : memref<9x3x8xf32, #tpu.memory_space<vmem>>, vector<1x3x8xf32>
    %13 = vector.shape_cast %12 : vector<1x3x8xf32> to vector<3x8xf32>
    %cst_23 = arith.constant dense<0.000000e+00> : vector<256x8xf32>
    %14 = tpu.matmul %11, %13, %cst_23 {dimension_numbers = #tpu.dot_dimension_numbers<[1], [0], [0], [1], [0, 0, 1, 1], [], []>} : vector<256x3xf32>, vector<3x8xf32>, vector<256x8xf32> -> vector<256x8xf32>
    %15 = arith.addf %9, %14 : vector<256x8xf32>
    %c0_24 = arith.constant 0 : index
    %c2 = arith.constant 2 : index
    %c0_25 = arith.constant 0 : index
    %c0_26 = arith.constant 0 : index
    %c0_27 = arith.constant 0 : index
    %16 = vector.load %arg0[%c0_24, %c2, %c0_25, %c0_26, %c0_27] : memref<6x6x4x8x3xf32, #tpu.memory_space<vmem>>, vector<2x4x4x8x3xf32>
    %17 = vector.shape_cast %16 : vector<2x4x4x8x3xf32> to vector<256x3xf32>
    %c2_28 = arith.constant 2 : index
    %c0_29 = arith.constant 0 : index
    %c0_30 = arith.constant 0 : index
    %18 = vector.load %arg1[%c2_28, %c0_29, %c0_30] : memref<9x3x8xf32, #tpu.memory_space<vmem>>, vector<1x3x8xf32>
    %19 = vector.shape_cast %18 : vector<1x3x8xf32> to vector<3x8xf32>
    %cst_31 = arith.constant dense<0.000000e+00> : vector<256x8xf32>
    %20 = tpu.matmul %17, %19, %cst_31 {dimension_numbers = #tpu.dot_dimension_numbers<[1], [0], [0], [1], [0, 0, 1, 1], [], []>} : vector<256x3xf32>, vector<3x8xf32>, vector<256x8xf32> -> vector<256x8xf32>
    %21 = arith.addf %15, %20 : vector<256x8xf32>
    %c1_32 = arith.constant 1 : index
    %c0_33 = arith.constant 0 : index
    %c0_34 = arith.constant 0 : index
    %c0_35 = arith.constant 0 : index
    %c0_36 = arith.constant 0 : index
    %22 = vector.load %arg0[%c1_32, %c0_33, %c0_34, %c0_35, %c0_36] : memref<6x6x4x8x3xf32, #tpu.memory_space<vmem>>, vector<2x4x4x8x3xf32>
    %23 = vector.shape_cast %22 : vector<2x4x4x8x3xf32> to vector<256x3xf32>
    %c3 = arith.constant 3 : index
    %c0_37 = arith.constant 0 : index
    %c0_38 = arith.constant 0 : index
    %24 = vector.load %arg1[%c3, %c0_37, %c0_38] : memref<9x3x8xf32, #tpu.memory_space<vmem>>, vector<1x3x8xf32>
    %25 = vector.shape_cast %24 : vector<1x3x8xf32> to vector<3x8xf32>
    %cst_39 = arith.constant dense<0.000000e+00> : vector<256x8xf32>
    %26 = tpu.matmul %23, %25, %cst_39 {dimension_numbers = #tpu.dot_dimension_numbers<[1], [0], [0], [1], [0, 0, 1, 1], [], []>} : vector<256x3xf32>, vector<3x8xf32>, vector<256x8xf32> -> vector<256x8xf32>
    %27 = arith.addf %21, %26 : vector<256x8xf32>
    %c1_40 = arith.constant 1 : index
    %c1_41 = arith.constant 1 : index
    %c0_42 = arith.constant 0 : index
    %c0_43 = arith.constant 0 : index
    %c0_44 = arith.constant 0 : index
    %28 = vector.load %arg0[%c1_40, %c1_41, %c0_42, %c0_43, %c0_44] : memref<6x6x4x8x3xf32, #tpu.memory_space<vmem>>, vector<2x4x4x8x3xf32>
    %29 = vector.shape_cast %28 : vector<2x4x4x8x3xf32> to vector<256x3xf32>
    %c4 = arith.constant 4 : index
    %c0_45 = arith.constant 0 : index
    %c0_46 = arith.constant 0 : index
    %30 = vector.load %arg1[%c4, %c0_45, %c0_46] : memref<9x3x8xf32, #tpu.memory_space<vmem>>, vector<1x3x8xf32>
    %31 = vector.shape_cast %30 : vector<1x3x8xf32> to vector<3x8xf32>
    %cst_47 = arith.constant dense<0.000000e+00> : vector<256x8xf32>
    %32 = tpu.matmul %29, %31, %cst_47 {dimension_numbers = #tpu.dot_dimension_numbers<[1], [0], [0], [1], [0, 0, 1, 1], [], []>} : vector<256x3xf32>, vector<3x8xf32>, vector<256x8xf32> -> vector<256x8xf32>
    %33 = arith.addf %27, %32 : vector<256x8xf32>
    %c1_48 = arith.constant 1 : index
    %c2_49 = arith.constant 2 : index
    %c0_50 = arith.constant 0 : index
    %c0_51 = arith.constant 0 : index
    %c0_52 = arith.constant 0 : index
    %34 = vector.load %arg0[%c1_48, %c2_49, %c0_50, %c0_51, %c0_52] : memref<6x6x4x8x3xf32, #tpu.memory_space<vmem>>, vector<2x4x4x8x3xf32>
    %35 = vector.shape_cast %34 : vector<2x4x4x8x3xf32> to vector<256x3xf32>
    %c5 = arith.constant 5 : index
    %c0_53 = arith.constant 0 : index
    %c0_54 = arith.constant 0 : index
    %36 = vector.load %arg1[%c5, %c0_53, %c0_54] : memref<9x3x8xf32, #tpu.memory_space<vmem>>, vector<1x3x8xf32>
    %37 = vector.shape_cast %36 : vector<1x3x8xf32> to vector<3x8xf32>
    %cst_55 = arith.constant dense<0.000000e+00> : vector<256x8xf32>
    %38 = tpu.matmul %35, %37, %cst_55 {dimension_numbers = #tpu.dot_dimension_numbers<[1], [0], [0], [1], [0, 0, 1, 1], [], []>} : vector<256x3xf32>, vector<3x8xf32>, vector<256x8xf32> -> vector<256x8xf32>
    %39 = arith.addf %33, %38 : vector<256x8xf32>
    %c2_56 = arith.constant 2 : index
    %c0_57 = arith.constant 0 : index
    %c0_58 = arith.constant 0 : index
    %c0_59 = arith.constant 0 : index
    %c0_60 = arith.constant 0 : index
    %40 = vector.load %arg0[%c2_56, %c0_57, %c0_58, %c0_59, %c0_60] : memref<6x6x4x8x3xf32, #tpu.memory_space<vmem>>, vector<2x4x4x8x3xf32>
    %41 = vector.shape_cast %40 : vector<2x4x4x8x3xf32> to vector<256x3xf32>
    %c6 = arith.constant 6 : index
    %c0_61 = arith.constant 0 : index
    %c0_62 = arith.constant 0 : index
    %42 = vector.load %arg1[%c6, %c0_61, %c0_62] : memref<9x3x8xf32, #tpu.memory_space<vmem>>, vector<1x3x8xf32>
    %43 = vector.shape_cast %42 : vector<1x3x8xf32> to vector<3x8xf32>
    %cst_63 = arith.constant dense<0.000000e+00> : vector<256x8xf32>
    %44 = tpu.matmul %41, %43, %cst_63 {dimension_numbers = #tpu.dot_dimension_numbers<[1], [0], [0], [1], [0, 0, 1, 1], [], []>} : vector<256x3xf32>, vector<3x8xf32>, vector<256x8xf32> -> vector<256x8xf32>
    %45 = arith.addf %39, %44 : vector<256x8xf32>
    %c2_64 = arith.constant 2 : index
    %c1_65 = arith.constant 1 : index
    %c0_66 = arith.constant 0 : index
    %c0_67 = arith.constant 0 : index
    %c0_68 = arith.constant 0 : index
    %46 = vector.load %arg0[%c2_64, %c1_65, %c0_66, %c0_67, %c0_68] : memref<6x6x4x8x3xf32, #tpu.memory_space<vmem>>, vector<2x4x4x8x3xf32>
    %47 = vector.shape_cast %46 : vector<2x4x4x8x3xf32> to vector<256x3xf32>
    %c7 = arith.constant 7 : index
    %c0_69 = arith.constant 0 : index
    %c0_70 = arith.constant 0 : index
    %48 = vector.load %arg1[%c7, %c0_69, %c0_70] : memref<9x3x8xf32, #tpu.memory_space<vmem>>, vector<1x3x8xf32>
    %49 = vector.shape_cast %48 : vector<1x3x8xf32> to vector<3x8xf32>
    %cst_71 = arith.constant dense<0.000000e+00> : vector<256x8xf32>
    %50 = tpu.matmul %47, %49, %cst_71 {dimension_numbers = #tpu.dot_dimension_numbers<[1], [0], [0], [1], [0, 0, 1, 1], [], []>} : vector<256x3xf32>, vector<3x8xf32>, vector<256x8xf32> -> vector<256x8xf32>
    %51 = arith.addf %45, %50 : vector<256x8xf32>
    %c2_72 = arith.constant 2 : index
    %c2_73 = arith.constant 2 : index
    %c0_74 = arith.constant 0 : index
    %c0_75 = arith.constant 0 : index
    %c0_76 = arith.constant 0 : index
    %52 = vector.load %arg0[%c2_72, %c2_73, %c0_74, %c0_75, %c0_76] : memref<6x6x4x8x3xf32, #tpu.memory_space<vmem>>, vector<2x4x4x8x3xf32>
    %53 = vector.shape_cast %52 : vector<2x4x4x8x3xf32> to vector<256x3xf32>
    %c8 = arith.constant 8 : index
    %c0_77 = arith.constant 0 : index
    %c0_78 = arith.constant 0 : index
    %54 = vector.load %arg1[%c8, %c0_77, %c0_78] : memref<9x3x8xf32, #tpu.memory_space<vmem>>, vector<1x3x8xf32>
    %55 = vector.shape_cast %54 : vector<1x3x8xf32> to vector<3x8xf32>
    %cst_79 = arith.constant dense<0.000000e+00> : vector<256x8xf32>
    %56 = tpu.matmul %53, %55, %cst_79 {dimension_numbers = #tpu.dot_dimension_numbers<[1], [0], [0], [1], [0, 0, 1, 1], [], []>} : vector<256x3xf32>, vector<3x8xf32>, vector<256x8xf32> -> vector<256x8xf32>
    %57 = arith.addf %51, %56 : vector<256x8xf32>
    %58 = vector.extract_strided_slice %57 {offsets = [0, 0], sizes = [32, 8], strides = [1, 1]} : vector<256x8xf32> to vector<32x8xf32>
    %59 = vector.extract_strided_slice %57 {offsets = [32, 0], sizes = [32, 8], strides = [1, 1]} : vector<256x8xf32> to vector<32x8xf32>
    %60 = vector.extract_strided_slice %57 {offsets = [128, 0], sizes = [32, 8], strides = [1, 1]} : vector<256x8xf32> to vector<32x8xf32>
    %61 = vector.extract_strided_slice %57 {offsets = [160, 0], sizes = [32, 8], strides = [1, 1]} : vector<256x8xf32> to vector<32x8xf32>
    %62 = arith.maximumf %58, %59 : vector<32x8xf32>
    %63 = arith.maximumf %60, %61 : vector<32x8xf32>
    %64 = arith.maximumf %62, %63 : vector<32x8xf32>
    %65 = vector.broadcast %2 : vector<1x8xf32> to vector<32x8xf32>
    %66 = arith.addf %64, %65 : vector<32x8xf32>
    %cst_80 = arith.constant 0.000000e+00 : f32
    %67 = vector.broadcast %cst_80 : f32 to vector<32x8xf32>
    %68 = arith.maximumf %66, %67 : vector<32x8xf32>
    %69 = vector.shape_cast %68 : vector<32x8xf32> to vector<4x8x8xf32>
    %c1_81 = arith.constant 1 : index
    %c1_82 = arith.constant 1 : index
    %c0_83 = arith.constant 0 : index
    %c0_84 = arith.constant 0 : index
    %c0_85 = arith.constant 0 : index
    %70 = vector.load %arg8[%c1_81, %c1_82, %c0_83, %c0_84, %c0_85] : memref<4x4x4x8x8xf32, #tpu.memory_space<vmem>>, vector<1x1x4x8x8xf32>
    %71 = vector.shape_cast %70 : vector<1x1x4x8x8xf32> to vector<4x8x8xf32>
    %72 = vector.shape_cast %69 : vector<4x8x8xf32> to vector<1x1x4x8x8xf32>
    tpu.vector_store %arg8[%c1_81, %c1_82, %c0_83, %c0_84, %c0_85], %72 {strides = array<i32>} : memref<4x4x4x8x8xf32, #tpu.memory_space<vmem>>, vector<1x1x4x8x8xf32>,
    %73 = vector.extract_strided_slice %69 {offsets = [0, 2, 0], sizes = [4, 6, 8], strides = [1, 1, 1]} : vector<4x8x8xf32> to vector<4x6x8xf32>
    %c1_86 = arith.constant 1 : index
    %c3_87 = arith.constant 3 : index
    %c0_88 = arith.constant 0 : index
    %c0_89 = arith.constant 0 : index
    %c0_90 = arith.constant 0 : index
    %74 = vector.load %arg8[%c1_86, %c3_87, %c0_88, %c0_89, %c0_90] : memref<4x4x4x8x8xf32, #tpu.memory_space<vmem>>, vector<1x1x4x6x8xf32>
    %75 = vector.shape_cast %74 : vector<1x1x4x6x8xf32> to vector<4x6x8xf32>
    %76 = vector.shape_cast %73 : vector<4x6x8xf32> to vector<1x1x4x6x8xf32>
    tpu.vector_store %arg8[%c1_86, %c3_87, %c0_88, %c0_89, %c0_90], %76 {strides = array<i32>} : memref<4x4x4x8x8xf32, #tpu.memory_space<vmem>>, vector<1x1x4x6x8xf32>,
    %77 = vector.extract_strided_slice %69 {offsets = [1, 0, 0], sizes = [3, 8, 8], strides = [1, 1, 1]} : vector<4x8x8xf32> to vector<3x8x8xf32>
    %c3_91 = arith.constant 3 : index
    %c1_92 = arith.constant 1 : index
    %c0_93 = arith.constant 0 : index
    %c0_94 = arith.constant 0 : index
    %c0_95 = arith.constant 0 : index
    %78 = vector.load %arg8[%c3_91, %c1_92, %c0_93, %c0_94, %c0_95] : memref<4x4x4x8x8xf32, #tpu.memory_space<vmem>>, vector<1x1x3x8x8xf32>
    %79 = vector.shape_cast %78 : vector<1x1x3x8x8xf32> to vector<3x8x8xf32>
    %80 = vector.shape_cast %77 : vector<3x8x8xf32> to vector<1x1x3x8x8xf32>
    tpu.vector_store %arg8[%c3_91, %c1_92, %c0_93, %c0_94, %c0_95], %80 {strides = array<i32>} : memref<4x4x4x8x8xf32, #tpu.memory_space<vmem>>, vector<1x1x3x8x8xf32>,
    %81 = vector.extract_strided_slice %69 {offsets = [1, 2, 0], sizes = [3, 6, 8], strides = [1, 1, 1]} : vector<4x8x8xf32> to vector<3x6x8xf32>
    %c3_96 = arith.constant 3 : index
    %c3_97 = arith.constant 3 : index
    %c0_98 = arith.constant 0 : index
    %c0_99 = arith.constant 0 : index
    %c0_100 = arith.constant 0 : index
    %82 = vector.load %arg8[%c3_96, %c3_97, %c0_98, %c0_99, %c0_100] : memref<4x4x4x8x8xf32, #tpu.memory_space<vmem>>, vector<1x1x3x6x8xf32>
    %83 = vector.shape_cast %82 : vector<1x1x3x6x8xf32> to vector<3x6x8xf32>
    %84 = vector.shape_cast %81 : vector<3x6x8xf32> to vector<1x1x3x6x8xf32>
    tpu.vector_store %arg8[%c3_96, %c3_97, %c0_98, %c0_99, %c0_100], %84 {strides = array<i32>} : memref<4x4x4x8x8xf32, #tpu.memory_space<vmem>>, vector<1x1x3x6x8xf32>,
    %85 = vector.extract_strided_slice %57 {offsets = [64, 0], sizes = [32, 8], strides = [1, 1]} : vector<256x8xf32> to vector<32x8xf32>
    %86 = vector.extract_strided_slice %57 {offsets = [96, 0], sizes = [32, 8], strides = [1, 1]} : vector<256x8xf32> to vector<32x8xf32>
    %87 = vector.extract_strided_slice %57 {offsets = [192, 0], sizes = [32, 8], strides = [1, 1]} : vector<256x8xf32> to vector<32x8xf32>
    %88 = vector.extract_strided_slice %57 {offsets = [224, 0], sizes = [32, 8], strides = [1, 1]} : vector<256x8xf32> to vector<32x8xf32>
    %89 = arith.maximumf %85, %86 : vector<32x8xf32>
    %90 = arith.maximumf %87, %88 : vector<32x8xf32>
    %91 = arith.maximumf %89, %90 : vector<32x8xf32>
    %92 = vector.broadcast %2 : vector<1x8xf32> to vector<32x8xf32>
    %93 = arith.addf %91, %92 : vector<32x8xf32>
    %cst_101 = arith.constant 0.000000e+00 : f32
    %94 = vector.broadcast %cst_101 : f32 to vector<32x8xf32>
    %95 = arith.maximumf %93, %94 : vector<32x8xf32>
    %96 = vector.shape_cast %95 : vector<32x8xf32> to vector<4x8x8xf32>
    %c1_102 = arith.constant 1 : index
    %c2_103 = arith.constant 2 : index
    %c0_104 = arith.constant 0 : index
    %c0_105 = arith.constant 0 : index
    %c0_106 = arith.constant 0 : index
    %97 = vector.load %arg8[%c1_102, %c2_103, %c0_104, %c0_105, %c0_106] : memref<4x4x4x8x8xf32, #tpu.memory_space<vmem>>, vector<1x1x4x8x8xf32>
    %98 = vector.shape_cast %97 : vector<1x1x4x8x8xf32> to vector<4x8x8xf32>
    %99 = vector.shape_cast %96 : vector<4x8x8xf32> to vector<1x1x4x8x8xf32>
    tpu.vector_store %arg8[%c1_102, %c2_103, %c0_104, %c0_105, %c0_106], %99 {strides = array<i32>} : memref<4x4x4x8x8xf32, #tpu.memory_space<vmem>>, vector<1x1x4x8x8xf32>,
    %100 = vector.extract_strided_slice %96 {offsets = [0, 0, 0], sizes = [4, 6, 8], strides = [1, 1, 1]} : vector<4x8x8xf32> to vector<4x6x8xf32>
    %c1_107 = arith.constant 1 : index
    %c0_108 = arith.constant 0 : index
    %c0_109 = arith.constant 0 : index
    %c2_110 = arith.constant 2 : index
    %c0_111 = arith.constant 0 : index
    %101 = vector.load %arg8[%c1_107, %c0_108, %c0_109, %c2_110, %c0_111] : memref<4x4x4x8x8xf32, #tpu.memory_space<vmem>>, vector<1x1x4x6x8xf32>
    %102 = vector.shape_cast %101 : vector<1x1x4x6x8xf32> to vector<4x6x8xf32>
    %103 = vector.shape_cast %100 : vector<4x6x8xf32> to vector<1x1x4x6x8xf32>
    tpu.vector_store %arg8[%c1_107, %c0_108, %c0_109, %c2_110, %c0_111], %103 {strides = array<i32>} : memref<4x4x4x8x8xf32, #tpu.memory_space<vmem>>, vector<1x1x4x6x8xf32>,
    %104 = vector.extract_strided_slice %96 {offsets = [1, 0, 0], sizes = [3, 8, 8], strides = [1, 1, 1]} : vector<4x8x8xf32> to vector<3x8x8xf32>
    %c3_112 = arith.constant 3 : index
    %c2_113 = arith.constant 2 : index
    %c0_114 = arith.constant 0 : index
    %c0_115 = arith.constant 0 : index
    %c0_116 = arith.constant 0 : index
    %105 = vector.load %arg8[%c3_112, %c2_113, %c0_114, %c0_115, %c0_116] : memref<4x4x4x8x8xf32, #tpu.memory_space<vmem>>, vector<1x1x3x8x8xf32>
    %106 = vector.shape_cast %105 : vector<1x1x3x8x8xf32> to vector<3x8x8xf32>
    %107 = vector.shape_cast %104 : vector<3x8x8xf32> to vector<1x1x3x8x8xf32>
    tpu.vector_store %arg8[%c3_112, %c2_113, %c0_114, %c0_115, %c0_116], %107 {strides = array<i32>} : memref<4x4x4x8x8xf32, #tpu.memory_space<vmem>>, vector<1x1x3x8x8xf32>,
    %108 = vector.extract_strided_slice %96 {offsets = [1, 0, 0], sizes = [3, 6, 8], strides = [1, 1, 1]} : vector<4x8x8xf32> to vector<3x6x8xf32>
    %c3_117 = arith.constant 3 : index
    %c0_118 = arith.constant 0 : index
    %c0_119 = arith.constant 0 : index
    %c2_120 = arith.constant 2 : index
    %c0_121 = arith.constant 0 : index
    %109 = vector.load %arg8[%c3_117, %c0_118, %c0_119, %c2_120, %c0_121] : memref<4x4x4x8x8xf32, #tpu.memory_space<vmem>>, vector<1x1x3x6x8xf32>
    %110 = vector.shape_cast %109 : vector<1x1x3x6x8xf32> to vector<3x6x8xf32>
    %111 = vector.shape_cast %108 : vector<3x6x8xf32> to vector<1x1x3x6x8xf32>
    tpu.vector_store %arg8[%c3_117, %c0_118, %c0_119, %c2_120, %c0_121], %111 {strides = array<i32>} : memref<4x4x4x8x8xf32, #tpu.memory_space<vmem>>, vector<1x1x3x6x8xf32>,
    %cst_122 = arith.constant 0.000000e+00 : f32
    %112 = vector.broadcast %cst_122 : f32 to vector<256x8xf32>
    %c2_123 = arith.constant 2 : index
    %c0_124 = arith.constant 0 : index
    %c0_125 = arith.constant 0 : index
    %c0_126 = arith.constant 0 : index
    %c0_127 = arith.constant 0 : index
    %113 = vector.load %arg0[%c2_123, %c0_124, %c0_125, %c0_126, %c0_127] : memref<6x6x4x8x3xf32, #tpu.memory_space<vmem>>, vector<2x4x4x8x3xf32>
    %114 = vector.shape_cast %113 : vector<2x4x4x8x3xf32> to vector<256x3xf32>
    %c0_128 = arith.constant 0 : index
    %c0_129 = arith.constant 0 : index
    %c0_130 = arith.constant 0 : index
    %115 = vector.load %arg1[%c0_128, %c0_129, %c0_130] : memref<9x3x8xf32, #tpu.memory_space<vmem>>, vector<1x3x8xf32>
    %116 = vector.shape_cast %115 : vector<1x3x8xf32> to vector<3x8xf32>
    %cst_131 = arith.constant dense<0.000000e+00> : vector<256x8xf32>
    %117 = tpu.matmul %114, %116, %cst_131 {dimension_numbers = #tpu.dot_dimension_numbers<[1], [0], [0], [1], [0, 0, 1, 1], [], []>} : vector<256x3xf32>, vector<3x8xf32>, vector<256x8xf32> -> vector<256x8xf32>
    %118 = arith.addf %112, %117 : vector<256x8xf32>
    %c2_132 = arith.constant 2 : index
    %c1_133 = arith.constant 1 : index
    %c0_134 = arith.constant 0 : index
    %c0_135 = arith.constant 0 : index
    %c0_136 = arith.constant 0 : index
    %119 = vector.load %arg0[%c2_132, %c1_133, %c0_134, %c0_135, %c0_136] : memref<6x6x4x8x3xf32, #tpu.memory_space<vmem>>, vector<2x4x4x8x3xf32>
    %120 = vector.shape_cast %119 : vector<2x4x4x8x3xf32> to vector<256x3xf32>
    %c1_137 = arith.constant 1 : index
    %c0_138 = arith.constant 0 : index
    %c0_139 = arith.constant 0 : index
    %121 = vector.load %arg1[%c1_137, %c0_138, %c0_139] : memref<9x3x8xf32, #tpu.memory_space<vmem>>, vector<1x3x8xf32>
    %122 = vector.shape_cast %121 : vector<1x3x8xf32> to vector<3x8xf32>
    %cst_140 = arith.constant dense<0.000000e+00> : vector<256x8xf32>
    %123 = tpu.matmul %120, %122, %cst_140 {dimension_numbers = #tpu.dot_dimension_numbers<[1], [0], [0], [1], [0, 0, 1, 1], [], []>} : vector<256x3xf32>, vector<3x8xf32>, vector<256x8xf32> -> vector<256x8xf32>
    %124 = arith.addf %118, %123 : vector<256x8xf32>
    %c2_141 = arith.constant 2 : index
    %c2_142 = arith.constant 2 : index
    %c0_143 = arith.constant 0 : index
    %c0_144 = arith.constant 0 : index
    %c0_145 = arith.constant 0 : index
    %125 = vector.load %arg0[%c2_141, %c2_142, %c0_143, %c0_144, %c0_145] : memref<6x6x4x8x3xf32, #tpu.memory_space<vmem>>, vector<2x4x4x8x3xf32>
    %126 = vector.shape_cast %125 : vector<2x4x4x8x3xf32> to vector<256x3xf32>
    %c2_146 = arith.constant 2 : index
    %c0_147 = arith.constant 0 : index
    %c0_148 = arith.constant 0 : index
    %127 = vector.load %arg1[%c2_146, %c0_147, %c0_148] : memref<9x3x8xf32, #tpu.memory_space<vmem>>, vector<1x3x8xf32>
    %128 = vector.shape_cast %127 : vector<1x3x8xf32> to vector<3x8xf32>
    %cst_149 = arith.constant dense<0.000000e+00> : vector<256x8xf32>
    %129 = tpu.matmul %126, %128, %cst_149 {dimension_numbers = #tpu.dot_dimension_numbers<[1], [0], [0], [1], [0, 0, 1, 1], [], []>} : vector<256x3xf32>, vector<3x8xf32>, vector<256x8xf32> -> vector<256x8xf32>
    %130 = arith.addf %124, %129 : vector<256x8xf32>
    %c3_150 = arith.constant 3 : index
    %c0_151 = arith.constant 0 : index
    %c0_152 = arith.constant 0 : index
    %c0_153 = arith.constant 0 : index
    %c0_154 = arith.constant 0 : index
    %131 = vector.load %arg0[%c3_150, %c0_151, %c0_152, %c0_153, %c0_154] : memref<6x6x4x8x3xf32, #tpu.memory_space<vmem>>, vector<2x4x4x8x3xf32>
    %132 = vector.shape_cast %131 : vector<2x4x4x8x3xf32> to vector<256x3xf32>
    %c3_155 = arith.constant 3 : index
    %c0_156 = arith.constant 0 : index
    %c0_157 = arith.constant 0 : index
    %133 = vector.load %arg1[%c3_155, %c0_156, %c0_157] : memref<9x3x8xf32, #tpu.memory_space<vmem>>, vector<1x3x8xf32>
    %134 = vector.shape_cast %133 : vector<1x3x8xf32> to vector<3x8xf32>
    %cst_158 = arith.constant dense<0.000000e+00> : vector<256x8xf32>
    %135 = tpu.matmul %132, %134, %cst_158 {dimension_numbers = #tpu.dot_dimension_numbers<[1], [0], [0], [1], [0, 0, 1, 1], [], []>} : vector<256x3xf32>, vector<3x8xf32>, vector<256x8xf32> -> vector<256x8xf32>
    %136 = arith.addf %130, %135 : vector<256x8xf32>
    %c3_159 = arith.constant 3 : index
    %c1_160 = arith.constant 1 : index
    %c0_161 = arith.constant 0 : index
    %c0_162 = arith.constant 0 : index
    %c0_163 = arith.constant 0 : index
    %137 = vector.load %arg0[%c3_159, %c1_160, %c0_161, %c0_162, %c0_163] : memref<6x6x4x8x3xf32, #tpu.memory_space<vmem>>, vector<2x4x4x8x3xf32>
    %138 = vector.shape_cast %137 : vector<2x4x4x8x3xf32> to vector<256x3xf32>
    %c4_164 = arith.constant 4 : index
    %c0_165 = arith.constant 0 : index
    %c0_166 = arith.constant 0 : index
    %139 = vector.load %arg1[%c4_164, %c0_165, %c0_166] : memref<9x3x8xf32, #tpu.memory_space<vmem>>, vector<1x3x8xf32>
    %140 = vector.shape_cast %139 : vector<1x3x8xf32> to vector<3x8xf32>
    %cst_167 = arith.constant dense<0.000000e+00> : vector<256x8xf32>
    %141 = tpu.matmul %138, %140, %cst_167 {dimension_numbers = #tpu.dot_dimension_numbers<[1], [0], [0], [1], [0, 0, 1, 1], [], []>} : vector<256x3xf32>, vector<3x8xf32>, vector<256x8xf32> -> vector<256x8xf32>
    %142 = arith.addf %136, %141 : vector<256x8xf32>
    %c3_168 = arith.constant 3 : index
    %c2_169 = arith.constant 2 : index
    %c0_170 = arith.constant 0 : index
    %c0_171 = arith.constant 0 : index
    %c0_172 = arith.constant 0 : index
    %143 = vector.load %arg0[%c3_168, %c2_169, %c0_170, %c0_171, %c0_172] : memref<6x6x4x8x3xf32, #tpu.memory_space<vmem>>, vector<2x4x4x8x3xf32>
    %144 = vector.shape_cast %143 : vector<2x4x4x8x3xf32> to vector<256x3xf32>
    %c5_173 = arith.constant 5 : index
    %c0_174 = arith.constant 0 : index
    %c0_175 = arith.constant 0 : index
    %145 = vector.load %arg1[%c5_173, %c0_174, %c0_175] : memref<9x3x8xf32, #tpu.memory_space<vmem>>, vector<1x3x8xf32>
    %146 = vector.shape_cast %145 : vector<1x3x8xf32> to vector<3x8xf32>
    %cst_176 = arith.constant dense<0.000000e+00> : vector<256x8xf32>
    %147 = tpu.matmul %144, %146, %cst_176 {dimension_numbers = #tpu.dot_dimension_numbers<[1], [0], [0], [1], [0, 0, 1, 1], [], []>} : vector<256x3xf32>, vector<3x8xf32>, vector<256x8xf32> -> vector<256x8xf32>
    %148 = arith.addf %142, %147 : vector<256x8xf32>
    %c4_177 = arith.constant 4 : index
    %c0_178 = arith.constant 0 : index
    %c0_179 = arith.constant 0 : index
    %c0_180 = arith.constant 0 : index
    %c0_181 = arith.constant 0 : index
    %149 = vector.load %arg0[%c4_177, %c0_178, %c0_179, %c0_180, %c0_181] : memref<6x6x4x8x3xf32, #tpu.memory_space<vmem>>, vector<2x4x4x8x3xf32>
    %150 = vector.shape_cast %149 : vector<2x4x4x8x3xf32> to vector<256x3xf32>
    %c6_182 = arith.constant 6 : index
    %c0_183 = arith.constant 0 : index
    %c0_184 = arith.constant 0 : index
    %151 = vector.load %arg1[%c6_182, %c0_183, %c0_184] : memref<9x3x8xf32, #tpu.memory_space<vmem>>, vector<1x3x8xf32>
    %152 = vector.shape_cast %151 : vector<1x3x8xf32> to vector<3x8xf32>
    %cst_185 = arith.constant dense<0.000000e+00> : vector<256x8xf32>
    %153 = tpu.matmul %150, %152, %cst_185 {dimension_numbers = #tpu.dot_dimension_numbers<[1], [0], [0], [1], [0, 0, 1, 1], [], []>} : vector<256x3xf32>, vector<3x8xf32>, vector<256x8xf32> -> vector<256x8xf32>
    %154 = arith.addf %148, %153 : vector<256x8xf32>
    %c4_186 = arith.constant 4 : index
    %c1_187 = arith.constant 1 : index
    %c0_188 = arith.constant 0 : index
    %c0_189 = arith.constant 0 : index
    %c0_190 = arith.constant 0 : index
    %155 = vector.load %arg0[%c4_186, %c1_187, %c0_188, %c0_189, %c0_190] : memref<6x6x4x8x3xf32, #tpu.memory_space<vmem>>, vector<2x4x4x8x3xf32>
    %156 = vector.shape_cast %155 : vector<2x4x4x8x3xf32> to vector<256x3xf32>
    %c7_191 = arith.constant 7 : index
    %c0_192 = arith.constant 0 : index
    %c0_193 = arith.constant 0 : index
    %157 = vector.load %arg1[%c7_191, %c0_192, %c0_193] : memref<9x3x8xf32, #tpu.memory_space<vmem>>, vector<1x3x8xf32>
    %158 = vector.shape_cast %157 : vector<1x3x8xf32> to vector<3x8xf32>
    %cst_194 = arith.constant dense<0.000000e+00> : vector<256x8xf32>
    %159 = tpu.matmul %156, %158, %cst_194 {dimension_numbers = #tpu.dot_dimension_numbers<[1], [0], [0], [1], [0, 0, 1, 1], [], []>} : vector<256x3xf32>, vector<3x8xf32>, vector<256x8xf32> -> vector<256x8xf32>
    %160 = arith.addf %154, %159 : vector<256x8xf32>
    %c4_195 = arith.constant 4 : index
    %c2_196 = arith.constant 2 : index
    %c0_197 = arith.constant 0 : index
    %c0_198 = arith.constant 0 : index
    %c0_199 = arith.constant 0 : index
    %161 = vector.load %arg0[%c4_195, %c2_196, %c0_197, %c0_198, %c0_199] : memref<6x6x4x8x3xf32, #tpu.memory_space<vmem>>, vector<2x4x4x8x3xf32>
    %162 = vector.shape_cast %161 : vector<2x4x4x8x3xf32> to vector<256x3xf32>
    %c8_200 = arith.constant 8 : index
    %c0_201 = arith.constant 0 : index
    %c0_202 = arith.constant 0 : index
    %163 = vector.load %arg1[%c8_200, %c0_201, %c0_202] : memref<9x3x8xf32, #tpu.memory_space<vmem>>, vector<1x3x8xf32>
    %164 = vector.shape_cast %163 : vector<1x3x8xf32> to vector<3x8xf32>
    %cst_203 = arith.constant dense<0.000000e+00> : vector<256x8xf32>
    %165 = tpu.matmul %162, %164, %cst_203 {dimension_numbers = #tpu.dot_dimension_numbers<[1], [0], [0], [1], [0, 0, 1, 1], [], []>} : vector<256x3xf32>, vector<3x8xf32>, vector<256x8xf32> -> vector<256x8xf32>
    %166 = arith.addf %160, %165 : vector<256x8xf32>
    %167 = vector.extract_strided_slice %166 {offsets = [0, 0], sizes = [32, 8], strides = [1, 1]} : vector<256x8xf32> to vector<32x8xf32>
    %168 = vector.extract_strided_slice %166 {offsets = [32, 0], sizes = [32, 8], strides = [1, 1]} : vector<256x8xf32> to vector<32x8xf32>
    %169 = vector.extract_strided_slice %166 {offsets = [128, 0], sizes = [32, 8], strides = [1, 1]} : vector<256x8xf32> to vector<32x8xf32>
    %170 = vector.extract_strided_slice %166 {offsets = [160, 0], sizes = [32, 8], strides = [1, 1]} : vector<256x8xf32> to vector<32x8xf32>
    %171 = arith.maximumf %167, %168 : vector<32x8xf32>
    %172 = arith.maximumf %169, %170 : vector<32x8xf32>
    %173 = arith.maximumf %171, %172 : vector<32x8xf32>
    %174 = vector.broadcast %2 : vector<1x8xf32> to vector<32x8xf32>
    %175 = arith.addf %173, %174 : vector<32x8xf32>
    %cst_204 = arith.constant 0.000000e+00 : f32
    %176 = vector.broadcast %cst_204 : f32 to vector<32x8xf32>
    %177 = arith.maximumf %175, %176 : vector<32x8xf32>
    %178 = vector.shape_cast %177 : vector<32x8xf32> to vector<4x8x8xf32>
    %c2_205 = arith.constant 2 : index
    %c1_206 = arith.constant 1 : index
    %c0_207 = arith.constant 0 : index
    %c0_208 = arith.constant 0 : index
    %c0_209 = arith.constant 0 : index
    %179 = vector.load %arg8[%c2_205, %c1_206, %c0_207, %c0_208, %c0_209] : memref<4x4x4x8x8xf32, #tpu.memory_space<vmem>>, vector<1x1x4x8x8xf32>
    %180 = vector.shape_cast %179 : vector<1x1x4x8x8xf32> to vector<4x8x8xf32>
    %181 = vector.shape_cast %178 : vector<4x8x8xf32> to vector<1x1x4x8x8xf32>
    tpu.vector_store %arg8[%c2_205, %c1_206, %c0_207, %c0_208, %c0_209], %181 {strides = array<i32>} : memref<4x4x4x8x8xf32, #tpu.memory_space<vmem>>, vector<1x1x4x8x8xf32>,
    %182 = vector.extract_strided_slice %178 {offsets = [0, 2, 0], sizes = [4, 6, 8], strides = [1, 1, 1]} : vector<4x8x8xf32> to vector<4x6x8xf32>
    %c2_210 = arith.constant 2 : index
    %c3_211 = arith.constant 3 : index
    %c0_212 = arith.constant 0 : index
    %c0_213 = arith.constant 0 : index
    %c0_214 = arith.constant 0 : index
    %183 = vector.load %arg8[%c2_210, %c3_211, %c0_212, %c0_213, %c0_214] : memref<4x4x4x8x8xf32, #tpu.memory_space<vmem>>, vector<1x1x4x6x8xf32>
    %184 = vector.shape_cast %183 : vector<1x1x4x6x8xf32> to vector<4x6x8xf32>
    %185 = vector.shape_cast %182 : vector<4x6x8xf32> to vector<1x1x4x6x8xf32>
    tpu.vector_store %arg8[%c2_210, %c3_211, %c0_212, %c0_213, %c0_214], %185 {strides = array<i32>} : memref<4x4x4x8x8xf32, #tpu.memory_space<vmem>>, vector<1x1x4x6x8xf32>,
    %186 = vector.extract_strided_slice %178 {offsets = [0, 0, 0], sizes = [3, 8, 8], strides = [1, 1, 1]} : vector<4x8x8xf32> to vector<3x8x8xf32>
    %c0_215 = arith.constant 0 : index
    %c1_216 = arith.constant 1 : index
    %c1_217 = arith.constant 1 : index
    %c0_218 = arith.constant 0 : index
    %c0_219 = arith.constant 0 : index
    %187 = vector.load %arg8[%c0_215, %c1_216, %c1_217, %c0_218, %c0_219] : memref<4x4x4x8x8xf32, #tpu.memory_space<vmem>>, vector<1x1x3x8x8xf32>
    %188 = vector.shape_cast %187 : vector<1x1x3x8x8xf32> to vector<3x8x8xf32>
    %189 = vector.shape_cast %186 : vector<3x8x8xf32> to vector<1x1x3x8x8xf32>
    tpu.vector_store %arg8[%c0_215, %c1_216, %c1_217, %c0_218, %c0_219], %189 {strides = array<i32>} : memref<4x4x4x8x8xf32, #tpu.memory_space<vmem>>, vector<1x1x3x8x8xf32>,
    %190 = vector.extract_strided_slice %178 {offsets = [0, 2, 0], sizes = [3, 6, 8], strides = [1, 1, 1]} : vector<4x8x8xf32> to vector<3x6x8xf32>
    %c0_220 = arith.constant 0 : index
    %c3_221 = arith.constant 3 : index
    %c1_222 = arith.constant 1 : index
    %c0_223 = arith.constant 0 : index
    %c0_224 = arith.constant 0 : index
    %191 = vector.load %arg8[%c0_220, %c3_221, %c1_222, %c0_223, %c0_224] : memref<4x4x4x8x8xf32, #tpu.memory_space<vmem>>, vector<1x1x3x6x8xf32>
    %192 = vector.shape_cast %191 : vector<1x1x3x6x8xf32> to vector<3x6x8xf32>
    %193 = vector.shape_cast %190 : vector<3x6x8xf32> to vector<1x1x3x6x8xf32>
    tpu.vector_store %arg8[%c0_220, %c3_221, %c1_222, %c0_223, %c0_224], %193 {strides = array<i32>} : memref<4x4x4x8x8xf32, #tpu.memory_space<vmem>>, vector<1x1x3x6x8xf32>,
    %194 = vector.extract_strided_slice %166 {offsets = [64, 0], sizes = [32, 8], strides = [1, 1]} : vector<256x8xf32> to vector<32x8xf32>
    %195 = vector.extract_strided_slice %166 {offsets = [96, 0], sizes = [32, 8], strides = [1, 1]} : vector<256x8xf32> to vector<32x8xf32>
    %196 = vector.extract_strided_slice %166 {offsets = [192, 0], sizes = [32, 8], strides = [1, 1]} : vector<256x8xf32> to vector<32x8xf32>
    %197 = vector.extract_strided_slice %166 {offsets = [224, 0], sizes = [32, 8], strides = [1, 1]} : vector<256x8xf32> to vector<32x8xf32>
    %198 = arith.maximumf %194, %195 : vector<32x8xf32>
    %199 = arith.maximumf %196, %197 : vector<32x8xf32>
    %200 = arith.maximumf %198, %199 : vector<32x8xf32>
    %201 = vector.broadcast %2 : vector<1x8xf32> to vector<32x8xf32>
    %202 = arith.addf %200, %201 : vector<32x8xf32>
    %cst_225 = arith.constant 0.000000e+00 : f32
    %203 = vector.broadcast %cst_225 : f32 to vector<32x8xf32>
    %204 = arith.maximumf %202, %203 : vector<32x8xf32>
    %205 = vector.shape_cast %204 : vector<32x8xf32> to vector<4x8x8xf32>
    %c2_226 = arith.constant 2 : index
    %c2_227 = arith.constant 2 : index
    %c0_228 = arith.constant 0 : index
    %c0_229 = arith.constant 0 : index
    %c0_230 = arith.constant 0 : index
    %206 = vector.load %arg8[%c2_226, %c2_227, %c0_228, %c0_229, %c0_230] : memref<4x4x4x8x8xf32, #tpu.memory_space<vmem>>, vector<1x1x4x8x8xf32>
    %207 = vector.shape_cast %206 : vector<1x1x4x8x8xf32> to vector<4x8x8xf32>
    %208 = vector.shape_cast %205 : vector<4x8x8xf32> to vector<1x1x4x8x8xf32>
    tpu.vector_store %arg8[%c2_226, %c2_227, %c0_228, %c0_229, %c0_230], %208 {strides = array<i32>} : memref<4x4x4x8x8xf32, #tpu.memory_space<vmem>>, vector<1x1x4x8x8xf32>,
    %209 = vector.extract_strided_slice %205 {offsets = [0, 0, 0], sizes = [4, 6, 8], strides = [1, 1, 1]} : vector<4x8x8xf32> to vector<4x6x8xf32>
    %c2_231 = arith.constant 2 : index
    %c0_232 = arith.constant 0 : index
    %c0_233 = arith.constant 0 : index
    %c2_234 = arith.constant 2 : index
    %c0_235 = arith.constant 0 : index
    %210 = vector.load %arg8[%c2_231, %c0_232, %c0_233, %c2_234, %c0_235] : memref<4x4x4x8x8xf32, #tpu.memory_space<vmem>>, vector<1x1x4x6x8xf32>
    %211 = vector.shape_cast %210 : vector<1x1x4x6x8xf32> to vector<4x6x8xf32>
    %212 = vector.shape_cast %209 : vector<4x6x8xf32> to vector<1x1x4x6x8xf32>
    tpu.vector_store %arg8[%c2_231, %c0_232, %c0_233, %c2_234, %c0_235], %212 {strides = array<i32>} : memref<4x4x4x8x8xf32, #tpu.memory_space<vmem>>, vector<1x1x4x6x8xf32>,
    %213 = vector.extract_strided_slice %205 {offsets = [0, 0, 0], sizes = [3, 8, 8], strides = [1, 1, 1]} : vector<4x8x8xf32> to vector<3x8x8xf32>
    %c0_236 = arith.constant 0 : index
    %c2_237 = arith.constant 2 : index
    %c1_238 = arith.constant 1 : index
    %c0_239 = arith.constant 0 : index
    %c0_240 = arith.constant 0 : index
    %214 = vector.load %arg8[%c0_236, %c2_237, %c1_238, %c0_239, %c0_240] : memref<4x4x4x8x8xf32, #tpu.memory_space<vmem>>, vector<1x1x3x8x8xf32>
    %215 = vector.shape_cast %214 : vector<1x1x3x8x8xf32> to vector<3x8x8xf32>
    %216 = vector.shape_cast %213 : vector<3x8x8xf32> to vector<1x1x3x8x8xf32>
    tpu.vector_store %arg8[%c0_236, %c2_237, %c1_238, %c0_239, %c0_240], %216 {strides = array<i32>} : memref<4x4x4x8x8xf32, #tpu.memory_space<vmem>>, vector<1x1x3x8x8xf32>,
    %217 = vector.extract_strided_slice %205 {offsets = [0, 0, 0], sizes = [3, 6, 8], strides = [1, 1, 1]} : vector<4x8x8xf32> to vector<3x6x8xf32>
    %c0_241 = arith.constant 0 : index
    %c0_242 = arith.constant 0 : index
    %c1_243 = arith.constant 1 : index
    %c2_244 = arith.constant 2 : index
    %c0_245 = arith.constant 0 : index
    %218 = vector.load %arg8[%c0_241, %c0_242, %c1_243, %c2_244, %c0_245] : memref<4x4x4x8x8xf32, #tpu.memory_space<vmem>>, vector<1x1x3x6x8xf32>
    %219 = vector.shape_cast %218 : vector<1x1x3x6x8xf32> to vector<3x6x8xf32>
    %220 = vector.shape_cast %217 : vector<3x6x8xf32> to vector<1x1x3x6x8xf32>
    tpu.vector_store %arg8[%c0_241, %c0_242, %c1_243, %c2_244, %c0_245], %220 {strides = array<i32>} : memref<4x4x4x8x8xf32, #tpu.memory_space<vmem>>, vector<1x1x3x6x8xf32>,
    %cst_246 = arith.constant 0.000000e+00 : f32
    %221 = vector.broadcast %cst_246 : f32 to vector<128x32xf32>
    %c0_247 = arith.constant 0 : index
    %c0_248 = arith.constant 0 : index
    %c0_249 = arith.constant 0 : index
    %c0_250 = arith.constant 0 : index
    %c0_251 = arith.constant 0 : index
    %222 = vector.load %arg8[%c0_247, %c0_248, %c0_249, %c0_250, %c0_251] : memref<4x4x4x8x8xf32, #tpu.memory_space<vmem>>, vector<2x2x4x8x8xf32>
    %223 = vector.shape_cast %222 : vector<2x2x4x8x8xf32> to vector<128x8xf32>
    %c0_252 = arith.constant 0 : index
    %c0_253 = arith.constant 0 : index
    %c0_254 = arith.constant 0 : index
    %224 = vector.load %arg3[%c0_252, %c0_253, %c0_254] : memref<9x8x32xf32, #tpu.memory_space<vmem>>, vector<1x8x32xf32>
    %225 = vector.shape_cast %224 : vector<1x8x32xf32> to vector<8x32xf32>
    %cst_255 = arith.constant dense<0.000000e+00> : vector<128x32xf32>
    %226 = tpu.matmul %223, %225, %cst_255 {dimension_numbers = #tpu.dot_dimension_numbers<[1], [0], [0], [1], [0, 0, 1, 1], [], []>} : vector<128x8xf32>, vector<8x32xf32>, vector<128x32xf32> -> vector<128x32xf32>
    %227 = arith.addf %221, %226 : vector<128x32xf32>
    %c0_256 = arith.constant 0 : index
    %c1_257 = arith.constant 1 : index
    %c0_258 = arith.constant 0 : index
    %c0_259 = arith.constant 0 : index
    %c0_260 = arith.constant 0 : index
    %228 = vector.load %arg8[%c0_256, %c1_257, %c0_258, %c0_259, %c0_260] : memref<4x4x4x8x8xf32, #tpu.memory_space<vmem>>, vector<2x2x4x8x8xf32>
    %229 = vector.shape_cast %228 : vector<2x2x4x8x8xf32> to vector<128x8xf32>
    %c1_261 = arith.constant 1 : index
    %c0_262 = arith.constant 0 : index
    %c0_263 = arith.constant 0 : index
    %230 = vector.load %arg3[%c1_261, %c0_262, %c0_263] : memref<9x8x32xf32, #tpu.memory_space<vmem>>, vector<1x8x32xf32>
    %231 = vector.shape_cast %230 : vector<1x8x32xf32> to vector<8x32xf32>
    %cst_264 = arith.constant dense<0.000000e+00> : vector<128x32xf32>
    %232 = tpu.matmul %229, %231, %cst_264 {dimension_numbers = #tpu.dot_dimension_numbers<[1], [0], [0], [1], [0, 0, 1, 1], [], []>} : vector<128x8xf32>, vector<8x32xf32>, vector<128x32xf32> -> vector<128x32xf32>
    %233 = arith.addf %227, %232 : vector<128x32xf32>
    %c0_265 = arith.constant 0 : index
    %c2_266 = arith.constant 2 : index
    %c0_267 = arith.constant 0 : index
    %c0_268 = arith.constant 0 : index
    %c0_269 = arith.constant 0 : index
    %234 = vector.load %arg8[%c0_265, %c2_266, %c0_267, %c0_268, %c0_269] : memref<4x4x4x8x8xf32, #tpu.memory_space<vmem>>, vector<2x2x4x8x8xf32>
    %235 = vector.shape_cast %234 : vector<2x2x4x8x8xf32> to vector<128x8xf32>
    %c2_270 = arith.constant 2 : index
    %c0_271 = arith.constant 0 : index
    %c0_272 = arith.constant 0 : index
    %236 = vector.load %arg3[%c2_270, %c0_271, %c0_272] : memref<9x8x32xf32, #tpu.memory_space<vmem>>, vector<1x8x32xf32>
    %237 = vector.shape_cast %236 : vector<1x8x32xf32> to vector<8x32xf32>
    %cst_273 = arith.constant dense<0.000000e+00> : vector<128x32xf32>
    %238 = tpu.matmul %235, %237, %cst_273 {dimension_numbers = #tpu.dot_dimension_numbers<[1], [0], [0], [1], [0, 0, 1, 1], [], []>} : vector<128x8xf32>, vector<8x32xf32>, vector<128x32xf32> -> vector<128x32xf32>
    %239 = arith.addf %233, %238 : vector<128x32xf32>
    %c1_274 = arith.constant 1 : index
    %c0_275 = arith.constant 0 : index
    %c0_276 = arith.constant 0 : index
    %c0_277 = arith.constant 0 : index
    %c0_278 = arith.constant 0 : index
    %240 = vector.load %arg8[%c1_274, %c0_275, %c0_276, %c0_277, %c0_278] : memref<4x4x4x8x8xf32, #tpu.memory_space<vmem>>, vector<2x2x4x8x8xf32>
    %241 = vector.shape_cast %240 : vector<2x2x4x8x8xf32> to vector<128x8xf32>
    %c3_279 = arith.constant 3 : index
    %c0_280 = arith.constant 0 : index
    %c0_281 = arith.constant 0 : index
    %242 = vector.load %arg3[%c3_279, %c0_280, %c0_281] : memref<9x8x32xf32, #tpu.memory_space<vmem>>, vector<1x8x32xf32>
    %243 = vector.shape_cast %242 : vector<1x8x32xf32> to vector<8x32xf32>
    %cst_282 = arith.constant dense<0.000000e+00> : vector<128x32xf32>
    %244 = tpu.matmul %241, %243, %cst_282 {dimension_numbers = #tpu.dot_dimension_numbers<[1], [0], [0], [1], [0, 0, 1, 1], [], []>} : vector<128x8xf32>, vector<8x32xf32>, vector<128x32xf32> -> vector<128x32xf32>
    %245 = arith.addf %239, %244 : vector<128x32xf32>
    %c1_283 = arith.constant 1 : index
    %c1_284 = arith.constant 1 : index
    %c0_285 = arith.constant 0 : index
    %c0_286 = arith.constant 0 : index
    %c0_287 = arith.constant 0 : index
    %246 = vector.load %arg8[%c1_283, %c1_284, %c0_285, %c0_286, %c0_287] : memref<4x4x4x8x8xf32, #tpu.memory_space<vmem>>, vector<2x2x4x8x8xf32>
    %247 = vector.shape_cast %246 : vector<2x2x4x8x8xf32> to vector<128x8xf32>
    %c4_288 = arith.constant 4 : index
    %c0_289 = arith.constant 0 : index
    %c0_290 = arith.constant 0 : index
    %248 = vector.load %arg3[%c4_288, %c0_289, %c0_290] : memref<9x8x32xf32, #tpu.memory_space<vmem>>, vector<1x8x32xf32>
    %249 = vector.shape_cast %248 : vector<1x8x32xf32> to vector<8x32xf32>
    %cst_291 = arith.constant dense<0.000000e+00> : vector<128x32xf32>
    %250 = tpu.matmul %247, %249, %cst_291 {dimension_numbers = #tpu.dot_dimension_numbers<[1], [0], [0], [1], [0, 0, 1, 1], [], []>} : vector<128x8xf32>, vector<8x32xf32>, vector<128x32xf32> -> vector<128x32xf32>
    %251 = arith.addf %245, %250 : vector<128x32xf32>
    %c1_292 = arith.constant 1 : index
    %c2_293 = arith.constant 2 : index
    %c0_294 = arith.constant 0 : index
    %c0_295 = arith.constant 0 : index
    %c0_296 = arith.constant 0 : index
    %252 = vector.load %arg8[%c1_292, %c2_293, %c0_294, %c0_295, %c0_296] : memref<4x4x4x8x8xf32, #tpu.memory_space<vmem>>, vector<2x2x4x8x8xf32>
    %253 = vector.shape_cast %252 : vector<2x2x4x8x8xf32> to vector<128x8xf32>
    %c5_297 = arith.constant 5 : index
    %c0_298 = arith.constant 0 : index
    %c0_299 = arith.constant 0 : index
    %254 = vector.load %arg3[%c5_297, %c0_298, %c0_299] : memref<9x8x32xf32, #tpu.memory_space<vmem>>, vector<1x8x32xf32>
    %255 = vector.shape_cast %254 : vector<1x8x32xf32> to vector<8x32xf32>
    %cst_300 = arith.constant dense<0.000000e+00> : vector<128x32xf32>
    %256 = tpu.matmul %253, %255, %cst_300 {dimension_numbers = #tpu.dot_dimension_numbers<[1], [0], [0], [1], [0, 0, 1, 1], [], []>} : vector<128x8xf32>, vector<8x32xf32>, vector<128x32xf32> -> vector<128x32xf32>
    %257 = arith.addf %251, %256 : vector<128x32xf32>
    %c2_301 = arith.constant 2 : index
    %c0_302 = arith.constant 0 : index
    %c0_303 = arith.constant 0 : index
    %c0_304 = arith.constant 0 : index
    %c0_305 = arith.constant 0 : index
    %258 = vector.load %arg8[%c2_301, %c0_302, %c0_303, %c0_304, %c0_305] : memref<4x4x4x8x8xf32, #tpu.memory_space<vmem>>, vector<2x2x4x8x8xf32>
    %259 = vector.shape_cast %258 : vector<2x2x4x8x8xf32> to vector<128x8xf32>
    %c6_306 = arith.constant 6 : index
    %c0_307 = arith.constant 0 : index
    %c0_308 = arith.constant 0 : index
    %260 = vector.load %arg3[%c6_306, %c0_307, %c0_308] : memref<9x8x32xf32, #tpu.memory_space<vmem>>, vector<1x8x32xf32>
    %261 = vector.shape_cast %260 : vector<1x8x32xf32> to vector<8x32xf32>
    %cst_309 = arith.constant dense<0.000000e+00> : vector<128x32xf32>
    %262 = tpu.matmul %259, %261, %cst_309 {dimension_numbers = #tpu.dot_dimension_numbers<[1], [0], [0], [1], [0, 0, 1, 1], [], []>} : vector<128x8xf32>, vector<8x32xf32>, vector<128x32xf32> -> vector<128x32xf32>
    %263 = arith.addf %257, %262 : vector<128x32xf32>
    %c2_310 = arith.constant 2 : index
    %c1_311 = arith.constant 1 : index
    %c0_312 = arith.constant 0 : index
    %c0_313 = arith.constant 0 : index
    %c0_314 = arith.constant 0 : index
    %264 = vector.load %arg8[%c2_310, %c1_311, %c0_312, %c0_313, %c0_314] : memref<4x4x4x8x8xf32, #tpu.memory_space<vmem>>, vector<2x2x4x8x8xf32>
    %265 = vector.shape_cast %264 : vector<2x2x4x8x8xf32> to vector<128x8xf32>
    %c7_315 = arith.constant 7 : index
    %c0_316 = arith.constant 0 : index
    %c0_317 = arith.constant 0 : index
    %266 = vector.load %arg3[%c7_315, %c0_316, %c0_317] : memref<9x8x32xf32, #tpu.memory_space<vmem>>, vector<1x8x32xf32>
    %267 = vector.shape_cast %266 : vector<1x8x32xf32> to vector<8x32xf32>
    %cst_318 = arith.constant dense<0.000000e+00> : vector<128x32xf32>
    %268 = tpu.matmul %265, %267, %cst_318 {dimension_numbers = #tpu.dot_dimension_numbers<[1], [0], [0], [1], [0, 0, 1, 1], [], []>} : vector<128x8xf32>, vector<8x32xf32>, vector<128x32xf32> -> vector<128x32xf32>
    %269 = arith.addf %263, %268 : vector<128x32xf32>
    %c2_319 = arith.constant 2 : index
    %c2_320 = arith.constant 2 : index
    %c0_321 = arith.constant 0 : index
    %c0_322 = arith.constant 0 : index
    %c0_323 = arith.constant 0 : index
    %270 = vector.load %arg8[%c2_319, %c2_320, %c0_321, %c0_322, %c0_323] : memref<4x4x4x8x8xf32, #tpu.memory_space<vmem>>, vector<2x2x4x8x8xf32>
    %271 = vector.shape_cast %270 : vector<2x2x4x8x8xf32> to vector<128x8xf32>
    %c8_324 = arith.constant 8 : index
    %c0_325 = arith.constant 0 : index
    %c0_326 = arith.constant 0 : index
    %272 = vector.load %arg3[%c8_324, %c0_325, %c0_326] : memref<9x8x32xf32, #tpu.memory_space<vmem>>, vector<1x8x32xf32>
    %273 = vector.shape_cast %272 : vector<1x8x32xf32> to vector<8x32xf32>
    %cst_327 = arith.constant dense<0.000000e+00> : vector<128x32xf32>
    %274 = tpu.matmul %271, %273, %cst_327 {dimension_numbers = #tpu.dot_dimension_numbers<[1], [0], [0], [1], [0, 0, 1, 1], [], []>} : vector<128x8xf32>, vector<8x32xf32>, vector<128x32xf32> -> vector<128x32xf32>
    %275 = arith.addf %269, %274 : vector<128x32xf32>
    %276 = vector.extract_strided_slice %275 {offsets = [0, 0], sizes = [32, 32], strides = [1, 1]} : vector<128x32xf32> to vector<32x32xf32>
    %277 = vector.extract_strided_slice %275 {offsets = [32, 0], sizes = [32, 32], strides = [1, 1]} : vector<128x32xf32> to vector<32x32xf32>
    %278 = arith.maximumf %276, %277 : vector<32x32xf32>
    %279 = vector.extract_strided_slice %275 {offsets = [64, 0], sizes = [32, 32], strides = [1, 1]} : vector<128x32xf32> to vector<32x32xf32>
    %280 = vector.extract_strided_slice %275 {offsets = [96, 0], sizes = [32, 32], strides = [1, 1]} : vector<128x32xf32> to vector<32x32xf32>
    %281 = arith.maximumf %279, %280 : vector<32x32xf32>
    %282 = arith.maximumf %278, %281 : vector<32x32xf32>
    %c0_328 = arith.constant 0 : index
    %c0_329 = arith.constant 0 : index
    %283 = vector.load %arg4[%c0_328, %c0_329] : memref<1x32xf32, #tpu.memory_space<vmem>>, vector<1x32xf32>
    %284 = vector.broadcast %283 : vector<1x32xf32> to vector<32x32xf32>
    %285 = arith.addf %282, %284 : vector<32x32xf32>
    %cst_330 = arith.constant 0.000000e+00 : f32
    %286 = vector.broadcast %cst_330 : f32 to vector<32x32xf32>
    %287 = arith.maximumf %285, %286 : vector<32x32xf32>
    %cst_331 = arith.constant 0.000000e+00 : f32
    %288 = vector.broadcast %cst_331 : f32 to vector<2x10xf32>
    %289 = vector.extract_strided_slice %287 {offsets = [0, 0], sizes = [2, 32], strides = [1, 1]} : vector<32x32xf32> to vector<2x32xf32>
    %c0_332 = arith.constant 0 : index
    %c0_333 = arith.constant 0 : index
    %c0_334 = arith.constant 0 : index
    %290 = vector.load %arg5[%c0_332, %c0_333, %c0_334] : memref<16x32x10xf32, #tpu.memory_space<vmem>>, vector<1x32x10xf32>
    %291 = vector.shape_cast %290 : vector<1x32x10xf32> to vector<32x10xf32>
    %cst_335 = arith.constant dense<0.000000e+00> : vector<2x10xf32>
    %292 = tpu.matmul %289, %291, %cst_335 {dimension_numbers = #tpu.dot_dimension_numbers<[1], [0], [0], [1], [0, 0, 1, 1], [], []>} : vector<2x32xf32>, vector<32x10xf32>, vector<2x10xf32> -> vector<2x10xf32>
    %293 = arith.addf %288, %292 : vector<2x10xf32>
    %294 = vector.extract_strided_slice %287 {offsets = [2, 0], sizes = [2, 32], strides = [1, 1]} : vector<32x32xf32> to vector<2x32xf32>
    %c1_336 = arith.constant 1 : index
    %c0_337 = arith.constant 0 : index
    %c0_338 = arith.constant 0 : index
    %295 = vector.load %arg5[%c1_336, %c0_337, %c0_338] : memref<16x32x10xf32, #tpu.memory_space<vmem>>, vector<1x32x10xf32>
    %296 = vector.shape_cast %295 : vector<1x32x10xf32> to vector<32x10xf32>
    %cst_339 = arith.constant dense<0.000000e+00> : vector<2x10xf32>
    %297 = tpu.matmul %294, %296, %cst_339 {dimension_numbers = #tpu.dot_dimension_numbers<[1], [0], [0], [1], [0, 0, 1, 1], [], []>} : vector<2x32xf32>, vector<32x10xf32>, vector<2x10xf32> -> vector<2x10xf32>
    %298 = arith.addf %293, %297 : vector<2x10xf32>
    %299 = vector.extract_strided_slice %287 {offsets = [4, 0], sizes = [2, 32], strides = [1, 1]} : vector<32x32xf32> to vector<2x32xf32>
    %c2_340 = arith.constant 2 : index
    %c0_341 = arith.constant 0 : index
    %c0_342 = arith.constant 0 : index
    %300 = vector.load %arg5[%c2_340, %c0_341, %c0_342] : memref<16x32x10xf32, #tpu.memory_space<vmem>>, vector<1x32x10xf32>
    %301 = vector.shape_cast %300 : vector<1x32x10xf32> to vector<32x10xf32>
    %cst_343 = arith.constant dense<0.000000e+00> : vector<2x10xf32>
    %302 = tpu.matmul %299, %301, %cst_343 {dimension_numbers = #tpu.dot_dimension_numbers<[1], [0], [0], [1], [0, 0, 1, 1], [], []>} : vector<2x32xf32>, vector<32x10xf32>, vector<2x10xf32> -> vector<2x10xf32>
    %303 = arith.addf %298, %302 : vector<2x10xf32>
    %304 = vector.extract_strided_slice %287 {offsets = [6, 0], sizes = [2, 32], strides = [1, 1]} : vector<32x32xf32> to vector<2x32xf32>
    %c3_344 = arith.constant 3 : index
    %c0_345 = arith.constant 0 : index
    %c0_346 = arith.constant 0 : index
    %305 = vector.load %arg5[%c3_344, %c0_345, %c0_346] : memref<16x32x10xf32, #tpu.memory_space<vmem>>, vector<1x32x10xf32>
    %306 = vector.shape_cast %305 : vector<1x32x10xf32> to vector<32x10xf32>
    %cst_347 = arith.constant dense<0.000000e+00> : vector<2x10xf32>
    %307 = tpu.matmul %304, %306, %cst_347 {dimension_numbers = #tpu.dot_dimension_numbers<[1], [0], [0], [1], [0, 0, 1, 1], [], []>} : vector<2x32xf32>, vector<32x10xf32>, vector<2x10xf32> -> vector<2x10xf32>
    %308 = arith.addf %303, %307 : vector<2x10xf32>
    %309 = vector.extract_strided_slice %287 {offsets = [8, 0], sizes = [2, 32], strides = [1, 1]} : vector<32x32xf32> to vector<2x32xf32>
    %c4_348 = arith.constant 4 : index
    %c0_349 = arith.constant 0 : index
    %c0_350 = arith.constant 0 : index
    %310 = vector.load %arg5[%c4_348, %c0_349, %c0_350] : memref<16x32x10xf32, #tpu.memory_space<vmem>>, vector<1x32x10xf32>
    %311 = vector.shape_cast %310 : vector<1x32x10xf32> to vector<32x10xf32>
    %cst_351 = arith.constant dense<0.000000e+00> : vector<2x10xf32>
    %312 = tpu.matmul %309, %311, %cst_351 {dimension_numbers = #tpu.dot_dimension_numbers<[1], [0], [0], [1], [0, 0, 1, 1], [], []>} : vector<2x32xf32>, vector<32x10xf32>, vector<2x10xf32> -> vector<2x10xf32>
    %313 = arith.addf %308, %312 : vector<2x10xf32>
    %314 = vector.extract_strided_slice %287 {offsets = [10, 0], sizes = [2, 32], strides = [1, 1]} : vector<32x32xf32> to vector<2x32xf32>
    %c5_352 = arith.constant 5 : index
    %c0_353 = arith.constant 0 : index
    %c0_354 = arith.constant 0 : index
    %315 = vector.load %arg5[%c5_352, %c0_353, %c0_354] : memref<16x32x10xf32, #tpu.memory_space<vmem>>, vector<1x32x10xf32>
    %316 = vector.shape_cast %315 : vector<1x32x10xf32> to vector<32x10xf32>
    %cst_355 = arith.constant dense<0.000000e+00> : vector<2x10xf32>
    %317 = tpu.matmul %314, %316, %cst_355 {dimension_numbers = #tpu.dot_dimension_numbers<[1], [0], [0], [1], [0, 0, 1, 1], [], []>} : vector<2x32xf32>, vector<32x10xf32>, vector<2x10xf32> -> vector<2x10xf32>
    %318 = arith.addf %313, %317 : vector<2x10xf32>
    %319 = vector.extract_strided_slice %287 {offsets = [12, 0], sizes = [2, 32], strides = [1, 1]} : vector<32x32xf32> to vector<2x32xf32>
    %c6_356 = arith.constant 6 : index
    %c0_357 = arith.constant 0 : index
    %c0_358 = arith.constant 0 : index
    %320 = vector.load %arg5[%c6_356, %c0_357, %c0_358] : memref<16x32x10xf32, #tpu.memory_space<vmem>>, vector<1x32x10xf32>
    %321 = vector.shape_cast %320 : vector<1x32x10xf32> to vector<32x10xf32>
    %cst_359 = arith.constant dense<0.000000e+00> : vector<2x10xf32>
    %322 = tpu.matmul %319, %321, %cst_359 {dimension_numbers = #tpu.dot_dimension_numbers<[1], [0], [0], [1], [0, 0, 1, 1], [], []>} : vector<2x32xf32>, vector<32x10xf32>, vector<2x10xf32> -> vector<2x10xf32>
    %323 = arith.addf %318, %322 : vector<2x10xf32>
    %324 = vector.extract_strided_slice %287 {offsets = [14, 0], sizes = [2, 32], strides = [1, 1]} : vector<32x32xf32> to vector<2x32xf32>
    %c7_360 = arith.constant 7 : index
    %c0_361 = arith.constant 0 : index
    %c0_362 = arith.constant 0 : index
    %325 = vector.load %arg5[%c7_360, %c0_361, %c0_362] : memref<16x32x10xf32, #tpu.memory_space<vmem>>, vector<1x32x10xf32>
    %326 = vector.shape_cast %325 : vector<1x32x10xf32> to vector<32x10xf32>
    %cst_363 = arith.constant dense<0.000000e+00> : vector<2x10xf32>
    %327 = tpu.matmul %324, %326, %cst_363 {dimension_numbers = #tpu.dot_dimension_numbers<[1], [0], [0], [1], [0, 0, 1, 1], [], []>} : vector<2x32xf32>, vector<32x10xf32>, vector<2x10xf32> -> vector<2x10xf32>
    %328 = arith.addf %323, %327 : vector<2x10xf32>
    %329 = vector.extract_strided_slice %287 {offsets = [16, 0], sizes = [2, 32], strides = [1, 1]} : vector<32x32xf32> to vector<2x32xf32>
    %c8_364 = arith.constant 8 : index
    %c0_365 = arith.constant 0 : index
    %c0_366 = arith.constant 0 : index
    %330 = vector.load %arg5[%c8_364, %c0_365, %c0_366] : memref<16x32x10xf32, #tpu.memory_space<vmem>>, vector<1x32x10xf32>
    %331 = vector.shape_cast %330 : vector<1x32x10xf32> to vector<32x10xf32>
    %cst_367 = arith.constant dense<0.000000e+00> : vector<2x10xf32>
    %332 = tpu.matmul %329, %331, %cst_367 {dimension_numbers = #tpu.dot_dimension_numbers<[1], [0], [0], [1], [0, 0, 1, 1], [], []>} : vector<2x32xf32>, vector<32x10xf32>, vector<2x10xf32> -> vector<2x10xf32>
    %333 = arith.addf %328, %332 : vector<2x10xf32>
    %334 = vector.extract_strided_slice %287 {offsets = [18, 0], sizes = [2, 32], strides = [1, 1]} : vector<32x32xf32> to vector<2x32xf32>
    %c9 = arith.constant 9 : index
    %c0_368 = arith.constant 0 : index
    %c0_369 = arith.constant 0 : index
    %335 = vector.load %arg5[%c9, %c0_368, %c0_369] : memref<16x32x10xf32, #tpu.memory_space<vmem>>, vector<1x32x10xf32>
    %336 = vector.shape_cast %335 : vector<1x32x10xf32> to vector<32x10xf32>
    %cst_370 = arith.constant dense<0.000000e+00> : vector<2x10xf32>
    %337 = tpu.matmul %334, %336, %cst_370 {dimension_numbers = #tpu.dot_dimension_numbers<[1], [0], [0], [1], [0, 0, 1, 1], [], []>} : vector<2x32xf32>, vector<32x10xf32>, vector<2x10xf32> -> vector<2x10xf32>
    %338 = arith.addf %333, %337 : vector<2x10xf32>
    %339 = vector.extract_strided_slice %287 {offsets = [20, 0], sizes = [2, 32], strides = [1, 1]} : vector<32x32xf32> to vector<2x32xf32>
    %c10 = arith.constant 10 : index
    %c0_371 = arith.constant 0 : index
    %c0_372 = arith.constant 0 : index
    %340 = vector.load %arg5[%c10, %c0_371, %c0_372] : memref<16x32x10xf32, #tpu.memory_space<vmem>>, vector<1x32x10xf32>
    %341 = vector.shape_cast %340 : vector<1x32x10xf32> to vector<32x10xf32>
    %cst_373 = arith.constant dense<0.000000e+00> : vector<2x10xf32>
    %342 = tpu.matmul %339, %341, %cst_373 {dimension_numbers = #tpu.dot_dimension_numbers<[1], [0], [0], [1], [0, 0, 1, 1], [], []>} : vector<2x32xf32>, vector<32x10xf32>, vector<2x10xf32> -> vector<2x10xf32>
    %343 = arith.addf %338, %342 : vector<2x10xf32>
    %344 = vector.extract_strided_slice %287 {offsets = [22, 0], sizes = [2, 32], strides = [1, 1]} : vector<32x32xf32> to vector<2x32xf32>
    %c11 = arith.constant 11 : index
    %c0_374 = arith.constant 0 : index
    %c0_375 = arith.constant 0 : index
    %345 = vector.load %arg5[%c11, %c0_374, %c0_375] : memref<16x32x10xf32, #tpu.memory_space<vmem>>, vector<1x32x10xf32>
    %346 = vector.shape_cast %345 : vector<1x32x10xf32> to vector<32x10xf32>
    %cst_376 = arith.constant dense<0.000000e+00> : vector<2x10xf32>
    %347 = tpu.matmul %344, %346, %cst_376 {dimension_numbers = #tpu.dot_dimension_numbers<[1], [0], [0], [1], [0, 0, 1, 1], [], []>} : vector<2x32xf32>, vector<32x10xf32>, vector<2x10xf32> -> vector<2x10xf32>
    %348 = arith.addf %343, %347 : vector<2x10xf32>
    %349 = vector.extract_strided_slice %287 {offsets = [24, 0], sizes = [2, 32], strides = [1, 1]} : vector<32x32xf32> to vector<2x32xf32>
    %c12 = arith.constant 12 : index
    %c0_377 = arith.constant 0 : index
    %c0_378 = arith.constant 0 : index
    %350 = vector.load %arg5[%c12, %c0_377, %c0_378] : memref<16x32x10xf32, #tpu.memory_space<vmem>>, vector<1x32x10xf32>
    %351 = vector.shape_cast %350 : vector<1x32x10xf32> to vector<32x10xf32>
    %cst_379 = arith.constant dense<0.000000e+00> : vector<2x10xf32>
    %352 = tpu.matmul %349, %351, %cst_379 {dimension_numbers = #tpu.dot_dimension_numbers<[1], [0], [0], [1], [0, 0, 1, 1], [], []>} : vector<2x32xf32>, vector<32x10xf32>, vector<2x10xf32> -> vector<2x10xf32>
    %353 = arith.addf %348, %352 : vector<2x10xf32>
    %354 = vector.extract_strided_slice %287 {offsets = [26, 0], sizes = [2, 32], strides = [1, 1]} : vector<32x32xf32> to vector<2x32xf32>
    %c13 = arith.constant 13 : index
    %c0_380 = arith.constant 0 : index
    %c0_381 = arith.constant 0 : index
    %355 = vector.load %arg5[%c13, %c0_380, %c0_381] : memref<16x32x10xf32, #tpu.memory_space<vmem>>, vector<1x32x10xf32>
    %356 = vector.shape_cast %355 : vector<1x32x10xf32> to vector<32x10xf32>
    %cst_382 = arith.constant dense<0.000000e+00> : vector<2x10xf32>
    %357 = tpu.matmul %354, %356, %cst_382 {dimension_numbers = #tpu.dot_dimension_numbers<[1], [0], [0], [1], [0, 0, 1, 1], [], []>} : vector<2x32xf32>, vector<32x10xf32>, vector<2x10xf32> -> vector<2x10xf32>
    %358 = arith.addf %353, %357 : vector<2x10xf32>
    %359 = vector.extract_strided_slice %287 {offsets = [28, 0], sizes = [2, 32], strides = [1, 1]} : vector<32x32xf32> to vector<2x32xf32>
    %c14 = arith.constant 14 : index
    %c0_383 = arith.constant 0 : index
    %c0_384 = arith.constant 0 : index
    %360 = vector.load %arg5[%c14, %c0_383, %c0_384] : memref<16x32x10xf32, #tpu.memory_space<vmem>>, vector<1x32x10xf32>
    %361 = vector.shape_cast %360 : vector<1x32x10xf32> to vector<32x10xf32>
    %cst_385 = arith.constant dense<0.000000e+00> : vector<2x10xf32>
    %362 = tpu.matmul %359, %361, %cst_385 {dimension_numbers = #tpu.dot_dimension_numbers<[1], [0], [0], [1], [0, 0, 1, 1], [], []>} : vector<2x32xf32>, vector<32x10xf32>, vector<2x10xf32> -> vector<2x10xf32>
    %363 = arith.addf %358, %362 : vector<2x10xf32>
    %364 = vector.extract_strided_slice %287 {offsets = [30, 0], sizes = [2, 32], strides = [1, 1]} : vector<32x32xf32> to vector<2x32xf32>
    %c15 = arith.constant 15 : index
    %c0_386 = arith.constant 0 : index
    %c0_387 = arith.constant 0 : index
    %365 = vector.load %arg5[%c15, %c0_386, %c0_387] : memref<16x32x10xf32, #tpu.memory_space<vmem>>, vector<1x32x10xf32>
    %366 = vector.shape_cast %365 : vector<1x32x10xf32> to vector<32x10xf32>
    %cst_388 = arith.constant dense<0.000000e+00> : vector<2x10xf32>
    %367 = tpu.matmul %364, %366, %cst_388 {dimension_numbers = #tpu.dot_dimension_numbers<[1], [0], [0], [1], [0, 0, 1, 1], [], []>} : vector<2x32xf32>, vector<32x10xf32>, vector<2x10xf32> -> vector<2x10xf32>
    %368 = arith.addf %363, %367 : vector<2x10xf32>
    %c0_389 = arith.constant 0 : index
    %c0_390 = arith.constant 0 : index
    %369 = vector.load %arg6[%c0_389, %c0_390] : memref<1x10xf32, #tpu.memory_space<vmem>>, vector<1x10xf32>
    %370 = vector.broadcast %369 : vector<1x10xf32> to vector<2x10xf32>
    %371 = arith.addf %368, %370 : vector<2x10xf32>
    %c0_391 = arith.constant 0 : index
    %c0_392 = arith.constant 0 : index
    %372 = vector.load %arg7[%c0_391, %c0_392] : memref<2x10xf32, #tpu.memory_space<vmem>>, vector<2x10xf32>
    tpu.vector_store %arg7[%c0_391, %c0_392], %371 {strides = array<i32>} : memref<2x10xf32, #tpu.memory_space<vmem>>, vector<2x10xf32>,
    return
  }
}

</mosaic_0001>

<bundles_post_ra>
// kernel: convnet_forward.1
= control target key start
LH: loop header
LB: loop body
LE: loop exit
PB: predicated region body
PF: predicated region fallthrough
CT: control target
= control target key end

     0   :  { %vm258_vm0 = vcmask 1042432   ;;  %vm161_vm1 = vcmask 23552   ;;  %s12321_s0 = inlined_call_operand.vmem [shape: f32[6,6,4,8,3], index: 0, kind: input, shape index: {}]   ;;  %s12322_s1 = inlined_call_operand.vmem [shape: f32[9,3,8], index: 1, kind: input, shape index: {}]   ;;  %s12323_s2 = inlined_call_operand.vmem [shape: f32[1,8], index: 2, kind: input, shape index: {}]   ;;  %s12324_s3 = inlined_call_operand.vmem [shape: f32[9,8,32], index: 3, kind: input, shape index: {}]   ;;  %s12325_s4 = inlined_call_operand.vmem [shape: f32[1,32], index: 4, kind: input, shape index: {}]   ;;  %s12326_s5 = inlined_call_operand.vmem [shape: f32[16,32,10], index: 5, kind: input, shape index: {}]   ;;  %s12327_s6 = inlined_call_operand.vmem [shape: f32[1,10], index: 6, kind: input, shape index: {}]   ;;  %s12328_s7 = inlined_call_operand.hbm [shape: f32[2,10], index: 7, kind: output, shape index: {}]  }
   0x1   :  { %v6965_v0 = vld [vmem:[%s12322_s1 + $0x4] sm:$0x7]  ;;  %v8410_v3 = vld [vmem:[%s12321_s0 + $0x130] sm:$0xff]  ;;  %v125_v4 = vld [vmem:[%s12322_s1] sm:$0x7] }
   0x2   :  { %v8398_v1 = vld [vmem:[%s12321_s0 + $0x20] sm:$0xff]  ;;  %6966 = vmatpush.msk.msra.mxu0 %vm258_vm0, %v6965_v0  ;;  %8315 = vmatpush.msk.msra.mxu1 %vm258_vm0, %v6965_v0  ;;  %v8421_v5 = vld [vmem:[%s12321_s0 + $0x148] sm:$0xff]  ;;  %v7262_v6 = vld [vmem:[%s12322_s1 + $0x14] sm:$0x7] }
   0x3   :  { %v8403_v2 = vld [vmem:[%s12321_s0 + $0x120] sm:$0xff]  ;;  %8316 = vmatpush.msk.msra.mxu2 %vm258_vm0, %v6965_v0  ;;  %6967 = vmatmul.msk.f32.vlgmr.msra.gmra.mxu0 %vm161_vm1, %v8398_v1  ;;  %v7064_v7 = vld [vmem:[%s12322_s1 + $0x8] sm:$0x7]  ;;  %v7130_v8 = vld [vmem:[%s12322_s1 + $0xc] sm:$0x7] }
   0x4   :  { %6991 = vmatmul.msk.f32.vlgmr.msra.gmra.mxu1 %vm161_vm1, %v8403_v2  ;;  %6993 = vmatmul.msk.f32.vlgmr.msra.gmra.mxu2 %vm161_vm1, %v8410_v3  ;;  %v6934_v9 = vld [vmem:[%s12321_s0 + $0x28] sm:$0xff]  ;;  %v8453_v11 = vld [vmem:[%s12321_s0 + $0x138] sm:$0xff] }
   0x5   :  { %6999 = vmatpush.msk.msrb.mxu1 %vm258_vm0, %v125_v4  ;;  %8317 = vmatpush.msk.msra.mxu3 %vm258_vm0, %v6965_v0  ;;  %v8448_v10 = vld [vmem:[%s12321_s0 + $0x128] sm:$0xff] }
   0x6   :  { %6996 = vmatmul.msk.f32.vlgmr.msra.gmra.mxu3 %vm161_vm1, %v8421_v5  ;;  %7065 = vmatpush.msk.msrb.mxu2 %vm258_vm0, %v7064_v7 }
   0x7   :  { %7263 = vmatpush.msk.msra.mxu1 %vm258_vm0, %v7262_v6  ;;  %7131 = vmatpush.msk.msrb.mxu3 %vm258_vm0, %v7130_v8 }
   0x8   :  { %12 = vsyncpa [#allocation4], 0  ;;  %v8460_v12 = vld [vmem:[%s12321_s0 + $0x150] sm:$0xff]  ;;  %v8474_v14 = vld [vmem:[%s12321_s0 + $0x140] sm:$0xff]  ;;  %vm27_vm2 = vcmask 64512   ;;  %vm2569_vm3 = vcmask 64514  }
   0x9   :  { %v6935_v13 = vld [vmem:[%s12321_s0 + $0x30] sm:$0xff]  ;;  %v93_v15 = vld [vmem:[%s12321_s0] sm:$0xff]  ;;  %v8483_v16 = vld [vmem:[%s12321_s0 + $0x158] sm:$0xff]  ;;  %vm2608_vm4 = vcmask 62464   ;;  %vm6459_vm5 = vcmask 261120   ;;  %s8351_s30 = smov [#allocation3]  }
   0xa   :  { %v6936_v17 = vld [vmem:[%s12321_s0 + $0x38] sm:$0xff]  ;;  %v94_v18 = vld [vmem:[%s12321_s0 + $0x8] sm:$0xff]  ;;  %v7032_v19 = vld [vmem:[%s12321_s0 + $0x40] sm:$0xff]  ;;  %s6924_s9 = sshll.u32 %s12328_s7, 4  ;;  %vm6915_vm6 = vcmask 74752   ;;  %s6925_s9 = int_to_ptr.hbm [resolvable:$true] %s6924_s9 }
   0xb   :  { %6968 = vmatmul.msk.f32.gmra.mxu0 %vm161_vm1, %v6934_v9  ;;  %v8503_v20 = vld [vmem:[%s12321_s0 + $0xc0] sm:$0xff]  ;;  %v95_v21 = vld [vmem:[%s12321_s0 + $0x10] sm:$0xff]  ;;  %v7033_v22 = vld [vmem:[%s12321_s0 + $0x48] sm:$0xff] }
   0xc   :  { %6992 = vmatmul.msk.f32.gmra.mxu1 %vm161_vm1, %v8448_v10  ;;  %6994 = vmatmul.msk.f32.gmra.mxu2 %vm161_vm1, %v8453_v11  ;;  %v8519_v23 = vld [vmem:[%s12321_s0 + $0xc8] sm:$0xff]  ;;  %v96_v24 = vld [vmem:[%s12321_s0 + $0x18] sm:$0xff]  ;;  %v7034_v25 = vld [vmem:[%s12321_s0 + $0x50] sm:$0xff] }
   0xd   :  { %v8535_v26 = vld [vmem:[%s12321_s0 + $0xd0] sm:$0xff]  ;;  %v7035_v28 = vld [vmem:[%s12321_s0 + $0x58] sm:$0xff]  ;;  %v7036_v30 = vld [vmem:[%s12321_s0 + $0x60] sm:$0xff] }
   0xe   :  { %6997 = vmatmul.msk.f32.gmra.mxu3 %vm161_vm1, %v8460_v12  ;;  %v7196_v27 = vld [vmem:[%s12322_s1 + $0x10] sm:$0x7]  ;;  %v8552_v29 = vld [vmem:[%s12321_s0 + $0xd8] sm:$0xff]  ;;  %v8566_v31 = vld [vmem:[%s12321_s0 + $0xe0] sm:$0xff] }
   0xf   :  { %7197 = vmatpush.msk.msrb.mxu0 %vm258_vm0, %v7196_v27  ;;  %v7037_v32 = vld [vmem:[%s12321_s0 + $0x68] sm:$0xff]  ;;  %v7038_v34 = vld [vmem:[%s12321_s0 + $0x70] sm:$0xff]  ;;  %v7039_v36 = vld [vmem:[%s12321_s0 + $0x78] sm:$0xff] }
  0x10   :  { %v8579_v33 = vld [vmem:[%s12321_s0 + $0xe8] sm:$0xff]  ;;  %v8592_v35 = vld [vmem:[%s12321_s0 + $0xf0] sm:$0xff]  ;;  %v8605_v37 = vld [vmem:[%s12321_s0 + $0xf8] sm:$0xff] }
  0x11   :  { %v7040_v38 = vld [vmem:[%s12321_s0 + $0x80] sm:$0xff]  ;;  %v7041_v40 = vld [vmem:[%s12321_s0 + $0x88] sm:$0xff]  ;;  %v7042_v42 = vld [vmem:[%s12321_s0 + $0x90] sm:$0xff] }
  0x12   :  { %v8618_v39 = vld [vmem:[%s12321_s0 + $0x100] sm:$0xff]  ;;  %v8631_v41 = vld [vmem:[%s12321_s0 + $0x108] sm:$0xff]  ;;  %v8644_v43 = vld [vmem:[%s12321_s0 + $0x110] sm:$0xff] }
  0x13   :  { %6969 = vmatmul.msk.f32.gmra.mxu0 %vm161_vm1, %v6935_v13  ;;  %v7043_v44 = vld [vmem:[%s12321_s0 + $0x98] sm:$0xff]  ;;  %v7044_v46 = vld [vmem:[%s12321_s0 + $0xa0] sm:$0xff]  ;;  %v7045_v49 = vld [vmem:[%s12321_s0 + $0xa8] sm:$0xff] }
  0x14   :  { %6995 = vmatmul.msk.f32.gmra.mxu2 %vm161_vm1, %v8474_v14  ;;  %7000 = vmatmul.msk.f32.vlgmr.msrb.gmra.mxu1 %vm161_vm1, %v93_v15  ;;  %v8657_v45 = vld [vmem:[%s12321_s0 + $0x118] sm:$0xff]  ;;  %v7046_v54 = vld [vmem:[%s12321_s0 + $0xb0] sm:$0xff]  ;;  %v8720_v0 = vld [vmem:[%s12321_s0 + $0x180] sm:$0xff] }
  0x15   :  { %v7047_v59 = vld [vmem:[%s12321_s0 + $0xb8] sm:$0xff]  ;;  %v8735_v15 = vld [vmem:[%s12321_s0 + $0x188] sm:$0xff] }
  0x16   :  { %6998 = vmatmul.msk.f32.gmra.mxu3 %vm161_vm1, %v8483_v16 }
  0x1b   :  { %6970 = vmatmul.msk.f32.gmra.mxu0 %vm161_vm1, %v6936_v17 }
  0x1c   :  { %7001 = vmatmul.msk.f32.gmra.mxu1 %vm161_vm1, %v94_v18  ;;  %7066 = vmatmul.msk.f32.vlgmr.msrb.gmra.mxu2 %vm161_vm1, %v7032_v19 }
  0x1e   :  { %7132 = vmatmul.msk.f32.vlgmr.msrb.gmra.mxu3 %vm161_vm1, %v8503_v20 }
  0x23   :  { %6971 = vmatmul.msk.f32.gmra.mxu0 %vm161_vm1, %v7032_v19 }
  0x24   :  { %7002 = vmatmul.msk.f32.gmra.mxu1 %vm161_vm1, %v95_v21  ;;  %7067 = vmatmul.msk.f32.gmra.mxu2 %vm161_vm1, %v7033_v22 }
  0x26   :  { %7133 = vmatmul.msk.f32.gmra.mxu3 %vm161_vm1, %v8519_v23 }
  0x2b   :  { %6972 = vmatmul.msk.f32.gmra.mxu0 %vm161_vm1, %v7033_v22 }
  0x2c   :  { %7003 = vmatmul.msk.f32.gmra.mxu1 %vm161_vm1, %v96_v24  ;;  %7068 = vmatmul.msk.f32.gmra.mxu2 %vm161_vm1, %v7034_v25  ;;  %v8750_v24 = vld [vmem:[%s12321_s0 + $0x190] sm:$0xff] }
  0x2e   :  { %7134 = vmatmul.msk.f32.gmra.mxu3 %vm161_vm1, %v8535_v26 }
  0x33   :  { %6973 = vmatmul.msk.f32.gmra.mxu0 %vm161_vm1, %v7034_v25 }
  0x34   :  { %7004 = vmatmul.msk.f32.gmra.mxu1 %vm161_vm1, %v8398_v1  ;;  %7069 = vmatmul.msk.f32.gmra.mxu2 %vm161_vm1, %v7035_v28 }
  0x36   :  { %7135 = vmatmul.msk.f32.gmra.mxu3 %vm161_vm1, %v8552_v29 }
  0x3b   :  { %6974 = vmatmul.msk.f32.gmra.mxu0 %vm161_vm1, %v7035_v28 }
  0x3c   :  { %7005 = vmatmul.msk.f32.gmra.mxu1 %vm161_vm1, %v6934_v9  ;;  %7070 = vmatmul.msk.f32.gmra.mxu2 %vm161_vm1, %v7036_v30 }
  0x3e   :  { %7136 = vmatmul.msk.f32.gmra.mxu3 %vm161_vm1, %v8566_v31 }
  0x43   :  { %6975 = vmatmul.msk.f32.gmra.mxu0 %vm161_vm1, %v7036_v30 }
  0x44   :  { %7006 = vmatmul.msk.f32.gmra.mxu1 %vm161_vm1, %v6935_v13  ;;  %7071 = vmatmul.msk.f32.gmra.mxu2 %vm161_vm1, %v7037_v32 }
  0x46   :  { %7137 = vmatmul.msk.f32.gmra.mxu3 %vm161_vm1, %v8579_v33 }
  0x4b   :  { %6976 = vmatmul.msk.f32.gmra.mxu0 %vm161_vm1, %v7037_v32 }
  0x4c   :  { %7007 = vmatmul.msk.f32.gmra.mxu1 %vm161_vm1, %v6936_v17  ;;  %7072 = vmatmul.msk.f32.gmra.mxu2 %vm161_vm1, %v7038_v34 }
  0x4e   :  { %7138 = vmatmul.msk.f32.gmra.mxu3 %vm161_vm1, %v8592_v35 }
  0x53   :  { %6977 = vmatmul.msk.f32.gmra.mxu0 %vm161_vm1, %v7038_v34 }
  0x54   :  { %7008 = vmatmul.msk.f32.gmra.mxu1 %vm161_vm1, %v7032_v19  ;;  %7073 = vmatmul.msk.f32.gmra.mxu2 %vm161_vm1, %v7039_v36 }
  0x56   :  { %7139 = vmatmul.msk.f32.gmra.mxu3 %vm161_vm1, %v8605_v37 }
  0x5b   :  { %6978 = vmatmul.msk.f32.gmra.mxu0 %vm161_vm1, %v7039_v36 }
  0x5c   :  { %7009 = vmatmul.msk.f32.gmra.mxu1 %vm161_vm1, %v7033_v22  ;;  %7074 = vmatmul.msk.f32.gmra.mxu2 %vm161_vm1, %v7040_v38 }
  0x5e   :  { %7140 = vmatmul.msk.f32.gmra.mxu3 %vm161_vm1, %v8618_v39 }
  0x63   :  { %6979 = vmatmul.msk.f32.gmra.mxu0 %vm161_vm1, %v7040_v38 }
  0x64   :  { %7010 = vmatmul.msk.f32.gmra.mxu1 %vm161_vm1, %v7034_v25  ;;  %7075 = vmatmul.msk.f32.gmra.mxu2 %vm161_vm1, %v7041_v40 }
  0x66   :  { %7141 = vmatmul.msk.f32.gmra.mxu3 %vm161_vm1, %v8631_v41 }
  0x6b   :  { %6980 = vmatmul.msk.f32.gmra.mxu0 %vm161_vm1, %v7041_v40 }
  0x6c   :  { %7011 = vmatmul.msk.f32.gmra.mxu1 %vm161_vm1, %v7035_v28  ;;  %7076 = vmatmul.msk.f32.gmra.mxu2 %vm161_vm1, %v7042_v42 }
  0x6e   :  { %7142 = vmatmul.msk.f32.gmra.mxu3 %vm161_vm1, %v8644_v43 }
  0x73   :  { %6981 = vmatmul.msk.f32.gmra.mxu0 %vm161_vm1, %v7042_v42 }
  0x74   :  { %7012 = vmatmul.msk.f32.gmra.mxu1 %vm161_vm1, %v7036_v30  ;;  %7077 = vmatmul.msk.f32.gmra.mxu2 %vm161_vm1, %v7043_v44 }
  0x76   :  { %7143 = vmatmul.msk.f32.gmra.mxu3 %vm161_vm1, %v8657_v45 }
  0x7b   :  { %6982 = vmatmul.msk.f32.gmra.mxu0 %vm161_vm1, %v7043_v44 }
  0x7c   :  { %7013 = vmatmul.msk.f32.gmra.mxu1 %vm161_vm1, %v7037_v32  ;;  %7078 = vmatmul.msk.f32.gmra.mxu2 %vm161_vm1, %v7044_v46 }
  0x7e   :  { %7144 = vmatmul.msk.f32.gmra.mxu3 %vm161_vm1, %v8403_v2 }
  0x80   :  { %v279_v47 = vpop.f32.mrf.mxu0 }
  0x81   :  { %v8671_v48 = vpop.f32.mrf.mxu1 }
  0x83   :  { %6983 = vmatmul.msk.f32.gmra.mxu0 %vm161_vm1, %v8566_v31 }
  0x84   :  { %7014 = vmatmul.msk.f32.gmra.mxu1 %vm161_vm1, %v7038_v34  ;;  %7079 = vmatmul.msk.f32.gmra.mxu2 %vm161_vm1, %v7045_v49  ;;  %v8780_v49 = vld [vmem:[%s12321_s0 + $0x1a0] sm:$0xff] }
  0x86   :  { %7145 = vmatmul.msk.f32.gmra.mxu3 %vm161_vm1, %v8448_v10 }
  0x87   :  { %v8682_v50 = vpop.f32.mrf.mxu2 }
  0x88   :  { %v282_v51 = vpop.f32.mrf.mxu0 }
  0x89   :  { %v8684_v52 = vpop.f32.mrf.mxu1  ;;  %v8686_v53 = vpop.f32.mrf.mxu3 }
  0x8b   :  { %6984 = vmatmul.msk.f32.gmra.mxu0 %vm161_vm1, %v8579_v33 }
  0x8c   :  { %7015 = vmatmul.msk.f32.gmra.mxu1 %vm161_vm1, %v7039_v36  ;;  %7080 = vmatmul.msk.f32.gmra.mxu2 %vm161_vm1, %v7046_v54 }
  0x8e   :  { %7146 = vmatmul.msk.f32.gmra.mxu3 %vm161_vm1, %v8410_v3 }
  0x8f   :  { %v8697_v55 = vpop.f32.mrf.mxu2 }
  0x90   :  { %v285_v56 = vpop.f32.mrf.mxu0 }
  0x91   :  { %v8699_v57 = vpop.f32.mrf.mxu3  ;;  %v491_v58 = vpop.f32.mrf.mxu1 }
  0x92   :  { %v492_v1 = vadd.f32 %v491_v58, %v279_v47 }
  0x93   :  { %6985 = vmatmul.msk.f32.gmra.mxu0 %vm161_vm1, %v8592_v35 }
  0x94   :  { %7016 = vmatmul.msk.f32.gmra.mxu1 %vm161_vm1, %v8503_v20  ;;  %7081 = vmatmul.msk.f32.gmra.mxu2 %vm161_vm1, %v7047_v59 }
  0x96   :  { %7147 = vmatmul.msk.f32.gmra.mxu3 %vm161_vm1, %v8453_v11 }
  0x97   :  { %v8711_v60 = vpop.f32.mrf.mxu2 }
  0x98   :  { %v288_v61 = vpop.f32.mrf.mxu0 }
  0x99   :  { %v8713_v62 = vpop.f32.mrf.mxu3  ;;  %v494_v63 = vpop.f32.mrf.mxu1 }
  0x9a   :  { %v495_v17 = vadd.f32 %v494_v63, %v282_v51 }
  0x9b   :  { %6986 = vmatmul.msk.f32.gmra.mxu0 %vm161_vm1, %v8605_v37 }
  0x9c   :  { %7017 = vmatmul.msk.f32.gmra.mxu1 %vm161_vm1, %v8519_v23  ;;  %7082 = vmatmul.msk.f32.gmra.mxu2 %vm161_vm1, %v8618_v39 }
  0x9e   :  { %7148 = vmatmul.msk.f32.gmra.mxu3 %vm161_vm1, %v8720_v0 }
  0x9f   :  { %v738_v4 = vpop.f32.mrf.mxu2 }
  0xa0   :  { %v834_v6 = vadd.f32 %v738_v4, %v492_v1  ;;  %v291_v7 = vpop.f32.mrf.mxu0  ;;  %v8795_v1 = vld [vmem:[%s12321_s0 + $0x1a8] sm:$0xff] }
  0xa1   :  { %v497_v8 = vpop.f32.mrf.mxu1  ;;  %v1017_v9 = vpop.f32.mrf.mxu3 }
  0xa2   :  { %v8728_v13 = vadd.f32 %v1017_v9, %v834_v6  ;;  %v498_v25 = vadd.f32 %v497_v8, %v285_v56 }
  0xa3   :  { %6987 = vmatmul.msk.f32.gmra.mxu0 %vm161_vm1, %v8618_v39 }
  0xa4   :  { %7018 = vmatmul.msk.f32.gmra.mxu1 %vm161_vm1, %v8535_v26  ;;  %7083 = vmatmul.msk.f32.gmra.mxu2 %vm161_vm1, %v8631_v41 }
  0xa6   :  { %7149 = vmatmul.msk.f32.gmra.mxu3 %vm161_vm1, %v8735_v15 }
  0xa7   :  { %v741_v18 = vpop.f32.mrf.mxu2 }
  0xa8   :  { %v835_v19 = vadd.f32 %v741_v18, %v495_v17  ;;  %v294_v20 = vpop.f32.mrf.mxu0  ;;  %v8810_v18 = vld [vmem:[%s12321_s0 + $0x1b0] sm:$0xff] }
  0xa9   :  { %v500_v21 = vpop.f32.mrf.mxu1  ;;  %v1020_v22 = vpop.f32.mrf.mxu3 }
  0xaa   :  { %v8743_v23 = vadd.f32 %v1020_v22, %v835_v19  ;;  %v501_v36 = vadd.f32 %v500_v21, %v288_v61 }
  0xab   :  { %6988 = vmatmul.msk.f32.gmra.mxu0 %vm161_vm1, %v8631_v41 }
  0xac   :  { %7019 = vmatmul.msk.f32.gmra.mxu1 %vm161_vm1, %v8552_v29  ;;  %7084 = vmatmul.msk.f32.gmra.mxu2 %vm161_vm1, %v8644_v43  ;;  %v8765_v29 = vld [vmem:[%s12321_s0 + $0x198] sm:$0xff] }
  0xae   :  { %7150 = vmatmul.msk.f32.gmra.mxu3 %vm161_vm1, %v8750_v24 }
  0xaf   :  { %v744_v26 = vpop.f32.mrf.mxu2 }
  0xb0   :  { %v836_v27 = vadd.f32 %v744_v26, %v498_v25  ;;  %v297_v28 = vpop.f32.mrf.mxu0 }
  0xb1   :  { %v503_v30 = vpop.f32.mrf.mxu1  ;;  %v1023_v32 = vpop.f32.mrf.mxu3 }
  0xb2   :  { %v8758_v34 = vadd.f32 %v1023_v32, %v836_v27  ;;  %v504_v51 = vadd.f32 %v503_v30, %v291_v7  ;;  %v8825_v27 = vld [vmem:[%s12321_s0 + $0x1b8] sm:$0xff] }
  0xb3   :  { %6989 = vmatmul.msk.f32.gmra.mxu0 %vm161_vm1, %v8644_v43 }
  0xb4   :  { %7020 = vmatmul.msk.f32.gmra.mxu1 %vm161_vm1, %v8566_v31  ;;  %7085 = vmatmul.msk.f32.gmra.mxu2 %vm161_vm1, %v8657_v45 }
  0xb6   :  { %7151 = vmatmul.msk.f32.gmra.mxu3 %vm161_vm1, %v8765_v29 }
  0xb7   :  { %v747_v38 = vpop.f32.mrf.mxu2 }
  0xb8   :  { %v837_v40 = vadd.f32 %v747_v38, %v501_v36  ;;  %v300_v42 = vpop.f32.mrf.mxu0 }
  0xb9   :  { %v506_v44 = vpop.f32.mrf.mxu1  ;;  %v1026_v46 = vpop.f32.mrf.mxu3 }
  0xba   :  { %v8773_v47 = vadd.f32 %v1026_v46, %v837_v40  ;;  %v507_v4 = vadd.f32 %v506_v44, %v294_v20  ;;  %v8840_v44 = vld [vmem:[%s12321_s0 + $0x1c0] sm:$0xff] }
  0xbb   :  { %6990 = vmatmul.msk.f32.gmra.mxu0 %vm161_vm1, %v8657_v45 }
  0xbc   :  { %7021 = vmatmul.msk.f32.gmra.mxu1 %vm161_vm1, %v8579_v33  ;;  %7086 = vmatmul.msk.f32.gmra.mxu2 %vm161_vm1, %v8403_v2 }
  0xbe   :  { %7152 = vmatmul.msk.f32.gmra.mxu3 %vm161_vm1, %v8780_v49 }
  0xbf   :  { %v750_v54 = vpop.f32.mrf.mxu2 }
  0xc0   :  { %v838_v56 = vadd.f32 %v750_v54, %v504_v51  ;;  %v303_v58 = vpop.f32.mrf.mxu0 }
  0xc1   :  { %v509_v59 = vpop.f32.mrf.mxu1  ;;  %v1029_v61 = vpop.f32.mrf.mxu3 }
  0xc2   :  { %v8788_v63 = vadd.f32 %v1029_v61, %v838_v56  ;;  %v510_v19 = vadd.f32 %v509_v59, %v297_v28  ;;  %v8855_v61 = vld [vmem:[%s12321_s0 + $0x1c8] sm:$0xff] }
  0xc3   :  { %7198 = vmatmul.msk.f32.vlgmr.msrb.gmra.mxu0 %vm161_vm1, %v8566_v31 }
  0xc4   :  { %7022 = vmatmul.msk.f32.gmra.mxu1 %vm161_vm1, %v8592_v35  ;;  %7087 = vmatmul.msk.f32.gmra.mxu2 %vm161_vm1, %v8448_v10 }
  0xc6   :  { %7153 = vmatmul.msk.f32.gmra.mxu3 %vm161_vm1, %v8795_v1 }
  0xc7   :  { %v753_v6 = vpop.f32.mrf.mxu2 }
  0xc8   :  { %v839_v7 = vadd.f32 %v753_v6, %v507_v4  ;;  %v306_v8 = vpop.f32.mrf.mxu0 }
  0xc9   :  { %v512_v9 = vpop.f32.mrf.mxu1  ;;  %v1032_v31 = vpop.f32.mrf.mxu3 }
  0xca   :  { %v8803_v17 = vadd.f32 %v1032_v31, %v839_v7  ;;  %v513_v28 = vadd.f32 %v512_v9, %v300_v42  ;;  %v7328_v9 = vld [vmem:[%s12322_s1 + $0x18] sm:$0x7] }
  0xcb   :  { %7199 = vmatmul.msk.f32.gmra.mxu0 %vm161_vm1, %v8579_v33  ;;  %7329 = vmatpush.msk.msra.mxu2 %vm258_vm0, %v7328_v9  ;;  %v8912_v9 = vld [vmem:[%s12321_s0 + $0x160] sm:$0xff] }
  0xcc   :  { %7023 = vmatmul.msk.f32.gmra.mxu1 %vm161_vm1, %v8605_v37  ;;  %7088 = vmatmul.msk.f32.gmra.mxu2 %vm161_vm1, %v8410_v3 }
  0xce   :  { %7154 = vmatmul.msk.f32.gmra.mxu3 %vm161_vm1, %v8810_v18 }
  0xcf   :  { %v756_v20 = vpop.f32.mrf.mxu2 }
  0xd0   :  { %v840_v21 = vadd.f32 %v756_v20, %v510_v19  ;;  %v309_v22 = vpop.f32.mrf.mxu0 }
  0xd1   :  { %v515_v25 = vpop.f32.mrf.mxu1  ;;  %v1035_v33 = vpop.f32.mrf.mxu3 }
  0xd2   :  { %v8818_v26 = vadd.f32 %v1035_v33, %v840_v21  ;;  %v516_v42 = vadd.f32 %v515_v25, %v303_v58  ;;  %v8877_v21 = vld [vmem:[%s12321_s0 + $0x1d0] sm:$0xff] }
  0xd3   :  { %7200 = vmatmul.msk.f32.gmra.mxu0 %vm161_vm1, %v8592_v35 }
  0xd4   :  { %7024 = vmatmul.msk.f32.gmra.mxu1 %vm161_vm1, %v8618_v39  ;;  %7089 = vmatmul.msk.f32.gmra.mxu2 %vm161_vm1, %v8453_v11 }
  0xd6   :  { %7155 = vmatmul.msk.f32.gmra.mxu3 %vm161_vm1, %v8825_v27 }
  0xd7   :  { %v759_v30 = vpop.f32.mrf.mxu2 }
  0xd8   :  { %v841_v32 = vadd.f32 %v759_v30, %v513_v28  ;;  %v312_v36 = vpop.f32.mrf.mxu0 }
  0xd9   :  { %v518_v38 = vpop.f32.mrf.mxu1  ;;  %v1038_v35 = vpop.f32.mrf.mxu3 }
  0xda   :  { %v8833_v40 = vadd.f32 %v1038_v35, %v841_v32  ;;  %v519_v58 = vadd.f32 %v518_v38, %v306_v8  ;;  %v7394_v8 = vld [vmem:[%s12322_s1 + $0x1c] sm:$0x7] }
  0xdb   :  { %7201 = vmatmul.msk.f32.gmra.mxu0 %vm161_vm1, %v8605_v37  ;;  %7395 = vmatpush.msk.msra.mxu3 %vm258_vm0, %v7394_v8 }
  0xdc   :  { %7025 = vmatmul.msk.f32.gmra.mxu1 %vm161_vm1, %v8631_v41  ;;  %7090 = vmatmul.msk.f32.gmra.mxu2 %vm161_vm1, %v8474_v14 }
  0xde   :  { %7156 = vmatmul.msk.f32.gmra.mxu3 %vm161_vm1, %v8840_v44 }
  0xdf   :  { %v762_v46 = vpop.f32.mrf.mxu2 }
  0xe0   :  { %v842_v51 = vadd.f32 %v762_v46, %v516_v42  ;;  %v315_v54 = vpop.f32.mrf.mxu0  ;;  %v7460_v42 = vld [vmem:[%s12322_s1 + $0x20] sm:$0x7]  ;;  %v7558_v46 = vld [vmem:[%s12322_s1 + $0x4] sm:$0x7] }
  0xe1   :  { %v521_v56 = vpop.f32.mrf.mxu1  ;;  %v1041_v37 = vpop.f32.mrf.mxu3  ;;  %7461 = vmatpush.msk.msra.mxu0 %vm258_vm0, %v7460_v42  ;;  %7559 = vmatpush.msk.msrb.mxu1 %vm258_vm0, %v7558_v46  ;;  %v8932_v42 = vld [vmem:[%s12321_s0 + $0x168] sm:$0xff] }
  0xe2   :  { %v8848_v59 = vadd.f32 %v1041_v37, %v842_v51  ;;  %v522_v25 = vadd.f32 %v521_v56, %v309_v22  ;;  %v8896_v22 = vld [vmem:[%s12321_s0 + $0x1d8] sm:$0xff] }
  0xe3   :  { %7202 = vmatmul.msk.f32.gmra.mxu0 %vm161_vm1, %v8618_v39 }
  0xe4   :  { %7026 = vmatmul.msk.f32.gmra.mxu1 %vm161_vm1, %v8644_v43  ;;  %7091 = vmatmul.msk.f32.gmra.mxu2 %vm161_vm1, %v8421_v5 }
  0xe6   :  { %7157 = vmatmul.msk.f32.gmra.mxu3 %vm161_vm1, %v8855_v61 }
  0xe7   :  { %v765_v4 = vpop.f32.mrf.mxu2 }
  0xe8   :  { %v843_v6 = vadd.f32 %v765_v4, %v519_v58  ;;  %v318_v7 = vpop.f32.mrf.mxu0 }
  0xe9   :  { %v524_v31 = vpop.f32.mrf.mxu1  ;;  %v1044_v19 = vpop.f32.mrf.mxu3 }
  0xea   :  { %v8867_v20 = vadd.f32 %v1044_v19, %v843_v6  ;;  %v525_v51 = vadd.f32 %v524_v31, %v312_v36  ;;  %v8921_v36 = vld [vmem:[%s12321_s0 + $0x1e0] sm:$0xff] }
  0xeb   :  { %7203 = vmatmul.msk.f32.gmra.mxu0 %vm161_vm1, %v8631_v41 }
  0xec   :  { %7027 = vmatmul.msk.f32.gmra.mxu1 %vm161_vm1, %v8657_v45  ;;  %7092 = vmatmul.msk.f32.gmra.mxu2 %vm161_vm1, %v8460_v12 }
  0xee   :  { %7158 = vmatmul.msk.f32.gmra.mxu3 %vm161_vm1, %v8877_v21 }
  0xef   :  { %v768_v33 = vpop.f32.mrf.mxu2 }
  0xf0   :  { %v844_v28 = vadd.f32 %v768_v33, %v522_v25  ;;  %v321_v30 = vpop.f32.mrf.mxu0 }
  0xf1   :  { %v527_v32 = vpop.f32.mrf.mxu1  ;;  %v1047_v38 = vpop.f32.mrf.mxu3 }
  0xf2   :  { %v8886_v35 = vadd.f32 %v1047_v38, %v844_v28  ;;  %v528_v31 = vadd.f32 %v527_v32, %v315_v54  ;;  %v8941_v54 = vld [vmem:[%s12321_s0 + $0x1e8] sm:$0xff] }
  0xf3   :  { %7204 = vmatmul.msk.f32.gmra.mxu0 %vm161_vm1, %v8644_v43 }
  0xf4   :  { %12356 = vst [vmem:[#allocation6_spill] sm:$0xff] %v8886_v35  ;;  %7028 = vmatmul.msk.f32.gmra.mxu1 %vm161_vm1, %v8403_v2  ;;  %7093 = vmatmul.msk.f32.gmra.mxu2 %vm161_vm1, %v8483_v16 }
  0xf6   :  { %7159 = vmatmul.msk.f32.gmra.mxu3 %vm161_vm1, %v8896_v22 }
  0xf7   :  { %v771_v56 = vpop.f32.mrf.mxu2 }
  0xf8   :  { %v845_v37 = vadd.f32 %v771_v56, %v525_v51  ;;  %v324_v58 = vpop.f32.mrf.mxu0 }
  0xf9   :  { %v530_v4 = vpop.f32.mrf.mxu1  ;;  %v1050_v6 = vpop.f32.mrf.mxu3 }
  0xfa   :  { %v8914_v19 = vadd.f32 %v1050_v6, %v845_v37  ;;  %v531_v32 = vadd.f32 %v530_v4, %v318_v7  ;;  %v8961_v7 = vld [vmem:[%s12321_s0 + $0x1f0] sm:$0xff] }
  0xfb   :  { %7205 = vmatmul.msk.f32.gmra.mxu0 %vm161_vm1, %v8657_v45 }
  0xfc   :  { %12357 = vst [vmem:[#allocation7_spill] sm:$0xff] %v8914_v19  ;;  %7029 = vmatmul.msk.f32.gmra.mxu1 %vm161_vm1, %v8448_v10  ;;  %7094 = vmatmul.msk.f32.gmra.mxu2 %vm161_vm1, %v8912_v9 }
  0xfe   :  { %7160 = vmatmul.msk.f32.gmra.mxu3 %vm161_vm1, %v8921_v36 }
  0xff   :  { %v774_v8 = vpop.f32.mrf.mxu2 }
 0x100   :  { %v846_v25 = vadd.f32 %v774_v8, %v528_v31  ;;  %v327_v33 = vpop.f32.mrf.mxu0  ;;  %v8952_v8 = vld [vmem:[%s12321_s0 + $0x170] sm:$0xff] }
 0x101   :  { %v533_v28 = vpop.f32.mrf.mxu1  ;;  %v1053_v38 = vpop.f32.mrf.mxu3 }
 0x102   :  { %v8934_v46 = vadd.f32 %v1053_v38, %v846_v25  ;;  %v534_v4 = vadd.f32 %v533_v28, %v321_v30  ;;  %v8981_v30 = vld [vmem:[%s12321_s0 + $0x1f8] sm:$0xff] }
 0x103   :  { %7206 = vmatmul.msk.f32.gmra.mxu0 %vm161_vm1, %v8403_v2 }
 0x104   :  { %12358 = vst [vmem:[#allocation8_spill] sm:$0xff] %v8934_v46  ;;  %7030 = vmatmul.msk.f32.gmra.mxu1 %vm161_vm1, %v8410_v3  ;;  %7095 = vmatmul.msk.f32.gmra.mxu2 %vm161_vm1, %v8932_v42 }
 0x106   :  { %7161 = vmatmul.msk.f32.gmra.mxu3 %vm161_vm1, %v8941_v54 }
 0x107   :  { %v777_v51 = vpop.f32.mrf.mxu2 }
 0x108   :  { %v847_v56 = vadd.f32 %v777_v51, %v531_v32  ;;  %v330_v37 = vpop.f32.mrf.mxu0 }
 0x109   :  { %v536_v6 = vpop.f32.mrf.mxu1  ;;  %v1056_v31 = vpop.f32.mrf.mxu3 }
 0x10a   :  { %v8954_v25 = vadd.f32 %v1056_v31, %v847_v56  ;;  %v537_v28 = vadd.f32 %v536_v6, %v324_v58 }
 0x10b   :  { %7207 = vmatmul.msk.f32.gmra.mxu0 %vm161_vm1, %v8448_v10 }
 0x10c   :  { %12359 = vst [vmem:[#allocation9_spill] sm:$0xff] %v8954_v25  ;;  %7031 = vmatmul.msk.f32.gmra.mxu1 %vm161_vm1, %v8453_v11  ;;  %7096 = vmatmul.msk.f32.gmra.mxu2 %vm161_vm1, %v8952_v8  ;;  %v8972_v25 = vld [vmem:[%s12321_s0 + $0x178] sm:$0xff] }
 0x10e   :  { %7162 = vmatmul.msk.f32.gmra.mxu3 %vm161_vm1, %v8961_v7 }
 0x10f   :  { %v780_v38 = vpop.f32.mrf.mxu2 }
 0x110   :  { %v848_v32 = vadd.f32 %v780_v38, %v534_v4  ;;  %v333_v51 = vpop.f32.mrf.mxu0 }
 0x111   :  { %v539_v56 = vpop.f32.mrf.mxu1  ;;  %v1059_v31 = vpop.f32.mrf.mxu3 }
 0x112   :  { %v8974_v46 = vadd.f32 %v1059_v31, %v848_v32 }
 0x113   :  { %7208 = vmatmul.msk.f32.gmra.mxu0 %vm161_vm1, %v8410_v3 }
 0x114   :  { %12360 = vst [vmem:[#allocation10_spill] sm:$0xff] %v8974_v46  ;;  %7097 = vmatmul.msk.f32.gmra.mxu2 %vm161_vm1, %v8972_v25  ;;  %7264 = vmatmul.msk.f32.vlgmr.msra.gmra.mxu1 %vm161_vm1, %v8618_v39  ;;  %v540_v39 = vadd.f32 %v539_v56, %v327_v33 }
 0x116   :  { %7163 = vmatmul.msk.f32.gmra.mxu3 %vm161_vm1, %v8981_v30 }
 0x117   :  { %v783_v4 = vpop.f32.mrf.mxu2 }
 0x118   :  { %v849_v38 = vadd.f32 %v783_v4, %v537_v28  ;;  %v336_v32 = vpop.f32.mrf.mxu0 }
 0x119   :  { %v542_v31 = vpop.f32.mrf.mxu1  ;;  %v1062_v46 = vpop.f32.mrf.mxu3 }
 0x11a   :  { %v8989_v19 = vadd.f32 %v1062_v46, %v849_v38 }
 0x11b   :  { %7209 = vmatmul.msk.f32.gmra.mxu0 %vm161_vm1, %v8453_v11 }
 0x11c   :  { %7265 = vmatmul.msk.f32.gmra.mxu1 %vm161_vm1, %v8631_v41  ;;  %7330 = vmatmul.msk.f32.vlgmr.msra.gmra.mxu2 %vm161_vm1, %v8720_v0  ;;  %v543_v41 = vadd.f32 %v542_v31, %v330_v37 }
 0x11e   :  { %7396 = vmatmul.msk.f32.vlgmr.msra.gmra.mxu3 %vm161_vm1, %v8780_v49 }
 0x11f   :  { %v786_v58 = vpop.f32.mrf.mxu2 }
 0x120   :  { %v850_v6 = vadd.f32 %v786_v58, %v540_v39  ;;  %v339_v28 = vpop.f32.mrf.mxu0 }
 0x121   :  { %v545_v4 = vpop.f32.mrf.mxu1  ;;  %v1065_v35 = vpop.f32.mrf.mxu3 }
 0x122   :  { %v8999_v46 = vadd.f32 %v1065_v35, %v850_v6 }
 0x123   :  { %7210 = vmatmul.msk.f32.gmra.mxu0 %vm161_vm1, %v8474_v14  ;;  %v546_v14 = vadd.f32 %v545_v4, %v333_v51 }
 0x124   :  { %7266 = vmatmul.msk.f32.gmra.mxu1 %vm161_vm1, %v8644_v43  ;;  %7331 = vmatmul.msk.f32.gmra.mxu2 %vm161_vm1, %v8735_v15 }
 0x126   :  { %7397 = vmatmul.msk.f32.gmra.mxu3 %vm161_vm1, %v8795_v1 }
 0x127   :  { %v789_v0 = vpop.f32.mrf.mxu2 }
 0x128   :  { %v851_v33 = vadd.f32 %v789_v0, %v543_v41  ;;  %v342_v56 = vpop.f32.mrf.mxu0 }
 0x129   :  { %v548_v38 = vpop.f32.mrf.mxu1  ;;  %v1068_v39 = vpop.f32.mrf.mxu3 }
 0x12a   :  { %v9009_v35 = vadd.f32 %v1068_v39, %v851_v33 }
 0x12b   :  { %7211 = vmatmul.msk.f32.gmra.mxu0 %vm161_vm1, %v8421_v5  ;;  %v549_v5 = vadd.f32 %v548_v38, %v336_v32 }
 0x12c   :  { %7267 = vmatmul.msk.f32.gmra.mxu1 %vm161_vm1, %v8657_v45  ;;  %7332 = vmatmul.msk.f32.gmra.mxu2 %vm161_vm1, %v8750_v24 }
 0x12e   :  { %7398 = vmatmul.msk.f32.gmra.mxu3 %vm161_vm1, %v8810_v18 }
 0x12f   :  { %v792_v43 = vpop.f32.mrf.mxu2 }
 0x130   :  { %v852_v15 = vadd.f32 %v792_v43, %v546_v14  ;;  %v345_v37 = vpop.f32.mrf.mxu0 }
 0x131   :  { %v551_v31 = vpop.f32.mrf.mxu1  ;;  %v1071_v58 = vpop.f32.mrf.mxu3 }
 0x132   :  { %v9019_v6 = vadd.f32 %v1071_v58, %v852_v15 }
 0x133   :  { %7212 = vmatmul.msk.f32.gmra.mxu0 %vm161_vm1, %v8460_v12 }
 0x134   :  { %7268 = vmatmul.msk.f32.gmra.mxu1 %vm161_vm1, %v8403_v2  ;;  %7333 = vmatmul.msk.f32.gmra.mxu2 %vm161_vm1, %v8765_v29  ;;  %v552_v2 = vadd.f32 %v551_v31, %v339_v28 }
 0x136   :  { %7399 = vmatmul.msk.f32.gmra.mxu3 %vm161_vm1, %v8825_v27 }
 0x137   :  { %v795_v45 = vpop.f32.mrf.mxu2 }
 0x138   :  { %v853_v24 = vadd.f32 %v795_v45, %v549_v5  ;;  %v348_v51 = vpop.f32.mrf.mxu0 }
 0x139   :  { %v554_v4 = vpop.f32.mrf.mxu1  ;;  %v1074_v41 = vpop.f32.mrf.mxu3 }
 0x13a   :  { %v9029_v0 = vadd.f32 %v1074_v41, %v853_v24 }
 0x13b   :  { %7213 = vmatmul.msk.f32.gmra.mxu0 %vm161_vm1, %v8483_v16 }
 0x13c   :  { %7269 = vmatmul.msk.f32.gmra.mxu1 %vm161_vm1, %v8448_v10  ;;  %7334 = vmatmul.msk.f32.gmra.mxu2 %vm161_vm1, %v8780_v49  ;;  %v555_v10 = vadd.f32 %v554_v4, %v342_v56 }
 0x13e   :  { %7400 = vmatmul.msk.f32.gmra.mxu3 %vm161_vm1, %v8840_v44 }
 0x13f   :  { %v798_v12 = vpop.f32.mrf.mxu2 }
 0x140   :  { %v854_v29 = vadd.f32 %v798_v12, %v552_v2  ;;  %v9039_v32 = vpop.f32.mrf.mxu0 }
 0x141   :  { %v557_v33 = vpop.f32.mrf.mxu1  ;;  %v1077_v38 = vpop.f32.mrf.mxu3 }
 0x142   :  { %v9041_v39 = vadd.f32 %v1077_v38, %v854_v29  ;;  %v7239_v29 = vld [vmem:[%s12321_s0 + $0x148] sm:$0xff] }
 0x143   :  { %7214 = vmatmul.msk.f32.gmra.mxu0 %vm161_vm1, %v8780_v49 }
 0x144   :  { %7270 = vmatmul.msk.f32.gmra.mxu1 %vm161_vm1, %v8410_v3  ;;  %7335 = vmatmul.msk.f32.gmra.mxu2 %vm161_vm1, %v8795_v1  ;;  %v558_v3 = vadd.f32 %v557_v33, %v345_v37 }
 0x146   :  { %7401 = vmatmul.msk.f32.gmra.mxu3 %vm161_vm1, %v8855_v61 }
 0x147   :  { %v801_v16 = vpop.f32.mrf.mxu2 }
 0x148   :  { %v855_v28 = vadd.f32 %v801_v16, %v555_v10  ;;  %v9051_v14 = vpop.f32.mrf.mxu0 }
 0x149   :  { %v560_v43 = vpop.f32.mrf.mxu1  ;;  %v1080_v15 = vpop.f32.mrf.mxu3 }
 0x14a   :  { %v9053_v31 = vadd.f32 %v1080_v15, %v855_v28 }
 0x14b   :  { %7215 = vmatmul.msk.f32.gmra.mxu0 %vm161_vm1, %v8795_v1  ;;  %v7238_v1 = vld [vmem:[%s12321_s0 + $0x140] sm:$0xff] }
 0x14c   :  { %7271 = vmatmul.msk.f32.gmra.mxu1 %vm161_vm1, %v8453_v11  ;;  %7336 = vmatmul.msk.f32.gmra.mxu2 %vm161_vm1, %v8810_v18  ;;  %v561_v11 = vadd.f32 %v560_v43, %v348_v51 }
 0x14e   :  { %7402 = vmatmul.msk.f32.gmra.mxu3 %vm161_vm1, %v8877_v21 }
 0x14f   :  { %v804_v49 = vpop.f32.mrf.mxu2 }
 0x150   :  { %v856_v56 = vadd.f32 %v804_v49, %v558_v3  ;;  %v9063_v58 = vpop.f32.mrf.mxu0 }
 0x151   :  { %v563_v5 = vpop.f32.mrf.mxu1  ;;  %v1083_v45 = vpop.f32.mrf.mxu3 }
 0x152   :  { %v9068_v24 = vadd.f32 %v1083_v45, %v856_v56  ;;  %v564_v51 = vadd.f32 %v563_v5, %v8671_v48  ;;  %v7241_v45 = vld [vmem:[%s12321_s0 + $0x158] sm:$0xff] }
 0x153   :  { %7216 = vmatmul.msk.f32.gmra.mxu0 %vm161_vm1, %v8810_v18 }
 0x154   :  { %7272 = vmatmul.msk.f32.gmra.mxu1 %vm161_vm1, %v7238_v1  ;;  %7337 = vmatmul.msk.f32.gmra.mxu2 %vm161_vm1, %v8825_v27 }
 0x156   :  { %7403 = vmatmul.msk.f32.gmra.mxu3 %vm161_vm1, %v8896_v22 }
 0x157   :  { %v807_v37 = vpop.f32.mrf.mxu2 }
 0x158   :  { %v857_v4 = vadd.f32 %v807_v37, %v561_v11  ;;  %v9077_v41 = vpop.f32.mrf.mxu0 }
 0x159   :  { %v566_v2 = vpop.f32.mrf.mxu1  ;;  %v1086_v12 = vpop.f32.mrf.mxu3 }
 0x15a   :  { %v9082_v18 = vadd.f32 %v1086_v12, %v857_v4  ;;  %v567_v48 = vadd.f32 %v566_v2, %v8684_v52 }
 0x15b   :  { %7217 = vmatmul.msk.f32.gmra.mxu0 %vm161_vm1, %v8825_v27  ;;  %v7240_v27 = vld [vmem:[%s12321_s0 + $0x150] sm:$0xff] }
 0x15c   :  { %7273 = vmatmul.msk.f32.gmra.mxu1 %vm161_vm1, %v7239_v29  ;;  %7338 = vmatmul.msk.f32.gmra.mxu2 %vm161_vm1, %v8840_v44 }
 0x15e   :  { %7404 = vmatmul.msk.f32.gmra.mxu3 %vm161_vm1, %v8921_v36 }
 0x15f   :  { %v810_v33 = vpop.f32.mrf.mxu2 }
 0x160   :  { %v858_v38 = vadd.f32 %v810_v33, %v564_v51  ;;  %v9092_v10 = vpop.f32.mrf.mxu0 }
 0x161   :  { %v569_v16 = vpop.f32.mrf.mxu1  ;;  %v1089_v28 = vpop.f32.mrf.mxu3 }
 0x162   :  { %v9097_v43 = vadd.f32 %v1089_v28, %v858_v38  ;;  %v570_v52 = vadd.f32 %v569_v16, %v8682_v50 }
 0x163   :  { %7218 = vmatmul.msk.f32.gmra.mxu0 %vm161_vm1, %v8840_v44 }
 0x164   :  { %7274 = vmatmul.msk.f32.gmra.mxu1 %vm161_vm1, %v7240_v27  ;;  %7339 = vmatmul.msk.f32.gmra.mxu2 %vm161_vm1, %v8855_v61 }
 0x166   :  { %7405 = vmatmul.msk.f32.gmra.mxu3 %vm161_vm1, %v8941_v54 }
 0x167   :  { %v813_v15 = vpop.f32.mrf.mxu2 }
 0x168   :  { %v859_v3 = vadd.f32 %v813_v15, %v567_v48  ;;  %v9107_v49 = vpop.f32.mrf.mxu0 }
 0x169   :  { %v572_v56 = vpop.f32.mrf.mxu1  ;;  %v1092_v5 = vpop.f32.mrf.mxu3 }
 0x16a   :  { %v9112_v1 = vadd.f32 %v1092_v5, %v859_v3  ;;  %v573_v50 = vadd.f32 %v572_v56, %v8697_v55 }
 0x16b   :  { %7219 = vmatmul.msk.f32.gmra.mxu0 %vm161_vm1, %v8855_v61 }
 0x16c   :  { %7275 = vmatmul.msk.f32.gmra.mxu1 %vm161_vm1, %v7241_v45  ;;  %7340 = vmatmul.msk.f32.gmra.mxu2 %vm161_vm1, %v8877_v21 }
 0x16e   :  { %7406 = vmatmul.msk.f32.gmra.mxu3 %vm161_vm1, %v8961_v7 }
 0x16f   :  { %v816_v11 = vpop.f32.mrf.mxu2 }
 0x170   :  { %v860_v37 = vadd.f32 %v816_v11, %v570_v52  ;;  %v9122_v4 = vpop.f32.mrf.mxu0 }
 0x171   :  { %v575_v2 = vpop.f32.mrf.mxu1  ;;  %v1095_v12 = vpop.f32.mrf.mxu3 }
 0x172   :  { %v9124_v29 = vadd.f32 %v1095_v12, %v860_v37  ;;  %v576_v55 = vadd.f32 %v575_v2, %v8711_v60 }
 0x173   :  { %7220 = vmatmul.msk.f32.gmra.mxu0 %vm161_vm1, %v8877_v21 }
 0x174   :  { %7276 = vmatmul.msk.f32.gmra.mxu1 %vm161_vm1, %v8912_v9  ;;  %7341 = vmatmul.msk.f32.gmra.mxu2 %vm161_vm1, %v8896_v22  ;;  %v9144_v9 = vld [vmem:[%s12321_s0 + $0x200] sm:$0xff] }
 0x176   :  { %7407 = vmatmul.msk.f32.gmra.mxu3 %vm161_vm1, %v8981_v30 }
 0x177   :  { %v819_v51 = vpop.f32.mrf.mxu2 }
 0x178   :  { %v861_v33 = vadd.f32 %v819_v51, %v573_v50  ;;  %v9135_v38 = vpop.f32.mrf.mxu0 }
 0x179   :  { %v578_v16 = vpop.f32.mrf.mxu1  ;;  %v1098_v28 = vpop.f32.mrf.mxu3 }
 0x17a   :  { %v9137_v27 = vadd.f32 %v1098_v28, %v861_v33  ;;  %v579_v60 = vadd.f32 %v578_v16, %v8686_v53 }
 0x17b   :  { %7221 = vmatmul.msk.f32.gmra.mxu0 %vm161_vm1, %v8896_v22 }
 0x17c   :  { %7277 = vmatmul.msk.f32.gmra.mxu1 %vm161_vm1, %v8932_v42  ;;  %7342 = vmatmul.msk.f32.gmra.mxu2 %vm161_vm1, %v8921_v36  ;;  %v9162_v42 = vld [vmem:[%s12321_s0 + $0x208] sm:$0xff] }
 0x17e   :  { %7408 = vmatmul.msk.f32.gmra.mxu3 %vm161_vm1, %v9144_v9 }
 0x17f   :  { %v822_v48 = vpop.f32.mrf.mxu2 }
 0x180   :  { %v862_v15 = vadd.f32 %v822_v48, %v576_v55  ;;  %v9153_v3 = vpop.f32.mrf.mxu0 }
 0x181   :  { %v581_v56 = vpop.f32.mrf.mxu1  ;;  %v1101_v5 = vpop.f32.mrf.mxu3 }
 0x182   :  { %v9155_v45 = vadd.f32 %v1101_v5, %v862_v15  ;;  %v582_v53 = vadd.f32 %v581_v56, %v8699_v57 }
 0x183   :  { %7222 = vmatmul.msk.f32.gmra.mxu0 %vm161_vm1, %v8921_v36 }
 0x184   :  { %7278 = vmatmul.msk.f32.gmra.mxu1 %vm161_vm1, %v8952_v8  ;;  %7343 = vmatmul.msk.f32.gmra.mxu2 %vm161_vm1, %v8941_v54  ;;  %v9180_v8 = vld [vmem:[%s12321_s0 + $0x210] sm:$0xff] }
 0x186   :  { %7409 = vmatmul.msk.f32.gmra.mxu3 %vm161_vm1, %v9162_v42 }
 0x187   :  { %v825_v52 = vpop.f32.mrf.mxu2 }
 0x188   :  { %v863_v11 = vadd.f32 %v825_v52, %v579_v60  ;;  %v9171_v37 = vpop.f32.mrf.mxu0 }
 0x189   :  { %v584_v2 = vpop.f32.mrf.mxu1  ;;  %v1104_v12 = vpop.f32.mrf.mxu3 }
 0x18a   :  { %v9173_v50 = vadd.f32 %v1104_v12, %v863_v11  ;;  %v585_v57 = vadd.f32 %v584_v2, %v8713_v62  ;;  %v7312_v11 = vld [vmem:[%s12321_s0 + $0x240] sm:$0xff]  ;;  %v1392_v2 = vadd.f32 %v9039_v32, %v8728_v13  ;;  %v9240_v32 = vld [vmem:[%s12321_s0 + $0x268] sm:$0xff] }
 0x18b   :  { %7223 = vmatmul.msk.f32.gmra.mxu0 %vm161_vm1, %v8941_v54  ;;  %v9219_v62 = vld [vmem:[%s12321_s0 + $0x260] sm:$0xff]  ;;  %12365 = vst [vmem:[#allocation15_spill] sm:$0xff] %v9240_v32 }
 0x18c   :  { %12361 = vst [vmem:[#allocation11_spill] sm:$0xff] %v9173_v50  ;;  %7279 = vmatmul.msk.f32.gmra.mxu1 %vm161_vm1, %v8972_v25  ;;  %7344 = vmatmul.msk.f32.gmra.mxu2 %vm161_vm1, %v8961_v7  ;;  %v9198_v25 = vld [vmem:[%s12321_s0 + $0x218] sm:$0xff]  ;;  %v9591_v50 = vld [vmem:[%s12321_s0 + $0x1b0] sm:$0xff] }
 0x18d   :  { %12364 = vst [vmem:[#allocation14_spill] sm:$0xff] %v9219_v62 }
 0x18e   :  { %7410 = vmatmul.msk.f32.gmra.mxu3 %vm161_vm1, %v9180_v8 }
 0x18f   :  { %v828_v51 = vpop.f32.mrf.mxu2 }
 0x190   :  { %v864_v33 = vadd.f32 %v828_v51, %v582_v53  ;;  %v9189_v16 = vpop.f32.mrf.mxu0 }
 0x191   :  { %v1107_v28 = vpop.f32.mrf.mxu3  ;;  %v1575_v55 = vpop.f32.mrf.mxu1 }
 0x192   :  { %v9191_v48 = vadd.f32 %v1107_v28, %v864_v33  ;;  %v1671_v53 = vadd.f32 %v1575_v55, %v1392_v2  ;;  %v1393_v55 = vadd.f32 %v9051_v14, %v8743_v23  ;;  %v9261_v14 = vld [vmem:[%s12321_s0 + $0x270] sm:$0xff] }
 0x193   :  { %7224 = vmatmul.msk.f32.gmra.mxu0 %vm161_vm1, %v8961_v7  ;;  %12366 = vst [vmem:[#allocation16_spill] sm:$0xff] %v9261_v14 }
 0x194   :  { %12362 = vst [vmem:[#allocation12_spill] sm:$0xff] %v9191_v48  ;;  %7280 = vmatmul.msk.f32.gmra.mxu1 %vm161_vm1, %v8840_v44  ;;  %7345 = vmatmul.msk.f32.gmra.mxu2 %vm161_vm1, %v8981_v30 }
 0x196   :  { %7411 = vmatmul.msk.f32.gmra.mxu3 %vm161_vm1, %v9198_v25 }
 0x197   :  { %v831_v15 = vpop.f32.mrf.mxu2 }
 0x198   :  { %v865_v56 = vadd.f32 %v831_v15, %v585_v57  ;;  %v9207_v5 = vpop.f32.mrf.mxu0 }
 0x199   :  { %v1110_v60 = vpop.f32.mrf.mxu3  ;;  %v1578_v52 = vpop.f32.mrf.mxu1 }
 0x19a   :  { %v9212_v12 = vadd.f32 %v1110_v60, %v865_v56  ;;  %v7313_v56 = vld [vmem:[%s12321_s0 + $0x248] sm:$0xff]  ;;  %v1672_v60 = vadd.f32 %v1578_v52, %v1393_v55  ;;  %v1394_v52 = vadd.f32 %v9063_v58, %v8758_v34  ;;  %v9282_v58 = vld [vmem:[%s12321_s0 + $0x278] sm:$0xff] }
 0x19b   :  { %7225 = vmatmul.msk.f32.gmra.mxu0 %vm161_vm1, %v8981_v30  ;;  %12367 = vst [vmem:[#allocation17_spill] sm:$0xff] %v9282_v58 }
 0x19c   :  { %12363 = vst [vmem:[#allocation13_spill] sm:$0xff] %v9212_v12  ;;  %7281 = vmatmul.msk.f32.gmra.mxu1 %vm161_vm1, %v8855_v61  ;;  %7346 = vmatmul.msk.f32.gmra.mxu2 %vm161_vm1, %v7312_v11  ;;  %v7315_v12 = vld [vmem:[%s12321_s0 + $0x258] sm:$0xff] }
 0x19e   :  { %7412 = vmatmul.msk.f32.gmra.mxu3 %vm161_vm1, %v9219_v62 }
 0x19f   :  { %v1854_v51 = vpop.f32.mrf.mxu2 }
 0x1a0   :  { %v1950_v33 = vadd.f32 %v1854_v51, %v1671_v53  ;;  %v9228_v28 = vpop.f32.mrf.mxu0 }
 0x1a1   :  { %v1581_v57 = vpop.f32.mrf.mxu1  ;;  %v2133_v15 = vpop.f32.mrf.mxu3 }
 0x1a2   :  { %v9233_v13 = vadd.f32 %v2133_v15, %v1950_v33  ;;  %v7314_v15 = vld [vmem:[%s12321_s0 + $0x250] sm:$0xff] }
 0x1a3   :  { %7226 = vmatmul.msk.f32.gmra.mxu0 %vm161_vm1, %v9144_v9 }
 0x1a4   :  { %7282 = vmatmul.msk.f32.gmra.mxu1 %vm161_vm1, %v8877_v21  ;;  %7347 = vmatmul.msk.f32.gmra.mxu2 %vm161_vm1, %v7313_v56  ;;  %v1673_v56 = vadd.f32 %v1581_v57, %v1394_v52  ;;  %v1395_v57 = vadd.f32 %v9077_v41, %v8773_v47  ;;  %v9300_v47 = vld [vmem:[%s12321_s0 + $0x280] sm:$0xff]  ;;  %v1396_v41 = vadd.f32 %v9092_v10, %v8788_v63  ;;  %v9319_v63 = vld [vmem:[%s12321_s0 + $0x288] sm:$0xff] }
 0x1a5   :  { %v1397_v10 = vadd.f32 %v9107_v49, %v8803_v17  ;;  %v9338_v17 = vld [vmem:[%s12321_s0 + $0x290] sm:$0xff]  ;;  %v1398_v49 = vadd.f32 %v9122_v4, %v8818_v26  ;;  %v9357_v26 = vld [vmem:[%s12321_s0 + $0x298] sm:$0xff]  ;;  %v1399_v4 = vadd.f32 %v9135_v38, %v8833_v40  ;;  %v9376_v40 = vld [vmem:[%s12321_s0 + $0x2a0] sm:$0xff]  ;;  %v1400_v38 = vadd.f32 %v9153_v3, %v8848_v59 }
 0x1a6   :  { %7413 = vmatmul.msk.f32.gmra.mxu3 %vm161_vm1, %v9240_v32  ;;  %v9395_v59 = vld [vmem:[%s12321_s0 + $0x2a8] sm:$0xff]  ;;  %v1401_v3 = vadd.f32 %v9171_v37, %v8867_v20 }
 0x1a7   :  { %v1857_v11 = vpop.f32.mrf.mxu2 }
 0x1a8   :  { %v1951_v2 = vadd.f32 %v1857_v11, %v1672_v60  ;;  %v9249_v53 = vpop.f32.mrf.mxu0 }
 0x1a9   :  { %v1584_v51 = vpop.f32.mrf.mxu1  ;;  %v2136_v33 = vpop.f32.mrf.mxu3 }
 0x1aa   :  { %v9254_v23 = vadd.f32 %v2136_v33, %v1951_v2 }
 0x1ab   :  { %7227 = vmatmul.msk.f32.gmra.mxu0 %vm161_vm1, %v9162_v42 }
 0x1ac   :  { %7283 = vmatmul.msk.f32.gmra.mxu1 %vm161_vm1, %v8896_v22  ;;  %7348 = vmatmul.msk.f32.gmra.mxu2 %vm161_vm1, %v7314_v15  ;;  %v1674_v15 = vadd.f32 %v1584_v51, %v1395_v57 }
 0x1ae   :  { %7414 = vmatmul.msk.f32.gmra.mxu3 %vm161_vm1, %v9261_v14 }
 0x1af   :  { %v1860_v55 = vpop.f32.mrf.mxu2 }
 0x1b0   :  { %v1952_v60 = vadd.f32 %v1860_v55, %v1673_v56  ;;  %v9270_v11 = vpop.f32.mrf.mxu0 }
 0x1b1   :  { %v1587_v2 = vpop.f32.mrf.mxu1  ;;  %v2139_v33 = vpop.f32.mrf.mxu3 }
 0x1b2   :  { %v9275_v34 = vadd.f32 %v2139_v33, %v1952_v60 }
 0x1b3   :  { %7228 = vmatmul.msk.f32.gmra.mxu0 %vm161_vm1, %v9180_v8 }
 0x1b4   :  { %7284 = vmatmul.msk.f32.gmra.mxu1 %vm161_vm1, %v8921_v36  ;;  %7349 = vmatmul.msk.f32.gmra.mxu2 %vm161_vm1, %v7315_v12  ;;  %v1675_v12 = vadd.f32 %v1587_v2, %v1396_v41 }
 0x1b6   :  { %7415 = vmatmul.msk.f32.gmra.mxu3 %vm161_vm1, %v9282_v58 }
 0x1b7   :  { %v1863_v52 = vpop.f32.mrf.mxu2 }
 0x1b8   :  { %v1953_v56 = vadd.f32 %v1863_v52, %v1674_v15  ;;  %v9291_v55 = vpop.f32.mrf.mxu0 }
 0x1b9   :  { %v1590_v60 = vpop.f32.mrf.mxu1  ;;  %v2142_v33 = vpop.f32.mrf.mxu3 }
 0x1ba   :  { %v9293_v48 = vadd.f32 %v2142_v33, %v1953_v56  ;;  %v1676_v2 = vadd.f32 %v1590_v60, %v1397_v10 }
 0x1bb   :  { %7229 = vmatmul.msk.f32.gmra.mxu0 %vm161_vm1, %v9198_v25 }
 0x1bc   :  { %7285 = vmatmul.msk.f32.gmra.mxu1 %vm161_vm1, %v8941_v54  ;;  %7350 = vmatmul.msk.f32.gmra.mxu2 %vm161_vm1, %v9219_v62 }
 0x1be   :  { %7416 = vmatmul.msk.f32.gmra.mxu3 %vm161_vm1, %v9300_v47 }
 0x1bf   :  { %v1866_v51 = vpop.f32.mrf.mxu2 }
 0x1c0   :  { %v1954_v57 = vadd.f32 %v1866_v51, %v1675_v12  ;;  %v9310_v15 = vpop.f32.mrf.mxu0 }
 0x1c1   :  { %v1593_v52 = vpop.f32.mrf.mxu1  ;;  %v2145_v56 = vpop.f32.mrf.mxu3 }
 0x1c2   :  { %v9312_v33 = vadd.f32 %v2145_v56, %v1954_v57  ;;  %v1677_v60 = vadd.f32 %v1593_v52, %v1398_v49 }
 0x1c3   :  { %7462 = vmatmul.msk.f32.vlgmr.msra.gmra.mxu0 %vm161_vm1, %v8840_v44 }
 0x1c4   :  { %7286 = vmatmul.msk.f32.gmra.mxu1 %vm161_vm1, %v8961_v7  ;;  %7351 = vmatmul.msk.f32.gmra.mxu2 %vm161_vm1, %v9240_v32 }
 0x1c6   :  { %7417 = vmatmul.msk.f32.gmra.mxu3 %vm161_vm1, %v9319_v63 }
 0x1c7   :  { %v1869_v41 = vpop.f32.mrf.mxu2 }
 0x1c8   :  { %v1955_v44 = vadd.f32 %v1869_v41, %v1676_v2  ;;  %v9329_v12 = vpop.f32.mrf.mxu0 }
 0x1c9   :  { %v1596_v51 = vpop.f32.mrf.mxu1  ;;  %v2148_v57 = vpop.f32.mrf.mxu3 }
 0x1ca   :  { %v9331_v56 = vadd.f32 %v2148_v57, %v1955_v44  ;;  %v1678_v52 = vadd.f32 %v1596_v51, %v1399_v4 }
 0x1cb   :  { %7463 = vmatmul.msk.f32.gmra.mxu0 %vm161_vm1, %v8855_v61 }
 0x1cc   :  { %7287 = vmatmul.msk.f32.gmra.mxu1 %vm161_vm1, %v8981_v30  ;;  %7352 = vmatmul.msk.f32.gmra.mxu2 %vm161_vm1, %v9261_v14 }
 0x1ce   :  { %7418 = vmatmul.msk.f32.gmra.mxu3 %vm161_vm1, %v9338_v17 }
 0x1cf   :  { %v1872_v10 = vpop.f32.mrf.mxu2 }
 0x1d0   :  { %v1956_v61 = vadd.f32 %v1872_v10, %v1677_v60  ;;  %v9348_v2 = vpop.f32.mrf.mxu0 }
 0x1d1   :  { %v1599_v41 = vpop.f32.mrf.mxu1  ;;  %v2151_v44 = vpop.f32.mrf.mxu3 }
 0x1d2   :  { %v9350_v57 = vadd.f32 %v2151_v44, %v1956_v61  ;;  %v1679_v51 = vadd.f32 %v1599_v41, %v1400_v38 }
 0x1d3   :  { %7464 = vmatmul.msk.f32.gmra.mxu0 %vm161_vm1, %v8877_v21 }
 0x1d4   :  { %7288 = vmatmul.msk.f32.gmra.mxu1 %vm161_vm1, %v9144_v9  ;;  %7353 = vmatmul.msk.f32.gmra.mxu2 %vm161_vm1, %v9282_v58 }
 0x1d6   :  { %7419 = vmatmul.msk.f32.gmra.mxu3 %vm161_vm1, %v9357_v26 }
 0x1d7   :  { %v1875_v49 = vpop.f32.mrf.mxu2 }
 0x1d8   :  { %v1957_v21 = vadd.f32 %v1875_v49, %v1678_v52  ;;  %v9367_v60 = vpop.f32.mrf.mxu0 }
 0x1d9   :  { %v1602_v10 = vpop.f32.mrf.mxu1  ;;  %v2154_v61 = vpop.f32.mrf.mxu3 }
 0x1da   :  { %v9369_v44 = vadd.f32 %v2154_v61, %v1957_v21  ;;  %v1680_v41 = vadd.f32 %v1602_v10, %v1401_v3  ;;  %v7657_v10 = vld [vmem:[%s12322_s1 + $0x8] sm:$0x7] }
 0x1db   :  { %7465 = vmatmul.msk.f32.gmra.mxu0 %vm161_vm1, %v8896_v22  ;;  %7658 = vmatpush.msk.msrb.mxu3 %vm258_vm0, %v7657_v10  ;;  %v12370_v3 = vld [vmem:[#allocation6_spill] sm:$0xff] }
 0x1dc   :  { %7289 = vmatmul.msk.f32.gmra.mxu1 %vm161_vm1, %v9162_v42  ;;  %7354 = vmatmul.msk.f32.gmra.mxu2 %vm161_vm1, %v9300_v47 }
 0x1de   :  { %7420 = vmatmul.msk.f32.gmra.mxu3 %vm161_vm1, %v9376_v40 }
 0x1df   :  { %v1878_v4 = vpop.f32.mrf.mxu2 }
 0x1e0   :  { %v1958_v22 = vadd.f32 %v1878_v4, %v1679_v51  ;;  %v9386_v52 = vpop.f32.mrf.mxu0  ;;  %v2653_v4 = vld [vmem:[%s12322_s1] sm:$0x7] }
 0x1e1   :  { %v1605_v49 = vpop.f32.mrf.mxu1  ;;  %v2157_v21 = vpop.f32.mrf.mxu3  ;;  %7592 = vmatpush.msk.msrb.mxu2 %vm258_vm0, %v2653_v4 }
 0x1e2   :  { %v9388_v61 = vadd.f32 %v2157_v21, %v1958_v22  ;;  %v9421_v21 = vld [vmem:[%s12321_s0 + $0x2b0] sm:$0xff] }
 0x1e3   :  { %7466 = vmatmul.msk.f32.gmra.mxu0 %vm161_vm1, %v8921_v36 }
 0x1e4   :  { %12368 = vst [vmem:[#allocation18_spill] sm:$0xff] %v9388_v61  ;;  %7290 = vmatmul.msk.f32.gmra.mxu1 %vm161_vm1, %v9180_v8  ;;  %7355 = vmatmul.msk.f32.gmra.mxu2 %vm161_vm1, %v9319_v63 }
 0x1e6   :  { %7421 = vmatmul.msk.f32.gmra.mxu3 %vm161_vm1, %v9395_v59 }
 0x1e7   :  { %v1881_v38 = vpop.f32.mrf.mxu2 }
 0x1e8   :  { %v1959_v36 = vadd.f32 %v1881_v38, %v1680_v41  ;;  %v9405_v51 = vpop.f32.mrf.mxu0  ;;  %v1402_v41 = vadd.f32 %v9189_v16, %v12370_v3  ;;  %v9437_v16 = vld [vmem:[%s12321_s0 + $0x220] sm:$0xff]  ;;  %v9449_v3 = vld [vmem:[%s12321_s0 + $0x2b8] sm:$0xff] }
 0x1e9   :  { %v1608_v22 = vpop.f32.mrf.mxu1  ;;  %v2160_v20 = vpop.f32.mrf.mxu3 }
 0x1ea   :  { %v9411_v37 = vadd.f32 %v2160_v20, %v1959_v36  ;;  %v1681_v38 = vadd.f32 %v1605_v49, %v1402_v41  ;;  %v7723_v49 = vld [vmem:[%s12322_s1 + $0xc] sm:$0x7] }
 0x1eb   :  { %7467 = vmatmul.msk.f32.gmra.mxu0 %vm161_vm1, %v8941_v54  ;;  %v12372_v41 = vld [vmem:[#allocation7_spill] sm:$0xff] }
 0x1ec   :  { %12369 = vst [vmem:[#allocation19_spill] sm:$0xff] %v9411_v37  ;;  %7291 = vmatmul.msk.f32.gmra.mxu1 %vm161_vm1, %v9198_v25  ;;  %7356 = vmatmul.msk.f32.gmra.mxu2 %vm161_vm1, %v9338_v17  ;;  %v9469_v37 = vld [vmem:[%s12321_s0 + $0x228] sm:$0xff] }
 0x1ed   :  { %7724 = vmatpush.msk.msrb.mxu0 %vm258_vm0, %v7723_v49  ;;  %12373 = vst [vmem:[#allocation7_spill] sm:$0xff] %v9469_v37  ;;  %v12376_v49 = vld [vmem:[#allocation8_spill] sm:$0xff] }
 0x1ee   :  { %7422 = vmatmul.msk.f32.gmra.mxu3 %vm161_vm1, %v9421_v21 }
 0x1ef   :  { %v1884_v54 = vpop.f32.mrf.mxu2 }
 0x1f0   :  { %v1960_v36 = vadd.f32 %v1884_v54, %v1681_v38  ;;  %v9432_v4 = vpop.f32.mrf.mxu0  ;;  %v1403_v38 = vadd.f32 %v9207_v5, %v12372_v41 }
 0x1f1   :  { %v1611_v20 = vpop.f32.mrf.mxu1  ;;  %v2163_v58 = vpop.f32.mrf.mxu3 }
 0x1f2   :  { %v9439_v10 = vadd.f32 %v2163_v58, %v1960_v36  ;;  %v7789_v58 = vld [vmem:[%s12322_s1 + $0x10] sm:$0x7] }
 0x1f3   :  { %7468 = vmatmul.msk.f32.gmra.mxu0 %vm161_vm1, %v8961_v7  ;;  %7790 = vmatpush.msk.msra.mxu1 %vm258_vm0, %v7789_v58  ;;  %v1682_v7 = vadd.f32 %v1608_v22, %v1403_v38  ;;  %v9478_v22 = vld [vmem:[%s12321_s0 + $0x2c0] sm:$0xff]  ;;  %v1404_v38 = vadd.f32 %v9228_v28, %v12376_v49  ;;  %v9493_v28 = vld [vmem:[%s12321_s0 + $0x230] sm:$0xff] }
 0x1f4   :  { %12371 = vst [vmem:[#allocation6_spill] sm:$0xff] %v9439_v10  ;;  %7292 = vmatmul.msk.f32.gmra.mxu1 %vm161_vm1, %v9437_v16  ;;  %7357 = vmatmul.msk.f32.gmra.mxu2 %vm161_vm1, %v9357_v26 }
 0x1f5   :  { %12375 = vst [vmem:[#allocation21_spill] sm:$0xff] %v9478_v22  ;;  %v1683_v58 = vadd.f32 %v1611_v20, %v1404_v38  ;;  %v9502_v20 = vld [vmem:[%s12321_s0 + $0x2c8] sm:$0xff]  ;;  %v12379_v38 = vld [vmem:[#allocation9_spill] sm:$0xff] }
 0x1f6   :  { %7423 = vmatmul.msk.f32.gmra.mxu3 %vm161_vm1, %v9449_v3  ;;  %12378 = vst [vmem:[#allocation22_spill] sm:$0xff] %v9502_v20 }
 0x1f7   :  { %v1887_v54 = vpop.f32.mrf.mxu2 }
 0x1f8   :  { %v1961_v5 = vadd.f32 %v1887_v54, %v1682_v7  ;;  %v9464_v36 = vpop.f32.mrf.mxu0 }
 0x1f9   :  { %v1614_v41 = vpop.f32.mrf.mxu1  ;;  %v2166_v10 = vpop.f32.mrf.mxu3 }
 0x1fa   :  { %v9471_v14 = vadd.f32 %v2166_v10, %v1961_v5 }
 0x1fb   :  { %7469 = vmatmul.msk.f32.gmra.mxu0 %vm161_vm1, %v8981_v30 }
 0x1fc   :  { %12374 = vst [vmem:[#allocation20_spill] sm:$0xff] %v9471_v14  ;;  %7293 = vmatmul.msk.f32.gmra.mxu1 %vm161_vm1, %v9469_v37  ;;  %7358 = vmatmul.msk.f32.gmra.mxu2 %vm161_vm1, %v9376_v40 }
 0x1fe   :  { %7424 = vmatmul.msk.f32.gmra.mxu3 %vm161_vm1, %v9478_v22  ;;  %v9617_v22 = vld [vmem:[%s12321_s0 + $0x1b8] sm:$0xff] }
 0x1ff   :  { %v1890_v10 = vpop.f32.mrf.mxu2 }
 0x200   :  { %v1962_v30 = vadd.f32 %v1890_v10, %v1683_v58  ;;  %v9488_v7 = vpop.f32.mrf.mxu0  ;;  %v1405_v58 = vadd.f32 %v9249_v53, %v12379_v38  ;;  %v9517_v53 = vld [vmem:[%s12321_s0 + $0x238] sm:$0xff] }
 0x201   :  { %v1617_v54 = vpop.f32.mrf.mxu1  ;;  %v2169_v5 = vpop.f32.mrf.mxu3 }
 0x202   :  { %v9495_v49 = vadd.f32 %v2169_v5, %v1962_v30  ;;  %v1684_v10 = vadd.f32 %v1614_v41, %v1405_v58  ;;  %v9526_v41 = vld [vmem:[%s12321_s0 + $0x2d0] sm:$0xff]  ;;  %v12382_v58 = vld [vmem:[#allocation10_spill] sm:$0xff] }
 0x203   :  { %7470 = vmatmul.msk.f32.gmra.mxu0 %vm161_vm1, %v9144_v9  ;;  %12381 = vst [vmem:[#allocation23_spill] sm:$0xff] %v9526_v41 }
 0x204   :  { %12377 = vst [vmem:[#allocation8_spill] sm:$0xff] %v9495_v49  ;;  %7294 = vmatmul.msk.f32.gmra.mxu1 %vm161_vm1, %v9493_v28  ;;  %7359 = vmatmul.msk.f32.gmra.mxu2 %vm161_vm1, %v9395_v59 }
 0x206   :  { %7425 = vmatmul.msk.f32.gmra.mxu3 %vm161_vm1, %v9502_v20 }
 0x207   :  { %v1893_v30 = vpop.f32.mrf.mxu2 }
 0x208   :  { %v1963_v5 = vadd.f32 %v1893_v30, %v1684_v10  ;;  %v9512_v14 = vpop.f32.mrf.mxu0  ;;  %v1406_v10 = vadd.f32 %v9270_v11, %v12382_v58  ;;  %v9541_v11 = vld [vmem:[%s12321_s0 + $0x1a0] sm:$0xff] }
 0x209   :  { %v1620_v49 = vpop.f32.mrf.mxu1  ;;  %v2172_v61 = vpop.f32.mrf.mxu3 }
 0x20a   :  { %v9519_v38 = vadd.f32 %v2172_v61, %v1963_v5  ;;  %v1685_v30 = vadd.f32 %v1617_v54, %v1406_v10  ;;  %v9550_v54 = vld [vmem:[%s12321_s0 + $0x2d8] sm:$0xff]  ;;  %v1407_v10 = vadd.f32 %v9291_v55, %v8989_v19  ;;  %v9565_v19 = vld [vmem:[%s12321_s0 + $0x1a8] sm:$0xff]  ;;  %v7494_v55 = vld [vmem:[%s12321_s0 + $0x180] sm:$0xff] }
 0x20b   :  { %7471 = vmatmul.msk.f32.gmra.mxu0 %vm161_vm1, %v9162_v42  ;;  %12384 = vst [vmem:[#allocation24_spill] sm:$0xff] %v9550_v54 }
 0x20c   :  { %12380 = vst [vmem:[#allocation9_spill] sm:$0xff] %v9519_v38  ;;  %7295 = vmatmul.msk.f32.gmra.mxu1 %vm161_vm1, %v9517_v53  ;;  %7360 = vmatmul.msk.f32.gmra.mxu2 %vm161_vm1, %v9421_v21 }
 0x20e   :  { %7426 = vmatmul.msk.f32.gmra.mxu3 %vm161_vm1, %v9526_v41 }
 0x20f   :  { %v1896_v61 = vpop.f32.mrf.mxu2 }
 0x210   :  { %v1964_v5 = vadd.f32 %v1896_v61, %v1685_v30  ;;  %v9536_v38 = vpop.f32.mrf.mxu0  ;;  %v1686_v30 = vadd.f32 %v1620_v49, %v1407_v10  ;;  %v9577_v49 = vld [vmem:[%s12321_s0 + $0x1c0] sm:$0xff]  ;;  %v1408_v10 = vadd.f32 %v9310_v15, %v8999_v46  ;;  %v7495_v46 = vld [vmem:[%s12321_s0 + $0x188] sm:$0xff] }
 0x211   :  { %v1623_v32 = vpop.f32.mrf.mxu1  ;;  %v2175_v62 = vpop.f32.mrf.mxu3 }
 0x212   :  { %v9543_v58 = vadd.f32 %v2175_v62, %v1964_v5 }
 0x213   :  { %7472 = vmatmul.msk.f32.gmra.mxu0 %vm161_vm1, %v9180_v8 }
 0x214   :  { %12383 = vst [vmem:[#allocation10_spill] sm:$0xff] %v9543_v58  ;;  %7361 = vmatmul.msk.f32.gmra.mxu2 %vm161_vm1, %v9449_v3  ;;  %7560 = vmatmul.msk.f32.vlgmr.msrb.gmra.mxu1 %vm161_vm1, %v9541_v11 }
 0x216   :  { %7427 = vmatmul.msk.f32.gmra.mxu3 %vm161_vm1, %v9550_v54 }
 0x217   :  { %v1899_v62 = vpop.f32.mrf.mxu2 }
 0x218   :  { %v1965_v61 = vadd.f32 %v1899_v62, %v1686_v30  ;;  %v9560_v5 = vpop.f32.mrf.mxu0  ;;  %v1687_v30 = vadd.f32 %v1623_v32, %v1408_v10  ;;  %v9603_v32 = vld [vmem:[%s12321_s0 + $0x1c8] sm:$0xff] }
 0x219   :  { %v1626_v58 = vpop.f32.mrf.mxu1  ;;  %v2178_v41 = vpop.f32.mrf.mxu3 }
 0x21a   :  { %v9570_v20 = vadd.f32 %v2178_v41, %v1965_v61 }
 0x21b   :  { %7473 = vmatmul.msk.f32.gmra.mxu0 %vm161_vm1, %v9198_v25 }
 0x21c   :  { %12385 = vst [vmem:[#allocation25_spill] sm:$0xff] %v9570_v20  ;;  %7561 = vmatmul.msk.f32.gmra.mxu1 %vm161_vm1, %v9565_v19  ;;  %7593 = vmatmul.msk.f32.vlgmr.msrb.gmra.mxu2 %vm161_vm1, %v7494_v55  ;;  %v1409_v55 = vadd.f32 %v9329_v12, %v9009_v35  ;;  %v7496_v35 = vld [vmem:[%s12321_s0 + $0x190] sm:$0xff] }
 0x21e   :  { %7659 = vmatmul.msk.f32.vlgmr.msrb.gmra.mxu3 %vm161_vm1, %v9577_v49  ;;  %v1688_v10 = vadd.f32 %v1626_v58, %v1409_v55  ;;  %v9629_v58 = vld [vmem:[%s12321_s0 + $0x1d0] sm:$0xff] }
 0x21f   :  { %v1902_v41 = vpop.f32.mrf.mxu2 }
 0x220   :  { %v1966_v62 = vadd.f32 %v1902_v41, %v1687_v30  ;;  %v9586_v61 = vpop.f32.mrf.mxu0 }
 0x221   :  { %v1629_v20 = vpop.f32.mrf.mxu1  ;;  %v2181_v54 = vpop.f32.mrf.mxu3 }
 0x222   :  { %v9596_v15 = vadd.f32 %v2181_v54, %v1966_v62 }
 0x223   :  { %7474 = vmatmul.msk.f32.gmra.mxu0 %vm161_vm1, %v9437_v16 }
 0x224   :  { %12386 = vst [vmem:[#allocation26_spill] sm:$0xff] %v9596_v15  ;;  %7562 = vmatmul.msk.f32.gmra.mxu1 %vm161_vm1, %v9591_v50  ;;  %7594 = vmatmul.msk.f32.gmra.mxu2 %vm161_vm1, %v7495_v46  ;;  %v1410_v46 = vadd.f32 %v9348_v2, %v9019_v6  ;;  %v9650_v2 = vld [vmem:[%s12321_s0 + $0x1d8] sm:$0xff] }
 0x226   :  { %7660 = vmatmul.msk.f32.gmra.mxu3 %vm161_vm1, %v9603_v32  ;;  %v1689_v55 = vadd.f32 %v1629_v20, %v1410_v46  ;;  %v1411_v20 = vadd.f32 %v9367_v60, %v9029_v0  ;;  %v9668_v0 = vld [vmem:[%s12321_s0 + $0x1e0] sm:$0xff]  ;;  %v1412_v60 = vadd.f32 %v9386_v52, %v9041_v39  ;;  %v9685_v39 = vld [vmem:[%s12321_s0 + $0x1e8] sm:$0xff]  ;;  %v1413_v52 = vadd.f32 %v9405_v51, %v9053_v31  ;;  %v9702_v31 = vld [vmem:[%s12321_s0 + $0x1f0] sm:$0xff] }
 0x227   :  { %v1905_v54 = vpop.f32.mrf.mxu2  ;;  %v1414_v51 = vadd.f32 %v9432_v4, %v9068_v24  ;;  %v9719_v24 = vld [vmem:[%s12321_s0 + $0x1f8] sm:$0xff] }
 0x228   :  { %v1967_v30 = vadd.f32 %v1905_v54, %v1688_v10  ;;  %v9612_v41 = vpop.f32.mrf.mxu0 }
 0x229   :  { %v1632_v62 = vpop.f32.mrf.mxu1  ;;  %v2184_v15 = vpop.f32.mrf.mxu3 }
 0x22a   :  { %v9622_v12 = vadd.f32 %v2184_v15, %v1967_v30 }
 0x22b   :  { %7475 = vmatmul.msk.f32.gmra.mxu0 %vm161_vm1, %v9469_v37  ;;  %v7497_v37 = vld [vmem:[%s12321_s0 + $0x198] sm:$0xff] }
 0x22c   :  { %12387 = vst [vmem:[#allocation27_spill] sm:$0xff] %v9622_v12  ;;  %7563 = vmatmul.msk.f32.gmra.mxu1 %vm161_vm1, %v9617_v22  ;;  %7595 = vmatmul.msk.f32.gmra.mxu2 %vm161_vm1, %v7496_v35  ;;  %v1690_v35 = vadd.f32 %v1632_v62, %v1411_v20 }
 0x22e   :  { %7661 = vmatmul.msk.f32.gmra.mxu3 %vm161_vm1, %v9629_v58 }
 0x22f   :  { %v1908_v15 = vpop.f32.mrf.mxu2 }
 0x230   :  { %v1968_v10 = vadd.f32 %v1908_v15, %v1689_v55  ;;  %v9638_v54 = vpop.f32.mrf.mxu0 }
 0x231   :  { %v1635_v30 = vpop.f32.mrf.mxu1  ;;  %v2187_v12 = vpop.f32.mrf.mxu3 }
 0x232   :  { %v9643_v6 = vadd.f32 %v2187_v12, %v1968_v10 }
 0x233   :  { %7476 = vmatmul.msk.f32.gmra.mxu0 %vm161_vm1, %v9493_v28 }
 0x234   :  { %12388 = vst [vmem:[#allocation28_spill] sm:$0xff] %v9643_v6  ;;  %7564 = vmatmul.msk.f32.gmra.mxu1 %vm161_vm1, %v9577_v49  ;;  %7596 = vmatmul.msk.f32.gmra.mxu2 %vm161_vm1, %v7497_v37  ;;  %v1691_v37 = vadd.f32 %v1635_v30, %v1412_v60 }
 0x236   :  { %7662 = vmatmul.msk.f32.gmra.mxu3 %vm161_vm1, %v9650_v2 }
 0x237   :  { %v1911_v12 = vpop.f32.mrf.mxu2 }
 0x238   :  { %v1969_v46 = vadd.f32 %v1911_v12, %v1690_v35  ;;  %v9659_v55 = vpop.f32.mrf.mxu0 }
 0x239   :  { %v1638_v15 = vpop.f32.mrf.mxu1  ;;  %v2190_v10 = vpop.f32.mrf.mxu3 }
 0x23a   :  { %v9661_v6 = vadd.f32 %v2190_v10, %v1969_v46 }
 0x23b   :  { %7477 = vmatmul.msk.f32.gmra.mxu0 %vm161_vm1, %v9517_v53 }
 0x23c   :  { %7565 = vmatmul.msk.f32.gmra.mxu1 %vm161_vm1, %v9603_v32  ;;  %7597 = vmatmul.msk.f32.gmra.mxu2 %vm161_vm1, %v9541_v11  ;;  %v1692_v11 = vadd.f32 %v1638_v15, %v1413_v52 }
 0x23e   :  { %7663 = vmatmul.msk.f32.gmra.mxu3 %vm161_vm1, %v9668_v0 }
 0x23f   :  { %v1914_v62 = vpop.f32.mrf.mxu2 }
 0x240   :  { %v1970_v20 = vadd.f32 %v1914_v62, %v1691_v37  ;;  %v2412_v35 = vpop.f32.mrf.mxu0 }
 0x241   :  { %v1641_v12 = vpop.f32.mrf.mxu1  ;;  %v2193_v46 = vpop.f32.mrf.mxu3 }
 0x242   :  { %v9678_v10 = vadd.f32 %v2193_v46, %v1970_v20 }
 0x243   :  { %7478 = vmatmul.msk.f32.gmra.mxu0 %vm161_vm1, %v9300_v47 }
 0x244   :  { %7566 = vmatmul.msk.f32.gmra.mxu1 %vm161_vm1, %v9629_v58  ;;  %7598 = vmatmul.msk.f32.gmra.mxu2 %vm161_vm1, %v9565_v19  ;;  %v1693_v19 = vadd.f32 %v1641_v12, %v1414_v51 }
 0x246   :  { %7664 = vmatmul.msk.f32.gmra.mxu3 %vm161_vm1, %v9685_v39 }
 0x247   :  { %v1917_v30 = vpop.f32.mrf.mxu2 }
 0x248   :  { %v1971_v60 = vadd.f32 %v1917_v30, %v1692_v11  ;;  %v2415_v37 = vpop.f32.mrf.mxu0 }
 0x249   :  { %v1644_v62 = vpop.f32.mrf.mxu1  ;;  %v2196_v20 = vpop.f32.mrf.mxu3 }
 0x24a   :  { %v9695_v46 = vadd.f32 %v2196_v20, %v1971_v60 }
 0x24b   :  { %7479 = vmatmul.msk.f32.gmra.mxu0 %vm161_vm1, %v9319_v63 }
 0x24c   :  { %7567 = vmatmul.msk.f32.gmra.mxu1 %vm161_vm1, %v9650_v2  ;;  %7599 = vmatmul.msk.f32.gmra.mxu2 %vm161_vm1, %v9591_v50  ;;  %v1415_v50 = vadd.f32 %v9464_v36, %v9082_v18  ;;  %v1416_v18 = vadd.f32 %v9488_v7, %v9097_v43 }
 0x24e   :  { %7665 = vmatmul.msk.f32.gmra.mxu3 %vm161_vm1, %v9702_v31  ;;  %v1694_v4 = vadd.f32 %v1644_v62, %v1415_v50 }
 0x24f   :  { %v1920_v15 = vpop.f32.mrf.mxu2 }
 0x250   :  { %v1972_v52 = vadd.f32 %v1920_v15, %v1693_v19  ;;  %v2418_v11 = vpop.f32.mrf.mxu0 }
 0x251   :  { %v1647_v30 = vpop.f32.mrf.mxu1  ;;  %v2199_v60 = vpop.f32.mrf.mxu3 }
 0x252   :  { %v9712_v20 = vadd.f32 %v2199_v60, %v1972_v52  ;;  %v1695_v36 = vadd.f32 %v1647_v30, %v1416_v18  ;;  %v1417_v30 = vadd.f32 %v9512_v14, %v9112_v1  ;;  %v9762_v18 = vadd.f32 %v2415_v37, %v9254_v23 }
 0x253   :  { %7480 = vmatmul.msk.f32.gmra.mxu0 %vm161_vm1, %v9338_v17 }
 0x254   :  { %7568 = vmatmul.msk.f32.gmra.mxu1 %vm161_vm1, %v9668_v0  ;;  %7600 = vmatmul.msk.f32.gmra.mxu2 %vm161_vm1, %v9617_v22 }
 0x256   :  { %7666 = vmatmul.msk.f32.gmra.mxu3 %vm161_vm1, %v9719_v24 }
 0x257   :  { %v1923_v12 = vpop.f32.mrf.mxu2 }
 0x258   :  { %v1973_v51 = vadd.f32 %v1923_v12, %v1694_v4  ;;  %v2421_v19 = vpop.f32.mrf.mxu0  ;;  %v9742_v4 = vadd.f32 %v2412_v35, %v9233_v13 }
 0x259   :  { %v1650_v15 = vpop.f32.mrf.mxu1  ;;  %v2202_v52 = vpop.f32.mrf.mxu3 }
 0x25a   :  { %v9729_v60 = vadd.f32 %v2202_v52, %v1973_v51  ;;  %v1696_v13 = vadd.f32 %v1650_v15, %v1417_v30  ;;  %v1418_v15 = vadd.f32 %v9536_v38, %v9124_v29 }
 0x25b   :  { %7481 = vmatmul.msk.f32.gmra.mxu0 %vm161_vm1, %v9357_v26 }
 0x25c   :  { %7569 = vmatmul.msk.f32.gmra.mxu1 %vm161_vm1, %v9685_v39  ;;  %7601 = vmatmul.msk.f32.gmra.mxu2 %vm161_vm1, %v9577_v49 }
 0x25e   :  { %7667 = vmatmul.msk.f32.gmra.mxu3 %vm161_vm1, %v9144_v9 }
 0x25f   :  { %v1926_v22 = vpop.f32.mrf.mxu2 }
 0x260   :  { %v1974_v62 = vadd.f32 %v1926_v22, %v1695_v36  ;;  %v2424_v50 = vpop.f32.mrf.mxu0 }
 0x261   :  { %v1653_v12 = vpop.f32.mrf.mxu1  ;;  %v2205_v51 = vpop.f32.mrf.mxu3  ;;  %v9745_v43 = vadd.f32 %v2424_v50, %v9312_v33  ;;  %v9782_v50 = vadd.f32 %v2418_v11, %v9275_v34 }
 0x262   :  { %v9747_v7 = vadd.f32 %v2205_v51, %v1974_v62  ;;  %v1697_v23 = vadd.f32 %v1653_v12, %v1418_v15  ;;  %v1419_v12 = vadd.f32 %v9560_v5, %v9137_v27 }
 0x263   :  { %v2540_v49 = vmax.f32 %v9742_v4, %v9745_v43  ;;  %7482 = vmatmul.msk.f32.gmra.mxu0 %vm161_vm1, %v9376_v40 }
 0x264   :  { %7570 = vmatmul.msk.f32.gmra.mxu1 %vm161_vm1, %v9702_v31  ;;  %7602 = vmatmul.msk.f32.gmra.mxu2 %vm161_vm1, %v9603_v32 }
 0x266   :  { %7668 = vmatmul.msk.f32.gmra.mxu3 %vm161_vm1, %v9162_v42 }
 0x267   :  { %v1929_v33 = vpop.f32.mrf.mxu2 }
 0x268   :  { %v1975_v35 = vadd.f32 %v1929_v33, %v1696_v13  ;;  %v2427_v52 = vpop.f32.mrf.mxu0  ;;  %v9802_v33 = vadd.f32 %v2421_v19, %v9293_v48 }
 0x269   :  { %v1656_v36 = vpop.f32.mrf.mxu1  ;;  %v2208_v22 = vpop.f32.mrf.mxu3  ;;  %v9765_v1 = vadd.f32 %v2427_v52, %v9331_v56 }
 0x26a   :  { %v9767_v14 = vadd.f32 %v2208_v22, %v1975_v35  ;;  %v1698_v34 = vadd.f32 %v1656_v36, %v1419_v12 }
 0x26b   :  { %7483 = vmatmul.msk.f32.gmra.mxu0 %vm161_vm1, %v9395_v59 }
 0x26c   :  { %7571 = vmatmul.msk.f32.gmra.mxu1 %vm161_vm1, %v9719_v24  ;;  %7603 = vmatmul.msk.f32.gmra.mxu2 %vm161_vm1, %v9629_v58  ;;  %v10124_v58 = vld [vmem:[%s12321_s0 + $0x2b0] sm:$0xff] }
 0x26e   :  { %7669 = vmatmul.msk.f32.gmra.mxu3 %vm161_vm1, %v9180_v8 }
 0x26f   :  { %v1932_v56 = vpop.f32.mrf.mxu2 }
 0x270   :  { %v1976_v37 = vadd.f32 %v1932_v56, %v1697_v23  ;;  %v2430_v62 = vpop.f32.mrf.mxu0  ;;  %v12389_v56 = vld [vmem:[#allocation21_spill] sm:$0xff] }
 0x271   :  { %v1659_v51 = vpop.f32.mrf.mxu1  ;;  %v2211_v30 = vpop.f32.mrf.mxu3  ;;  %v9785_v29 = vadd.f32 %v2430_v62, %v9350_v57 }
 0x272   :  { %v9787_v38 = vadd.f32 %v2211_v30, %v1976_v37 }
 0x273   :  { %7484 = vmatmul.msk.f32.gmra.mxu0 %vm161_vm1, %v9421_v21 }
 0x274   :  { %7572 = vmatmul.msk.f32.gmra.mxu1 %vm161_vm1, %v9144_v9  ;;  %7604 = vmatmul.msk.f32.gmra.mxu2 %vm161_vm1, %v9650_v2  ;;  %v1420_v2 = vadd.f32 %v9586_v61, %v9155_v45  ;;  %v12390_v45 = vld [vmem:[#allocation11_spill] sm:$0xff] }
 0x275   :  { %v12391_v61 = vld [vmem:[#allocation7_spill] sm:$0xff] }
 0x276   :  { %7670 = vmatmul.msk.f32.gmra.mxu3 %vm161_vm1, %v9198_v25  ;;  %v1699_v48 = vadd.f32 %v1659_v51, %v1420_v2 }
 0x277   :  { %v1935_v57 = vpop.f32.mrf.mxu2 }
 0x278   :  { %v1977_v11 = vadd.f32 %v1935_v57, %v1698_v34  ;;  %v2433_v13 = vpop.f32.mrf.mxu0  ;;  %v12392_v34 = vld [vmem:[#allocation22_spill] sm:$0xff] }
 0x279   :  { %v1662_v35 = vpop.f32.mrf.mxu1  ;;  %v2214_v52 = vpop.f32.mrf.mxu3  ;;  %v9805_v27 = vadd.f32 %v2433_v13, %v9369_v44 }
 0x27a   :  { %v9807_v5 = vadd.f32 %v2214_v52, %v1977_v11 }
 0x27b   :  { %7485 = vmatmul.msk.f32.gmra.mxu0 %vm161_vm1, %v9449_v3 }
 0x27c   :  { %7573 = vmatmul.msk.f32.gmra.mxu1 %vm161_vm1, %v9162_v42  ;;  %7605 = vmatmul.msk.f32.gmra.mxu2 %vm161_vm1, %v9668_v0  ;;  %v1421_v42 = vadd.f32 %v9612_v41, %v12390_v45  ;;  %v12393_v41 = vld [vmem:[#allocation12_spill] sm:$0xff] }
 0x27e   :  { %7671 = vmatmul.msk.f32.gmra.mxu3 %vm161_vm1, %v9437_v16  ;;  %v1700_v16 = vadd.f32 %v1662_v35, %v1421_v42  ;;  %v9860_v42 = vld [vmem:[%s12321_s0 + $0x240] sm:$0xff] }
 0x27f   :  { %v1938_v44 = vpop.f32.mrf.mxu2 }
 0x280   :  { %v1978_v19 = vadd.f32 %v1938_v44, %v1699_v48  ;;  %v2436_v36 = vpop.f32.mrf.mxu0  ;;  %v12394_v48 = vld [vmem:[#allocation23_spill] sm:$0xff]  ;;  %v12396_v44 = vld [vmem:[#allocation14_spill] sm:$0xff] }
 0x281   :  { %v1665_v22 = vpop.f32.mrf.mxu1  ;;  %v2217_v15 = vpop.f32.mrf.mxu3 }
 0x282   :  { %v9821_v23 = vadd.f32 %v2217_v15, %v1978_v19 }
 0x283   :  { %7486 = vmatmul.msk.f32.gmra.mxu0 %vm161_vm1, %v12389_v56 }
 0x284   :  { %7574 = vmatmul.msk.f32.gmra.mxu1 %vm161_vm1, %v9180_v8  ;;  %7606 = vmatmul.msk.f32.gmra.mxu2 %vm161_vm1, %v9685_v39  ;;  %v1422_v8 = vadd.f32 %v9638_v54, %v12393_v41  ;;  %v12395_v54 = vld [vmem:[#allocation13_spill] sm:$0xff] }
 0x286   :  { %7672 = vmatmul.msk.f32.gmra.mxu3 %vm161_vm1, %v12391_v61  ;;  %v1701_v39 = vadd.f32 %v1665_v22, %v1422_v8 }
 0x287   :  { %v1941_v0 = vpop.f32.mrf.mxu2 }
 0x288   :  { %v1979_v37 = vadd.f32 %v1941_v0, %v1700_v16  ;;  %v2439_v62 = vpop.f32.mrf.mxu0  ;;  %v12397_v16 = vld [vmem:[#allocation24_spill] sm:$0xff] }
 0x289   :  { %v1668_v51 = vpop.f32.mrf.mxu1  ;;  %v2220_v30 = vpop.f32.mrf.mxu3 }
 0x28a   :  { %v9833_v12 = vadd.f32 %v2220_v30, %v1979_v37  ;;  %v9875_v37 = vld [vmem:[%s12321_s0 + $0x2e0] sm:$0xff] }
 0x28b   :  { %7487 = vmatmul.msk.f32.gmra.mxu0 %vm161_vm1, %v12392_v34  ;;  %v12400_v34 = vld [vmem:[#allocation8_spill] sm:$0xff] }
 0x28c   :  { %7575 = vmatmul.msk.f32.gmra.mxu1 %vm161_vm1, %v9198_v25  ;;  %7607 = vmatmul.msk.f32.gmra.mxu2 %vm161_vm1, %v9702_v31  ;;  %v1423_v25 = vadd.f32 %v9659_v55, %v12395_v54 }
 0x28e   :  { %7673 = vmatmul.msk.f32.gmra.mxu3 %vm161_vm1, %v9493_v28  ;;  %v1702_v28 = vadd.f32 %v1668_v51, %v1423_v25  ;;  %v12399_v51 = vld [vmem:[#allocation18_spill] sm:$0xff] }
 0x28f   :  { %v1944_v57 = vpop.f32.mrf.mxu2  ;;  %v9878_v30 = vadd.f32 %v2436_v36, %v12399_v51  ;;  %v12401_v36 = vld [vmem:[#allocation16_spill] sm:$0xff]  ;;  %v9903_v25 = vld [vmem:[%s12321_s0 + $0x2e8] sm:$0xff] }
 0x290   :  { %v1980_v11 = vadd.f32 %v1944_v57, %v1701_v39  ;;  %v2442_v13 = vpop.f32.mrf.mxu0  ;;  %v9886_v57 = vld [vmem:[%s12321_s0 + $0x248] sm:$0xff] }
 0x291   :  { %v2223_v35 = vpop.f32.mrf.mxu3  ;;  %v2803_v52 = vpop.f32.mrf.mxu1 }
 0x292   :  { %v9845_v2 = vadd.f32 %v2223_v35, %v1980_v11 }
 0x293   :  { %7488 = vmatmul.msk.f32.gmra.mxu0 %vm161_vm1, %v12394_v48 }
 0x294   :  { %7576 = vmatmul.msk.f32.gmra.mxu1 %vm161_vm1, %v12396_v44  ;;  %7608 = vmatmul.msk.f32.gmra.mxu2 %vm161_vm1, %v9719_v24  ;;  %v12398_v24 = vld [vmem:[#allocation15_spill] sm:$0xff] }
 0x295   :  { %v12402_v44 = vld [vmem:[#allocation19_spill] sm:$0xff] }
 0x296   :  { %7674 = vmatmul.msk.f32.gmra.mxu3 %vm161_vm1, %v9517_v53 }
 0x297   :  { %v1947_v31 = vpop.f32.mrf.mxu2 }
 0x298   :  { %v1981_v19 = vadd.f32 %v1947_v31, %v1702_v28  ;;  %v2445_v22 = vpop.f32.mrf.mxu0  ;;  %v9906_v28 = vadd.f32 %v2439_v62, %v12402_v44  ;;  %v12403_v31 = vld [vmem:[#allocation9_spill] sm:$0xff] }
 0x299   :  { %v2226_v15 = vpop.f32.mrf.mxu3  ;;  %v2806_v45 = vpop.f32.mrf.mxu1  ;;  %v12404_v62 = vld [vmem:[#allocation17_spill] sm:$0xff] }
 0x29a   :  { %v9862_v55 = vadd.f32 %v2226_v15, %v1981_v19 }
 0x29b   :  { %7489 = vmatmul.msk.f32.gmra.mxu0 %vm161_vm1, %v12397_v16 }
 0x29c   :  { %7577 = vmatmul.msk.f32.gmra.mxu1 %vm161_vm1, %v12398_v24  ;;  %7609 = vmatmul.msk.f32.gmra.mxu2 %vm161_vm1, %v9860_v42  ;;  %v9914_v24 = vld [vmem:[%s12321_s0 + $0x250] sm:$0xff] }
 0x29e   :  { %7675 = vmatmul.msk.f32.gmra.mxu3 %vm161_vm1, %v9300_v47 }
 0x29f   :  { %v3015_v53 = vpop.f32.mrf.mxu2 }
 0x2a0   :  { %v3016_v61 = vadd.f32 %v3015_v53, %v2803_v52  ;;  %v2448_v0 = vpop.f32.mrf.mxu0  ;;  %v9970_v53 = vld [vmem:[%s12321_s0 + $0x260] sm:$0xff] }
 0x2a1   :  { %v9881_v41 = vadd.f32 %v2448_v0, %v12400_v34  ;;  %v2809_v8 = vpop.f32.mrf.mxu1  ;;  %v3260_v39 = vpop.f32.mrf.mxu3  ;;  %v9931_v34 = vld [vmem:[%s12321_s0 + $0x2f0] sm:$0xff] }
 0x2a2   :  { %v9888_v11 = vadd.f32 %v3260_v39, %v3016_v61  ;;  %v12405_v39 = vld [vmem:[#allocation6_spill] sm:$0xff] }
 0x2a3   :  { %7490 = vmatmul.msk.f32.gmra.mxu0 %vm161_vm1, %v9875_v37 }
 0x2a4   :  { %7578 = vmatmul.msk.f32.gmra.mxu1 %vm161_vm1, %v12401_v36  ;;  %7610 = vmatmul.msk.f32.gmra.mxu2 %vm161_vm1, %v9886_v57  ;;  %v9934_v36 = vadd.f32 %v2442_v13, %v12405_v39 }
 0x2a6   :  { %7676 = vmatmul.msk.f32.gmra.mxu3 %vm161_vm1, %v9319_v63 }
 0x2a7   :  { %v3018_v52 = vpop.f32.mrf.mxu2 }
 0x2a8   :  { %v3019_v48 = vadd.f32 %v3018_v52, %v2806_v45  ;;  %v2451_v54 = vpop.f32.mrf.mxu0  ;;  %v12406_v52 = vld [vmem:[#allocation10_spill] sm:$0xff] }
 0x2a9   :  { %v9909_v19 = vadd.f32 %v2451_v54, %v12403_v31  ;;  %v2812_v15 = vpop.f32.mrf.mxu1  ;;  %v3263_v16 = vpop.f32.mrf.mxu3  ;;  %v9942_v31 = vld [vmem:[%s12321_s0 + $0x258] sm:$0xff] }
 0x2aa   :  { %v9916_v45 = vadd.f32 %v3263_v16, %v3019_v48 }
 0x2ab   :  { %7491 = vmatmul.msk.f32.gmra.mxu0 %vm161_vm1, %v9903_v25 }
 0x2ac   :  { %7579 = vmatmul.msk.f32.gmra.mxu1 %vm161_vm1, %v12404_v62  ;;  %7611 = vmatmul.msk.f32.gmra.mxu2 %vm161_vm1, %v9914_v24 }
 0x2ae   :  { %7677 = vmatmul.msk.f32.gmra.mxu3 %vm161_vm1, %v9338_v17 }
 0x2af   :  { %v3021_v61 = vpop.f32.mrf.mxu2 }
 0x2b0   :  { %v3022_v0 = vadd.f32 %v3021_v61, %v2809_v8  ;;  %v2454_v51 = vpop.f32.mrf.mxu0 }
 0x2b1   :  { %v9937_v48 = vadd.f32 %v2454_v51, %v12406_v52  ;;  %v2815_v54 = vpop.f32.mrf.mxu1  ;;  %v3266_v44 = vpop.f32.mrf.mxu3  ;;  %v12407_v51 = vld [vmem:[#allocation20_spill] sm:$0xff]  ;;  %v12408_v52 = vld [vmem:[#allocation25_spill] sm:$0xff] }
 0x2b2   :  { %v9944_v8 = vadd.f32 %v3266_v44, %v3022_v0  ;;  %v9959_v0 = vld [vmem:[%s12321_s0 + $0x2f8] sm:$0xff]  ;;  %v9962_v39 = vadd.f32 %v2445_v22, %v12407_v51 }
 0x2b3   :  { %7492 = vmatmul.msk.f32.gmra.mxu0 %vm161_vm1, %v9931_v34 }
 0x2b4   :  { %7580 = vmatmul.msk.f32.gmra.mxu1 %vm161_vm1, %v9300_v47  ;;  %7612 = vmatmul.msk.f32.gmra.mxu2 %vm161_vm1, %v9942_v31 }
 0x2b6   :  { %7678 = vmatmul.msk.f32.gmra.mxu3 %vm161_vm1, %v9357_v26 }
 0x2b7   :  { %v3024_v13 = vpop.f32.mrf.mxu2 }
 0x2b8   :  { %v3025_v62 = vadd.f32 %v3024_v13, %v2812_v15  ;;  %v2457_v61 = vpop.f32.mrf.mxu0  ;;  %v8350_v13 = vmov 0.0  }
 0x2b9   :  { %v9965_v44 = vadd.f32 %v2457_v61, %v12408_v52  ;;  %v2818_v47 = vpop.f32.mrf.mxu1  ;;  %v3269_v16 = vpop.f32.mrf.mxu3  ;;  %v9989_v52 = vld [vmem:[%s12321_s0 + $0x268] sm:$0xff]  ;;  %48 = vst.msk [vmem:[#allocation2 + $0xa0] sm:$0xff] %vm27_vm2, %v8350_v13 }
 0x2ba   :  { %v9972_v15 = vadd.f32 %v3269_v16, %v3025_v62  ;;  %56 = vst.msk [vmem:[#allocation2 + $0xe0] sm:$0xff] %vm27_vm2, %v8350_v13 }
 0x2bb   :  { %7493 = vmatmul.msk.f32.gmra.mxu0 %vm161_vm1, %v9959_v0  ;;  %28 = vst.msk [vmem:[#allocation2] sm:$0xff] %vm27_vm2, %v8350_v13 }
 0x2bc   :  { %7581 = vmatmul.msk.f32.gmra.mxu1 %vm161_vm1, %v9319_v63  ;;  %7613 = vmatmul.msk.f32.gmra.mxu2 %vm161_vm1, %v9970_v53  ;;  %29 = vst.msk [vmem:[#allocation2 + $0x8] sm:$0xff] %vm27_vm2, %v8350_v13 }
 0x2bd   :  { %30 = vst.msk [vmem:[#allocation2 + $0x10] sm:$0xff] %vm27_vm2, %v8350_v13 }
 0x2be   :  { %7679 = vmatmul.msk.f32.gmra.mxu3 %vm161_vm1, %v9376_v40  ;;  %31 = vst.msk [vmem:[#allocation2 + $0x18] sm:$0xff] %vm27_vm2, %v8350_v13 }
 0x2bf   :  { %v3027_v22 = vpop.f32.mrf.mxu2  ;;  %32 = vst.msk [vmem:[#allocation2 + $0x20] sm:$0xff] %vm27_vm2, %v8350_v13 }
 0x2c0   :  { %v3028_v61 = vadd.f32 %v3027_v22, %v2815_v54  ;;  %v9984_v51 = vpop.f32.mrf.mxu0  ;;  %33 = vst.msk [vmem:[#allocation2 + $0x28] sm:$0xff] %vm27_vm2, %v8350_v13 }
 0x2c1   :  { %v2821_v16 = vpop.f32.mrf.mxu1  ;;  %v3272_v62 = vpop.f32.mrf.mxu3  ;;  %34 = vst.msk [vmem:[#allocation2 + $0x30] sm:$0xff] %vm27_vm2, %v8350_v13 }
 0x2c2   :  { %v9993_v63 = vadd.f32 %v3272_v62, %v3028_v61  ;;  %v10022_v62 = vld [vmem:[%s12321_s0 + $0x270] sm:$0xff]  ;;  %35 = vst.msk [vmem:[#allocation2 + $0x38] sm:$0xff] %vm27_vm2, %v8350_v13 }
 0x2c3   :  { %7725 = vmatmul.msk.f32.vlgmr.msrb.gmra.mxu0 %vm161_vm1, %v9860_v42  ;;  %36 = vst.msk [vmem:[#allocation2 + $0x40] sm:$0xff] %vm27_vm2, %v8350_v13 }
 0x2c4   :  { %7582 = vmatmul.msk.f32.gmra.mxu1 %vm161_vm1, %v9338_v17  ;;  %7614 = vmatmul.msk.f32.gmra.mxu2 %vm161_vm1, %v9989_v52  ;;  %37 = vst.msk [vmem:[#allocation2 + $0x48] sm:$0xff] %vm27_vm2, %v8350_v13 }
 0x2c5   :  { %38 = vst.msk [vmem:[#allocation2 + $0x50] sm:$0xff] %vm27_vm2, %v8350_v13 }
 0x2c6   :  { %7680 = vmatmul.msk.f32.gmra.mxu3 %vm161_vm1, %v9395_v59  ;;  %39 = vst.msk [vmem:[#allocation2 + $0x58] sm:$0xff] %vm27_vm2, %v8350_v13 }
 0x2c7   :  { %v3030_v42 = vpop.f32.mrf.mxu2  ;;  %40 = vst.msk [vmem:[#allocation2 + $0x60] sm:$0xff] %vm27_vm2, %v8350_v13 }
 0x2c8   :  { %v3031_v17 = vadd.f32 %v3030_v42, %v2818_v47  ;;  %v10015_v54 = vpop.f32.mrf.mxu0  ;;  %41 = vst.msk [vmem:[#allocation2 + $0x68] sm:$0xff] %vm27_vm2, %v8350_v13 }
 0x2c9   :  { %v2824_v22 = vpop.f32.mrf.mxu1  ;;  %v3275_v61 = vpop.f32.mrf.mxu3  ;;  %42 = vst.msk [vmem:[#allocation2 + $0x70] sm:$0xff] %vm27_vm2, %v8350_v13 }
 0x2ca   :  { %v10026_v35 = vadd.f32 %v3275_v61, %v3031_v17  ;;  %v10055_v61 = vld [vmem:[%s12321_s0 + $0x278] sm:$0xff]  ;;  %43 = vst.msk [vmem:[#allocation2 + $0x78] sm:$0xff] %vm27_vm2, %v8350_v13 }
 0x2cb   :  { %7726 = vmatmul.msk.f32.gmra.mxu0 %vm161_vm1, %v9886_v57  ;;  %44 = vst.msk [vmem:[#allocation2 + $0x80] sm:$0xff] %vm27_vm2, %v8350_v13 }
 0x2cc   :  { %7583 = vmatmul.msk.f32.gmra.mxu1 %vm161_vm1, %v9357_v26  ;;  %7615 = vmatmul.msk.f32.gmra.mxu2 %vm161_vm1, %v10022_v62  ;;  %45 = vst.msk [vmem:[#allocation2 + $0x88] sm:$0xff] %vm27_vm2, %v8350_v13 }
 0x2cd   :  { %46 = vst.msk [vmem:[#allocation2 + $0x90] sm:$0xff] %vm27_vm2, %v8350_v13 }
 0x2ce   :  { %7681 = vmatmul.msk.f32.gmra.mxu3 %vm161_vm1, %v9421_v21  ;;  %47 = vst.msk [vmem:[#allocation2 + $0x98] sm:$0xff] %vm27_vm2, %v8350_v13 }
 0x2cf   :  { %v3033_v57 = vpop.f32.mrf.mxu2  ;;  %49 = vst.msk [vmem:[#allocation2 + $0xa8] sm:$0xff] %vm27_vm2, %v8350_v13 }
 0x2d0   :  { %v3034_v26 = vadd.f32 %v3033_v57, %v2821_v16  ;;  %v10048_v47 = vpop.f32.mrf.mxu0  ;;  %50 = vst.msk [vmem:[#allocation2 + $0xb0] sm:$0xff] %vm27_vm2, %v8350_v13 }
 0x2d1   :  { %v2827_v42 = vpop.f32.mrf.mxu1  ;;  %v3278_v17 = vpop.f32.mrf.mxu3  ;;  %51 = vst.msk [vmem:[#allocation2 + $0xb8] sm:$0xff] %vm27_vm2, %v8350_v13 }
 0x2d2   :  { %v10059_v21 = vadd.f32 %v3278_v17, %v3034_v26  ;;  %v10088_v17 = vld [vmem:[%s12321_s0 + $0x280] sm:$0xff]  ;;  %52 = vst.msk [vmem:[#allocation2 + $0xc0] sm:$0xff] %vm27_vm2, %v8350_v13 }
 0x2d3   :  { %7727 = vmatmul.msk.f32.gmra.mxu0 %vm161_vm1, %v9914_v24  ;;  %53 = vst.msk [vmem:[#allocation2 + $0xc8] sm:$0xff] %vm27_vm2, %v8350_v13 }
 0x2d4   :  { %7584 = vmatmul.msk.f32.gmra.mxu1 %vm161_vm1, %v9376_v40  ;;  %7616 = vmatmul.msk.f32.gmra.mxu2 %vm161_vm1, %v10055_v61  ;;  %54 = vst.msk [vmem:[#allocation2 + $0xd0] sm:$0xff] %vm27_vm2, %v8350_v13 }
 0x2d5   :  { %55 = vst.msk [vmem:[#allocation2 + $0xd8] sm:$0xff] %vm27_vm2, %v8350_v13 }
 0x2d6   :  { %7682 = vmatmul.msk.f32.gmra.mxu3 %vm161_vm1, %v9449_v3  ;;  %57 = vst.msk [vmem:[#allocation2 + $0xe8] sm:$0xff] %vm27_vm2, %v8350_v13 }
 0x2d7   :  { %v3036_v24 = vpop.f32.mrf.mxu2  ;;  %58 = vst.msk [vmem:[#allocation2 + $0xf0] sm:$0xff] %vm27_vm2, %v8350_v13 }
 0x2d8   :  { %v3037_v40 = vadd.f32 %v3036_v24, %v2824_v22  ;;  %v10081_v16 = vpop.f32.mrf.mxu0  ;;  %59 = vst.msk [vmem:[#allocation2 + $0xf8] sm:$0xff] %vm27_vm2, %v8350_v13  ;;  %v12409_v24 = vld [vmem:[#allocation26_spill] sm:$0xff] }
 0x2d9   :  { %v2830_v57 = vpop.f32.mrf.mxu1  ;;  %v3281_v26 = vpop.f32.mrf.mxu3  ;;  %60 = vst.msk [vmem:[#allocation2 + $0x100] sm:$0xff] %vm27_vm2, %v8350_v13 }
 0x2da   :  { %v10092_v3 = vadd.f32 %v3281_v26, %v3037_v40  ;;  %v2524_v40 = vadd.f32 %v9984_v51, %v12409_v24  ;;  %61 = vst.msk [vmem:[#allocation2 + $0x108] sm:$0xff] %vm27_vm2, %v8350_v13 }
 0x2db   :  { %7728 = vmatmul.msk.f32.gmra.mxu0 %vm161_vm1, %v9942_v31  ;;  %62 = vst.msk [vmem:[#allocation2 + $0x110] sm:$0xff] %vm27_vm2, %v8350_v13 }
 0x2dc   :  { %7585 = vmatmul.msk.f32.gmra.mxu1 %vm161_vm1, %v9395_v59  ;;  %7617 = vmatmul.msk.f32.gmra.mxu2 %vm161_vm1, %v10088_v17  ;;  %63 = vst.msk [vmem:[#allocation2 + $0x118] sm:$0xff] %vm27_vm2, %v8350_v13 }
 0x2dd   :  { %64 = vst.msk [vmem:[#allocation2 + $0x120] sm:$0xff] %vm27_vm2, %v8350_v13 }
 0x2de   :  { %7683 = vmatmul.msk.f32.gmra.mxu3 %vm161_vm1, %v12389_v56  ;;  %65 = vst.msk [vmem:[#allocation2 + $0x128] sm:$0xff] %vm27_vm2, %v8350_v13 }
 0x2df   :  { %v3039_v31 = vpop.f32.mrf.mxu2  ;;  %66 = vst.msk [vmem:[#allocation2 + $0x130] sm:$0xff] %vm27_vm2, %v8350_v13 }
 0x2e0   :  { %v3040_v59 = vadd.f32 %v3039_v31, %v2827_v42  ;;  %v2472_v22 = vpop.f32.mrf.mxu0  ;;  %v10129_v42 = vld [vmem:[%s12321_s0 + $0x288] sm:$0xff]  ;;  %v10138_v31 = vld [vmem:[%s12323_s2] ss:$0 sm:$0xff]  ;;  %67 = vst.msk [vmem:[#allocation2 + $0x138] sm:$0xff] %vm27_vm2, %v8350_v13 }
 0x2e1   :  { %v2528_v26 = vadd.f32 %v2472_v22, %v9678_v10  ;;  %v2833_v56 = vpop.f32.mrf.mxu1  ;;  %v3284_v9 = vpop.f32.mrf.mxu3  ;;  %v10147_v22 = vld [vmem:[%s12321_s0 + $0x2c8] sm:$0xff]  ;;  %68 = vst.msk [vmem:[#allocation2 + $0x140] sm:$0xff] %vm27_vm2, %v8350_v13 }
 0x2e2   :  { %v10133_v51 = vadd.f32 %v3284_v9, %v3040_v59  ;;  %69 = vst.msk [vmem:[#allocation2 + $0x148] sm:$0xff] %vm27_vm2, %v8350_v13 }
 0x2e3   :  { %v2544_v10 = vmax.f32 %v2524_v40, %v2528_v26  ;;  %7729 = vmatmul.msk.f32.gmra.mxu0 %vm161_vm1, %v9970_v53  ;;  %70 = vst.msk [vmem:[#allocation2 + $0x150] sm:$0xff] %vm27_vm2, %v8350_v13 }
 0x2e4   :  { %12410 = vst [vmem:[#allocation21_spill] sm:$0xff] %v10133_v51  ;;  %7586 = vmatmul.msk.f32.gmra.mxu1 %vm161_vm1, %v10124_v58  ;;  %7618 = vmatmul.msk.f32.gmra.mxu2 %vm161_vm1, %v10129_v42  ;;  %v10177_v51 = vld [vmem:[%s12321_s0 + $0x2b8] sm:$0xff] }
 0x2e5   :  { %v2548_v9 = vmax.f32 %v2540_v49, %v2544_v10  ;;  %v12411_v49 = vld [vmem:[#allocation27_spill] sm:$0xff]  ;;  %71 = vst.msk [vmem:[#allocation2 + $0x158] sm:$0xff] %vm27_vm2, %v8350_v13 }
 0x2e6   :  { %7684 = vmatmul.msk.f32.gmra.mxu3 %vm161_vm1, %v10147_v22  ;;  %v2525_v40 = vadd.f32 %v10015_v54, %v12411_v49  ;;  %72 = vst.msk [vmem:[#allocation2 + $0x160] sm:$0xff] %vm27_vm2, %v8350_v13 }
 0x2e7   :  { %v2555_v59 = vadd.f32 %v10138_v31, %v2548_v9  ;;  %v3042_v24 = vpop.f32.mrf.mxu2  ;;  %73 = vst.msk [vmem:[#allocation2 + $0x168] sm:$0xff] %vm27_vm2, %v8350_v13 }
 0x2e8   :  { %v3043_v4 = vadd.f32 %v3042_v24, %v2830_v57  ;;  %v2475_v43 = vpop.f32.mrf.mxu0  ;;  %v10182_v57 = vld [vmem:[%s12321_s0 + $0x290] sm:$0xff]  ;;  %74 = vst.msk [vmem:[#allocation2 + $0x170] sm:$0xff] %vm27_vm2, %v8350_v13 }
 0x2e9   :  { %v2559_v26 = vmax.f32 %v2555_v59, 0.0  ;;  %v2529_v10 = vadd.f32 %v2475_v43, %v9695_v46  ;;  %v2836_v9 = vpop.f32.mrf.mxu1  ;;  %v3287_v32 = vpop.f32.mrf.mxu3  ;;  %v10194_v59 = vld [vmem:[%s12321_s0 + $0x2d0] sm:$0xff]  ;;  %v7921_v43 = vld [vmem:[%s12322_s1 + $0x18] sm:$0x7]  ;;  %75 = vst.msk [vmem:[#allocation2 + $0x178] sm:$0xff] %vm27_vm2, %v8350_v13 }
 0x2ea   :  { %v10186_v54 = vadd.f32 %v3287_v32, %v3043_v4  ;;  %v12412_v32 = vmax.f32 %v9762_v18, %v9765_v1  ;;  %v7855_v4 = vld [vmem:[%s12322_s1 + $0x14] sm:$0x7]  ;;  %7922 = vmatpush.msk.msra.mxu3 %vm258_vm0, %v7921_v43  ;;  %76 = vst.msk [vmem:[#allocation2 + $0x180] sm:$0xff] %vm27_vm2, %v8350_v13 }
 0x2eb   :  { %2564 = vst.msk [vmem:[#allocation2 + $0xa0] sm:$0xff] %vm27_vm2, %v2559_v26  ;;  %v2545_v46 = vmax.f32 %v2525_v40, %v2529_v10  ;;  %7730 = vmatmul.msk.f32.gmra.mxu0 %vm161_vm1, %v9989_v52  ;;  %7856 = vmatpush.msk.msra.mxu2 %vm258_vm0, %v7855_v4  ;;  %v12413_v40 = vld [vmem:[#allocation28_spill] sm:$0xff]  ;;  %v10230_v4 = vld [vmem:[%s12321_s0 + $0x2c0] sm:$0xff] }
 0x2ec   :  { %2570 = vst.msk [vmem:[#allocation2 + $0xde] sm:$0xfc] %vm2569_vm3, %v2559_v26  ;;  %7587 = vmatmul.msk.f32.gmra.mxu1 %vm161_vm1, %v10177_v51  ;;  %7619 = vmatmul.msk.f32.gmra.mxu2 %vm161_vm1, %v10182_v57  ;;  %v2526_v26 = vadd.f32 %v10048_v47, %v12413_v40 }
 0x2ed   :  { %v2549_v24 = vmax.f32 %v12412_v32, %v2545_v46  ;;  %77 = vst.msk [vmem:[#allocation2 + $0x188] sm:$0xff] %vm27_vm2, %v8350_v13 }
 0x2ee   :  { %7685 = vmatmul.msk.f32.gmra.mxu3 %vm161_vm1, %v10194_v59  ;;  %78 = vst.msk [vmem:[#allocation2 + $0x190] sm:$0xff] %vm27_vm2, %v8350_v13 }
 0x2ef   :  { %v3045_v49 = vpop.f32.mrf.mxu2  ;;  %79 = vst.msk [vmem:[#allocation2 + $0x198] sm:$0xff] %vm27_vm2, %v8350_v13 }
 0x2f0   :  { %v3046_v18 = vadd.f32 %v3045_v49, %v2833_v56  ;;  %v2478_v1 = vpop.f32.mrf.mxu0  ;;  %v10235_v56 = vld [vmem:[%s12321_s0 + $0x298] sm:$0xff]  ;;  %80 = vst.msk [vmem:[#allocation2 + $0x1a0] sm:$0xff] %vm27_vm2, %v8350_v13 }
 0x2f1   :  { %v2530_v10 = vadd.f32 %v2478_v1, %v9712_v20  ;;  %v2839_v46 = vpop.f32.mrf.mxu1  ;;  %v3290_v32 = vpop.f32.mrf.mxu3  ;;  %v7987_v20 = vld [vmem:[%s12322_s1 + $0x1c] sm:$0x7]  ;;  %v12414_v1 = vmax.f32 %v9782_v50, %v9785_v29  ;;  %81 = vst.msk [vmem:[#allocation2 + $0x1a8] sm:$0xff] %vm27_vm2, %v8350_v13  ;;  %v2527_v29 = vadd.f32 %v10081_v16, %v9661_v6  ;;  %v2556_v6 = vadd.f32 %v10138_v31, %v2549_v24 }
 0x2f2   :  { %v10239_v47 = vadd.f32 %v3290_v32, %v3046_v18  ;;  %v10251_v49 = vld [vmem:[%s12321_s0 + $0x2d8] sm:$0xff]  ;;  %v8053_v18 = vld [vmem:[%s12322_s1 + $0x20] sm:$0x7]  ;;  %7988 = vmatpush.msk.msra.mxu0 %vm258_vm0, %v7987_v20  ;;  %82 = vst.msk [vmem:[#allocation2 + $0x1b0] sm:$0xff] %vm27_vm2, %v8350_v13  ;;  %s6922_s1 = sshll.u32 %s8351_s30, 4  ;;  %s6923_s1 = int_to_ptr.vmem [resolvable:$true] %s6922_s1 }
 0x2f3   :  { %v2546_v43 = vmax.f32 %v2526_v26, %v2530_v10  ;;  %7731 = vmatmul.msk.f32.gmra.mxu0 %vm161_vm1, %v10022_v62  ;;  %8054 = vmatpush.msk.msrb.mxu1 %vm258_vm0, %v8053_v18  ;;  %v10285_v18 = vld [vmem:[%s12321_s0 + $0x2a0] sm:$0xff]  ;;  %83 = vst.msk [vmem:[#allocation2 + $0x1b8] sm:$0xff] %vm27_vm2, %v8350_v13 }
 0x2f4   :  { %7588 = vmatmul.msk.f32.gmra.mxu1 %vm161_vm1, %v10230_v4  ;;  %7620 = vmatmul.msk.f32.gmra.mxu2 %vm161_vm1, %v10235_v56  ;;  %84 = vst.msk [vmem:[#allocation2 + $0x1c0] sm:$0xff] %vm27_vm2, %v8350_v13 }
 0x2f5   :  { %v2550_v40 = vmax.f32 %v12414_v1, %v2546_v43  ;;  %85 = vst.msk [vmem:[#allocation2 + $0x1c8] sm:$0xff] %vm27_vm2, %v8350_v13  ;;  %v2560_v1 = vmax.f32 %v2556_v6, 0.0 }
 0x2f6   :  { %7686 = vmatmul.msk.f32.gmra.mxu3 %vm161_vm1, %v10251_v49  ;;  %86 = vst.msk [vmem:[#allocation2 + $0x1d0] sm:$0xff] %vm27_vm2, %v8350_v13 }
 0x2f7   :  { %v3048_v26 = vpop.f32.mrf.mxu2  ;;  %87 = vst.msk [vmem:[#allocation2 + $0x1d8] sm:$0xff] %vm27_vm2, %v8350_v13 }
 0x2f8   :  { %v3049_v10 = vadd.f32 %v3048_v26, %v2836_v9  ;;  %v2481_v50 = vpop.f32.mrf.mxu0  ;;  %88 = vst.msk [vmem:[#allocation2 + $0x1e0] sm:$0xff] %vm27_vm2, %v8350_v13  ;;  %v2557_v26 = vadd.f32 %v10138_v31, %v2550_v40 }
 0x2f9   :  { %v2531_v32 = vadd.f32 %v2481_v50, %v9729_v60  ;;  %v2842_v20 = vpop.f32.mrf.mxu1  ;;  %v3293_v43 = vpop.f32.mrf.mxu3  ;;  %v12415_v60 = vmax.f32 %v9802_v33, %v9805_v27  ;;  %89 = vst.msk [vmem:[#allocation2 + $0x1e8] sm:$0xff] %vm27_vm2, %v8350_v13 }
 0x2fa   :  { %v10289_v9 = vadd.f32 %v3293_v43, %v3049_v10  ;;  %90 = vst.msk [vmem:[#allocation2 + $0x1f0] sm:$0xff] %vm27_vm2, %v8350_v13 }
 0x2fb   :  { %v2547_v16 = vmax.f32 %v2527_v29, %v2531_v32  ;;  %7732 = vmatmul.msk.f32.gmra.mxu0 %vm161_vm1, %v10055_v61  ;;  %91 = vst.msk [vmem:[#allocation2 + $0x1f8] sm:$0xff] %vm27_vm2, %v8350_v13  ;;  %v2561_v32 = vmax.f32 %v2557_v26, 0.0 }
 0x2fc   :  { %7589 = vmatmul.msk.f32.gmra.mxu1 %vm161_vm1, %v10147_v22  ;;  %7621 = vmatmul.msk.f32.gmra.mxu2 %vm161_vm1, %v10285_v18  ;;  %2565 = vst.msk [vmem:[#allocation2 + $0xa8] sm:$0xff] %vm27_vm2, %v2560_v1 }
 0x2fd   :  { %v2551_v24 = vmax.f32 %v12415_v60, %v2547_v16  ;;  %2571 = vst.msk [vmem:[#allocation2 + $0xe6] sm:$0xfc] %vm2569_vm3, %v2560_v1 }
 0x2fe   :  { %7687 = vmatmul.msk.f32.gmra.mxu3 %vm161_vm1, %v9875_v37  ;;  %v10321_v37 = vld [vmem:[%s12321_s0 + $0x2a8] sm:$0xff]  ;;  %2575 = vst.msk [vmem:[#allocation2 + $0x1a0] sm:$0xff] %vm27_vm2, %v2560_v1 }
 0x2ff   :  { %v3051_v10 = vpop.f32.mrf.mxu2  ;;  %2579 = vst.msk [vmem:[#allocation2 + $0x1de] sm:$0xfc] %vm2569_vm3, %v2560_v1 }
 0x300   :  { %v3052_v50 = vadd.f32 %v3051_v10, %v2839_v46  ;;  %v2484_v29 = vpop.f32.mrf.mxu0  ;;  %v2558_v46 = vadd.f32 %v10138_v31, %v2551_v24  ;;  %2566 = vst.msk [vmem:[#allocation2 + $0xb0] sm:$0xff] %vm27_vm2, %v2561_v32 }
 0x301   :  { %v2845_v33 = vpop.f32.mrf.mxu1  ;;  %v3296_v27 = vpop.f32.mrf.mxu3  ;;  %2572 = vst.msk [vmem:[#allocation2 + $0xee] sm:$0xfc] %vm2569_vm3, %v2561_v32 }
 0x302   :  { %v10325_v40 = vadd.f32 %v3296_v27, %v3052_v50  ;;  %v2562_v13 = vmax.f32 %v2558_v46, 0.0  ;;  %2576 = vst.msk [vmem:[#allocation2 + $0x1a8] sm:$0xff] %vm27_vm2, %v2561_v32 }
 0x303   :  { %7733 = vmatmul.msk.f32.gmra.mxu0 %vm161_vm1, %v10088_v17  ;;  %2580 = vst.msk [vmem:[#allocation2 + $0x1e6] sm:$0xfc] %vm2569_vm3, %v2561_v32 }
 0x304   :  { %7590 = vmatmul.msk.f32.gmra.mxu1 %vm161_vm1, %v10194_v59  ;;  %7622 = vmatmul.msk.f32.gmra.mxu2 %vm161_vm1, %v10321_v37  ;;  %2567 = vst.msk [vmem:[#allocation2 + $0xb8] sm:$0xff] %vm27_vm2, %v2562_v13 }
 0x305   :  { %2573 = vst.msk [vmem:[#allocation2 + $0xf6] sm:$0xfc] %vm2569_vm3, %v2562_v13 }
 0x306   :  { %7688 = vmatmul.msk.f32.gmra.mxu3 %vm161_vm1, %v9903_v25  ;;  %2577 = vst.msk [vmem:[#allocation2 + $0x1b0] sm:$0xff] %vm27_vm2, %v2562_v13 }
 0x307   :  { %v3054_v43 = vpop.f32.mrf.mxu2  ;;  %2581 = vst.msk [vmem:[#allocation2 + $0x1ee] sm:$0xfc] %vm2569_vm3, %v2562_v13 }
 0x308   :  { %v3055_v6 = vadd.f32 %v3054_v43, %v2842_v20  ;;  %v2487_v16 = vpop.f32.mrf.mxu0 }
 0x309   :  { %v2848_v60 = vpop.f32.mrf.mxu1  ;;  %v3299_v24 = vpop.f32.mrf.mxu3 }
 0x30a   :  { %v10344_v26 = vadd.f32 %v3299_v24, %v3055_v6  ;;  %v10377_v6 = vld [vmem:[%s12321_s0 + $0x300] sm:$0xff]  ;;  %v2532_v24 = vadd.f32 %v2484_v29, %v9747_v7  ;;  %v12417_v7 = vmax.f32 %v9878_v30, %v9881_v41  ;;  %v10416_v41 = vld [vmem:[%s12321_s0 + $0x310] sm:$0xff] }
 0x30b   :  { %7734 = vmatmul.msk.f32.gmra.mxu0 %vm161_vm1, %v10129_v42 }
 0x30c   :  { %7591 = vmatmul.msk.f32.gmra.mxu1 %vm161_vm1, %v10251_v49  ;;  %7623 = vmatmul.msk.f32.gmra.mxu2 %vm161_vm1, %v10124_v58 }
 0x30e   :  { %7689 = vmatmul.msk.f32.gmra.mxu3 %vm161_vm1, %v9931_v34 }
 0x30f   :  { %v3057_v25 = vpop.f32.mrf.mxu2 }
 0x310   :  { %v3058_v20 = vadd.f32 %v3057_v25, %v2845_v33  ;;  %v2490_v1 = vpop.f32.mrf.mxu0 }
 0x311   :  { %v2851_v10 = vpop.f32.mrf.mxu1  ;;  %v3302_v50 = vpop.f32.mrf.mxu3 }
 0x312   :  { %v10358_v27 = vadd.f32 %v3302_v50, %v3058_v20 }
 0x313   :  { %7735 = vmatmul.msk.f32.gmra.mxu0 %vm161_vm1, %v10182_v57 }
 0x314   :  { %7624 = vmatmul.msk.f32.gmra.mxu2 %vm161_vm1, %v10177_v51  ;;  %7791 = vmatmul.msk.f32.vlgmr.msra.gmra.mxu1 %vm161_vm1, %v9970_v53 }
 0x316   :  { %7690 = vmatmul.msk.f32.gmra.mxu3 %vm161_vm1, %v9959_v0 }
 0x317   :  { %v3060_v34 = vpop.f32.mrf.mxu2 }
 0x318   :  { %v3061_v32 = vadd.f32 %v3060_v34, %v2848_v60  ;;  %v10368_v33 = vpop.f32.mrf.mxu0 }
 0x319   :  { %v2854_v46 = vpop.f32.mrf.mxu1  ;;  %v3305_v13 = vpop.f32.mrf.mxu3 }
 0x31a   :  { %v10370_v43 = vadd.f32 %v3305_v13, %v3061_v32 }
 0x31b   :  { %7736 = vmatmul.msk.f32.gmra.mxu0 %vm161_vm1, %v10235_v56 }
 0x31c   :  { %7792 = vmatmul.msk.f32.gmra.mxu1 %vm161_vm1, %v9989_v52  ;;  %7857 = vmatmul.msk.f32.vlgmr.msra.gmra.mxu2 %vm161_vm1, %v10088_v17  ;;  %v10394_v52 = vld [vmem:[%s12321_s0 + $0x308] sm:$0xff] }
 0x31e   :  { %7923 = vmatmul.msk.f32.vlgmr.msra.gmra.mxu3 %vm161_vm1, %v10377_v6 }
 0x31f   :  { %v3063_v53 = vpop.f32.mrf.mxu2 }
 0x320   :  { %v3064_v0 = vadd.f32 %v3063_v53, %v2851_v10  ;;  %v2496_v60 = vpop.f32.mrf.mxu0 }
 0x321   :  { %v2536_v25 = vadd.f32 %v2496_v60, %v9821_v23  ;;  %v2857_v20 = vpop.f32.mrf.mxu1  ;;  %v3308_v50 = vpop.f32.mrf.mxu3 }
 0x322   :  { %v10387_v34 = vadd.f32 %v3308_v50, %v3064_v0  ;;  %v2533_v0 = vadd.f32 %v2487_v16, %v9767_v14  ;;  %v12419_v14 = vmax.f32 %v9906_v28, %v9909_v19  ;;  %v10439_v19 = vld [vmem:[%s12321_s0 + $0x318] sm:$0xff] }
 0x323   :  { %v2586_v32 = vmax.f32 %v2532_v24, %v2536_v25  ;;  %7737 = vmatmul.msk.f32.gmra.mxu0 %vm161_vm1, %v10285_v18 }
 0x324   :  { %12416 = vst [vmem:[#allocation11_spill] sm:$0xff] %v10387_v34  ;;  %7793 = vmatmul.msk.f32.gmra.mxu1 %vm161_vm1, %v10022_v62  ;;  %7858 = vmatmul.msk.f32.gmra.mxu2 %vm161_vm1, %v10129_v42 }
 0x325   :  { %v2590_v23 = vmax.f32 %v12417_v7, %v2586_v32 }
 0x326   :  { %7924 = vmatmul.msk.f32.gmra.mxu3 %vm161_vm1, %v10394_v52 }
 0x327   :  { %v2594_v29 = vadd.f32 %v10138_v31, %v2590_v23  ;;  %v3066_v10 = vpop.f32.mrf.mxu2  ;;  %v2534_v23 = vadd.f32 %v2490_v1, %v9787_v38  ;;  %v12421_v38 = vmax.f32 %v9934_v36, %v9937_v48 }
 0x328   :  { %v3067_v13 = vadd.f32 %v3066_v10, %v2854_v46  ;;  %v2499_v53 = vpop.f32.mrf.mxu0 }
 0x329   :  { %v2598_v60 = vmax.f32 %v2594_v29, 0.0  ;;  %v2537_v62 = vadd.f32 %v2499_v53, %v9833_v12  ;;  %v2860_v24 = vpop.f32.mrf.mxu1  ;;  %v3311_v25 = vpop.f32.mrf.mxu3 }
 0x32a   :  { %v10408_v50 = vadd.f32 %v3311_v25, %v3067_v13 }
 0x32b   :  { %2603 = vst.msk [vmem:[#allocation2 + $0xc0] sm:$0xff] %vm27_vm2, %v2598_v60  ;;  %v2587_v30 = vmax.f32 %v2533_v0, %v2537_v62  ;;  %7738 = vmatmul.msk.f32.gmra.mxu0 %vm161_vm1, %v10321_v37 }
 0x32c   :  { %12418 = vst [vmem:[#allocation7_spill] sm:$0xff] %v10408_v50  ;;  %7794 = vmatmul.msk.f32.gmra.mxu1 %vm161_vm1, %v10055_v61  ;;  %7859 = vmatmul.msk.f32.gmra.mxu2 %vm161_vm1, %v10182_v57 }
 0x32d   :  { %2609 = vst.msk [vmem:[#allocation2 + $0x82] sm:$0x3f] %vm2608_vm4, %v2598_v60  ;;  %v2591_v12 = vmax.f32 %v12419_v14, %v2587_v30 }
 0x32e   :  { %7925 = vmatmul.msk.f32.gmra.mxu3 %vm161_vm1, %v10416_v41 }
 0x32f   :  { %v2595_v16 = vadd.f32 %v10138_v31, %v2591_v12  ;;  %v3069_v46 = vpop.f32.mrf.mxu2 }
 0x330   :  { %v3070_v32 = vadd.f32 %v3069_v46, %v2857_v20  ;;  %v2502_v7 = vpop.f32.mrf.mxu0 }
 0x331   :  { %v2599_v29 = vmax.f32 %v2595_v16, 0.0  ;;  %v2538_v61 = vadd.f32 %v2502_v7, %v9845_v2  ;;  %v2863_v10 = vpop.f32.mrf.mxu1  ;;  %v3314_v13 = vpop.f32.mrf.mxu3 }
 0x332   :  { %v10431_v53 = vadd.f32 %v3314_v13, %v3070_v32 }
 0x333   :  { %2604 = vst.msk [vmem:[#allocation2 + $0xc8] sm:$0xff] %vm27_vm2, %v2599_v29  ;;  %v2588_v28 = vmax.f32 %v2534_v23, %v2538_v61  ;;  %7739 = vmatmul.msk.f32.gmra.mxu0 %vm161_vm1, %v10124_v58 }
 0x334   :  { %12420 = vst [vmem:[#allocation22_spill] sm:$0xff] %v10431_v53  ;;  %7795 = vmatmul.msk.f32.gmra.mxu1 %vm161_vm1, %v10088_v17  ;;  %7860 = vmatmul.msk.f32.gmra.mxu2 %vm161_vm1, %v10235_v56  ;;  %v2535_v17 = vadd.f32 %v10368_v33, %v9807_v5  ;;  %v12423_v5 = vmax.f32 %v9962_v39, %v9965_v44  ;;  %v10490_v39 = vld [vmem:[%s12321_s0 + $0x328] sm:$0xff] }
 0x335   :  { %2610 = vst.msk [vmem:[#allocation2 + $0x8a] sm:$0x3f] %vm2608_vm4, %v2599_v29  ;;  %v2592_v2 = vmax.f32 %v12421_v38, %v2588_v28 }
 0x336   :  { %2614 = vst.msk [vmem:[#allocation2 + $0x1c0] sm:$0xff] %vm27_vm2, %v2599_v29  ;;  %7926 = vmatmul.msk.f32.gmra.mxu3 %vm161_vm1, %v10439_v19 }
 0x337   :  { %2618 = vst.msk [vmem:[#allocation2 + $0x182] sm:$0x3f] %vm2608_vm4, %v2599_v29  ;;  %v2596_v1 = vadd.f32 %v10138_v31, %v2592_v2  ;;  %v3072_v20 = vpop.f32.mrf.mxu2 }
 0x338   :  { %v3073_v0 = vadd.f32 %v3072_v20, %v2860_v24  ;;  %v2505_v60 = vpop.f32.mrf.mxu0  ;;  %v10465_v24 = vld [vmem:[%s12321_s0 + $0x320] sm:$0xff] }
 0x339   :  { %v2600_v62 = vmax.f32 %v2596_v1, 0.0  ;;  %v2539_v25 = vadd.f32 %v2505_v60, %v9862_v55  ;;  %v2866_v30 = vpop.f32.mrf.mxu1  ;;  %v3317_v14 = vpop.f32.mrf.mxu3 }
 0x33a   :  { %v10457_v36 = vadd.f32 %v3317_v14, %v3073_v0 }
 0x33b   :  { %2605 = vst.msk [vmem:[#allocation2 + $0xd0] sm:$0xff] %vm27_vm2, %v2600_v62  ;;  %v2589_v48 = vmax.f32 %v2535_v17, %v2539_v25  ;;  %7740 = vmatmul.msk.f32.gmra.mxu0 %vm161_vm1, %v10177_v51 }
 0x33c   :  { %12422 = vst [vmem:[#allocation12_spill] sm:$0xff] %v10457_v36  ;;  %7796 = vmatmul.msk.f32.gmra.mxu1 %vm161_vm1, %v10129_v42  ;;  %7861 = vmatmul.msk.f32.gmra.mxu2 %vm161_vm1, %v10285_v18  ;;  %v10925_v36 = vld [vmem:[%s12321_s0 + $0x420] sm:$0xff] }
 0x33d   :  { %2611 = vst.msk [vmem:[#allocation2 + $0x92] sm:$0x3f] %vm2608_vm4, %v2600_v62  ;;  %v2593_v55 = vmax.f32 %v12423_v5, %v2589_v48 }
 0x33e   :  { %2615 = vst.msk [vmem:[#allocation2 + $0x1c8] sm:$0xff] %vm27_vm2, %v2600_v62  ;;  %7927 = vmatmul.msk.f32.gmra.mxu3 %vm161_vm1, %v10465_v24 }
 0x33f   :  { %2619 = vst.msk [vmem:[#allocation2 + $0x18a] sm:$0x3f] %vm2608_vm4, %v2600_v62  ;;  %v2597_v33 = vadd.f32 %v10138_v31, %v2593_v55  ;;  %v3075_v12 = vpop.f32.mrf.mxu2 }
 0x340   :  { %v3076_v16 = vadd.f32 %v3075_v12, %v2863_v10  ;;  %v10480_v46 = vpop.f32.mrf.mxu0 }
 0x341   :  { %v2601_v42 = vmax.f32 %v2597_v33, 0.0  ;;  %v2869_v32 = vpop.f32.mrf.mxu1  ;;  %v3320_v7 = vpop.f32.mrf.mxu3 }
 0x342   :  { %v10482_v23 = vadd.f32 %v3320_v7, %v3076_v16 }
 0x343   :  { %2606 = vst.msk [vmem:[#allocation2 + $0xd8] sm:$0xff] %vm27_vm2, %v2601_v42  ;;  %7741 = vmatmul.msk.f32.gmra.mxu0 %vm161_vm1, %v10377_v6 }
 0x344   :  { %12424 = vst [vmem:[#allocation23_spill] sm:$0xff] %v10482_v23  ;;  %7797 = vmatmul.msk.f32.gmra.mxu1 %vm161_vm1, %v10182_v57  ;;  %7862 = vmatmul.msk.f32.gmra.mxu2 %vm161_vm1, %v10321_v37  ;;  %v10510_v57 = vld [vmem:[%s12321_s0 + $0x330] sm:$0xff] }
 0x345   :  { %2612 = vst.msk [vmem:[#allocation2 + $0x9a] sm:$0x3f] %vm2608_vm4, %v2601_v42 }
 0x346   :  { %2616 = vst.msk [vmem:[#allocation2 + $0x1d0] sm:$0xff] %vm27_vm2, %v2601_v42  ;;  %7928 = vmatmul.msk.f32.gmra.mxu3 %vm161_vm1, %v10490_v39 }
 0x347   :  { %2620 = vst.msk [vmem:[#allocation2 + $0x192] sm:$0x3f] %vm2608_vm4, %v2601_v42  ;;  %v3078_v44 = vpop.f32.mrf.mxu2 }
 0x348   :  { %v3079_v31 = vadd.f32 %v3078_v44, %v2866_v30  ;;  %v10501_v6 = vpop.f32.mrf.mxu0 }
 0x349   :  { %v2872_v29 = vpop.f32.mrf.mxu1  ;;  %v3323_v61 = vpop.f32.mrf.mxu3 }
 0x34a   :  { %v10503_v10 = vadd.f32 %v3323_v61, %v3079_v31 }
 0x34b   :  { %7742 = vmatmul.msk.f32.gmra.mxu0 %vm161_vm1, %v10394_v52 }
 0x34c   :  { %12425 = vst [vmem:[#allocation13_spill] sm:$0xff] %v10503_v10  ;;  %7798 = vmatmul.msk.f32.gmra.mxu1 %vm161_vm1, %v10235_v56  ;;  %7863 = vmatmul.msk.f32.gmra.mxu2 %vm161_vm1, %v10124_v58  ;;  %v10527_v56 = vld [vmem:[%s12321_s0 + $0x338] sm:$0xff]  ;;  %v10969_v10 = vld [vmem:[%s12321_s0 + $0x430] sm:$0xff] }
 0x34e   :  { %7929 = vmatmul.msk.f32.gmra.mxu3 %vm161_vm1, %v10510_v57 }
 0x34f   :  { %v3081_v13 = vpop.f32.mrf.mxu2 }
 0x350   :  { %v3082_v28 = vadd.f32 %v3081_v13, %v2869_v32  ;;  %v10518_v38 = vpop.f32.mrf.mxu0 }
 0x351   :  { %v2875_v2 = vpop.f32.mrf.mxu1  ;;  %v3326_v52 = vpop.f32.mrf.mxu3 }
 0x352   :  { %v10520_v1 = vadd.f32 %v3326_v52, %v3082_v28 }
 0x353   :  { %7743 = vmatmul.msk.f32.gmra.mxu0 %vm161_vm1, %v10416_v41 }
 0x354   :  { %12426 = vst [vmem:[#allocation14_spill] sm:$0xff] %v10520_v1  ;;  %7799 = vmatmul.msk.f32.gmra.mxu1 %vm161_vm1, %v10285_v18  ;;  %7864 = vmatmul.msk.f32.gmra.mxu2 %vm161_vm1, %v10177_v51  ;;  %v10544_v18 = vld [vmem:[%s12321_s0 + $0x340] sm:$0xff]  ;;  %v10940_v1 = vld [vmem:[%s12321_s0 + $0x3a8] sm:$0xff] }
 0x356   :  { %7930 = vmatmul.msk.f32.gmra.mxu3 %vm161_vm1, %v10527_v56 }
 0x357   :  { %v3084_v20 = vpop.f32.mrf.mxu2 }
 0x358   :  { %v3085_v0 = vadd.f32 %v3084_v20, %v2872_v29  ;;  %v10535_v60 = vpop.f32.mrf.mxu0 }
 0x359   :  { %v2878_v17 = vpop.f32.mrf.mxu1  ;;  %v3329_v41 = vpop.f32.mrf.mxu3 }
 0x35a   :  { %v10537_v62 = vadd.f32 %v3329_v41, %v3085_v0 }
 0x35b   :  { %7744 = vmatmul.msk.f32.gmra.mxu0 %vm161_vm1, %v10439_v19 }
 0x35c   :  { %12427 = vst [vmem:[#allocation24_spill] sm:$0xff] %v10537_v62  ;;  %7800 = vmatmul.msk.f32.gmra.mxu1 %vm161_vm1, %v10321_v37  ;;  %7865 = vmatmul.msk.f32.gmra.mxu2 %vm161_vm1, %v10230_v4  ;;  %v10561_v37 = vld [vmem:[%s12321_s0 + $0x348] sm:$0xff] }
 0x35e   :  { %7931 = vmatmul.msk.f32.gmra.mxu3 %vm161_vm1, %v10544_v18 }
 0x35f   :  { %v3087_v25 = vpop.f32.mrf.mxu2 }
 0x360   :  { %v3088_v30 = vadd.f32 %v3087_v25, %v2875_v2  ;;  %v10552_v14 = vpop.f32.mrf.mxu0 }
 0x361   :  { %v2881_v48 = vpop.f32.mrf.mxu1  ;;  %v3332_v19 = vpop.f32.mrf.mxu3 }
 0x362   :  { %v10554_v5 = vadd.f32 %v3332_v19, %v3088_v30 }
 0x363   :  { %7745 = vmatmul.msk.f32.gmra.mxu0 %vm161_vm1, %v10465_v24 }
 0x364   :  { %12428 = vst [vmem:[#allocation15_spill] sm:$0xff] %v10554_v5  ;;  %7801 = vmatmul.msk.f32.gmra.mxu1 %vm161_vm1, %v10124_v58  ;;  %7866 = vmatmul.msk.f32.gmra.mxu2 %vm161_vm1, %v10147_v22  ;;  %v10578_v58 = vld [vmem:[%s12321_s0 + $0x350] sm:$0xff] }
 0x366   :  { %7932 = vmatmul.msk.f32.gmra.mxu3 %vm161_vm1, %v10561_v37 }
 0x367   :  { %v3090_v55 = vpop.f32.mrf.mxu2 }
 0x368   :  { %v3091_v33 = vadd.f32 %v3090_v55, %v2878_v17  ;;  %v10569_v12 = vpop.f32.mrf.mxu0  ;;  %v7835_v17 = vld [vmem:[%s12321_s0 + $0x2e0] sm:$0xff] }
 0x369   :  { %v2884_v16 = vpop.f32.mrf.mxu1  ;;  %v3335_v42 = vpop.f32.mrf.mxu3 }
 0x36a   :  { %v10571_v32 = vadd.f32 %v3335_v42, %v3091_v33  ;;  %v7836_v33 = vld [vmem:[%s12321_s0 + $0x2e8] sm:$0xff] }
 0x36b   :  { %7746 = vmatmul.msk.f32.gmra.mxu0 %vm161_vm1, %v10490_v39 }
 0x36c   :  { %12429 = vst [vmem:[#allocation18_spill] sm:$0xff] %v10571_v32  ;;  %7802 = vmatmul.msk.f32.gmra.mxu1 %vm161_vm1, %v10177_v51  ;;  %7867 = vmatmul.msk.f32.gmra.mxu2 %vm161_vm1, %v10194_v59  ;;  %v10595_v51 = vld [vmem:[%s12321_s0 + $0x358] sm:$0xff] }
 0x36d   :  { %v10896_v32 = vld [vmem:[%s12321_s0 + $0x398] sm:$0xff] }
 0x36e   :  { %7933 = vmatmul.msk.f32.gmra.mxu3 %vm161_vm1, %v10578_v58 }
 0x36f   :  { %v3093_v7 = vpop.f32.mrf.mxu2 }
 0x370   :  { %v3094_v44 = vadd.f32 %v3093_v7, %v2881_v48  ;;  %v10586_v31 = vpop.f32.mrf.mxu0 }
 0x371   :  { %v2887_v29 = vpop.f32.mrf.mxu1  ;;  %v3338_v61 = vpop.f32.mrf.mxu3 }
 0x372   :  { %v10588_v13 = vadd.f32 %v3338_v61, %v3094_v44 }
 0x373   :  { %7747 = vmatmul.msk.f32.gmra.mxu0 %vm161_vm1, %v10510_v57 }
 0x374   :  { %12430 = vst [vmem:[#allocation8_spill] sm:$0xff] %v10588_v13  ;;  %7803 = vmatmul.msk.f32.gmra.mxu1 %vm161_vm1, %v10230_v4  ;;  %7868 = vmatmul.msk.f32.gmra.mxu2 %vm161_vm1, %v10251_v49  ;;  %v10615_v4 = vld [vmem:[%s12321_s0 + $0x360] sm:$0xff] }
 0x376   :  { %7934 = vmatmul.msk.f32.gmra.mxu3 %vm161_vm1, %v10595_v51 }
 0x377   :  { %v3096_v28 = vpop.f32.mrf.mxu2 }
 0x378   :  { %v3097_v2 = vadd.f32 %v3096_v28, %v2884_v16  ;;  %v10603_v52 = vpop.f32.mrf.mxu0  ;;  %v7837_v28 = vld [vmem:[%s12321_s0 + $0x2f0] sm:$0xff] }
 0x379   :  { %v2890_v20 = vpop.f32.mrf.mxu1  ;;  %v3341_v0 = vpop.f32.mrf.mxu3 }
 0x37a   :  { %v10608_v41 = vadd.f32 %v3341_v0, %v3097_v2 }
 0x37b   :  { %7748 = vmatmul.msk.f32.gmra.mxu0 %vm161_vm1, %v10527_v56 }
 0x37c   :  { %12431 = vst [vmem:[#allocation16_spill] sm:$0xff] %v10608_v41  ;;  %7804 = vmatmul.msk.f32.gmra.mxu1 %vm161_vm1, %v10147_v22  ;;  %7869 = vmatmul.msk.f32.gmra.mxu2 %vm161_vm1, %v7835_v17  ;;  %v10634_v22 = vld [vmem:[%s12321_s0 + $0x368] sm:$0xff] }
 0x37e   :  { %7935 = vmatmul.msk.f32.gmra.mxu3 %vm161_vm1, %v10615_v4 }
 0x37f   :  { %v3099_v25 = vpop.f32.mrf.mxu2 }
 0x380   :  { %v3100_v30 = vadd.f32 %v3099_v25, %v2887_v29  ;;  %v10622_v48 = vpop.f32.mrf.mxu0 }
 0x381   :  { %v2893_v19 = vpop.f32.mrf.mxu1  ;;  %v3344_v55 = vpop.f32.mrf.mxu3 }
 0x382   :  { %v10627_v16 = vadd.f32 %v3344_v55, %v3100_v30  ;;  %v7838_v55 = vld [vmem:[%s12321_s0 + $0x2f8] sm:$0xff] }
 0x383   :  { %7749 = vmatmul.msk.f32.gmra.mxu0 %vm161_vm1, %v10544_v18 }
 0x384   :  { %12432 = vst [vmem:[#allocation19_spill] sm:$0xff] %v10627_v16  ;;  %7805 = vmatmul.msk.f32.gmra.mxu1 %vm161_vm1, %v10194_v59  ;;  %7870 = vmatmul.msk.f32.gmra.mxu2 %vm161_vm1, %v7836_v33  ;;  %v10653_v59 = vld [vmem:[%s12321_s0 + $0x370] sm:$0xff]  ;;  %v10903_v16 = vld [vmem:[%s12321_s0 + $0x418] sm:$0xff] }
 0x386   :  { %7936 = vmatmul.msk.f32.gmra.mxu3 %vm161_vm1, %v10634_v22 }
 0x387   :  { %v3102_v42 = vpop.f32.mrf.mxu2 }
 0x388   :  { %v3103_v7 = vadd.f32 %v3102_v42, %v2890_v20  ;;  %v10641_v44 = vpop.f32.mrf.mxu0 }
 0x389   :  { %v2896_v29 = vpop.f32.mrf.mxu1  ;;  %v3347_v61 = vpop.f32.mrf.mxu3 }
 0x38a   :  { %v10646_v2 = vadd.f32 %v3347_v61, %v3103_v7 }
 0x38b   :  { %7750 = vmatmul.msk.f32.gmra.mxu0 %vm161_vm1, %v10561_v37 }
 0x38c   :  { %12433 = vst [vmem:[#allocation9_spill] sm:$0xff] %v10646_v2  ;;  %7806 = vmatmul.msk.f32.gmra.mxu1 %vm161_vm1, %v10251_v49  ;;  %7871 = vmatmul.msk.f32.gmra.mxu2 %vm161_vm1, %v7837_v28  ;;  %v10672_v49 = vld [vmem:[%s12321_s0 + $0x378] sm:$0xff] }
 0x38e   :  { %7937 = vmatmul.msk.f32.gmra.mxu3 %vm161_vm1, %v10653_v59 }
 0x38f   :  { %v3105_v20 = vpop.f32.mrf.mxu2 }
 0x390   :  { %v3106_v0 = vadd.f32 %v3105_v20, %v2893_v19  ;;  %v10660_v17 = vpop.f32.mrf.mxu0 }
 0x391   :  { %v3350_v25 = vpop.f32.mrf.mxu3  ;;  %v3816_v30 = vpop.f32.mrf.mxu1 }
 0x392   :  { %v10665_v33 = vadd.f32 %v3350_v25, %v3106_v0  ;;  %v7905_v0 = vld [vmem:[%s12321_s0 + $0x3c0] sm:$0xff]  ;;  %v3634_v25 = vadd.f32 %v10480_v46, %v9888_v11  ;;  %v7906_v11 = vld [vmem:[%s12321_s0 + $0x3c8] sm:$0xff]  ;;  %v3635_v46 = vadd.f32 %v10501_v6, %v9916_v45  ;;  %v7907_v45 = vld [vmem:[%s12321_s0 + $0x3d0] sm:$0xff]  ;;  %v3636_v6 = vadd.f32 %v10518_v38, %v9944_v8 }
 0x393   :  { %7751 = vmatmul.msk.f32.gmra.mxu0 %vm161_vm1, %v10578_v58  ;;  %v7908_v8 = vld [vmem:[%s12321_s0 + $0x3d8] sm:$0xff]  ;;  %v3637_v38 = vadd.f32 %v10535_v60, %v9972_v15  ;;  %v10752_v15 = vld [vmem:[%s12321_s0 + $0x3e0] sm:$0xff]  ;;  %v3638_v60 = vadd.f32 %v10552_v14, %v9993_v63  ;;  %v10771_v63 = vld [vmem:[%s12321_s0 + $0x3e8] sm:$0xff]  ;;  %v3639_v14 = vadd.f32 %v10569_v12, %v10026_v35  ;;  %v3640_v12 = vadd.f32 %v10586_v31, %v10059_v21 }
 0x394   :  { %12434 = vst [vmem:[#allocation17_spill] sm:$0xff] %v10665_v33  ;;  %7807 = vmatmul.msk.f32.gmra.mxu1 %vm161_vm1, %v10465_v24  ;;  %7872 = vmatmul.msk.f32.gmra.mxu2 %vm161_vm1, %v7838_v55  ;;  %v10790_v35 = vld [vmem:[%s12321_s0 + $0x3f0] sm:$0xff]  ;;  %v10811_v21 = vld [vmem:[%s12321_s0 + $0x3f8] sm:$0xff]  ;;  %v3641_v31 = vadd.f32 %v10603_v52, %v10092_v3  ;;  %v10828_v3 = vld [vmem:[%s12321_s0 + $0x380] sm:$0xff] }
 0x395   :  { %v10881_v33 = vld [vmem:[%s12321_s0 + $0x410] sm:$0xff] }
 0x396   :  { %7938 = vmatmul.msk.f32.gmra.mxu3 %vm161_vm1, %v10672_v49 }
 0x397   :  { %v3108_v19 = vpop.f32.mrf.mxu2 }
 0x398   :  { %v3109_v42 = vadd.f32 %v3108_v19, %v2896_v29  ;;  %v10679_v7 = vpop.f32.mrf.mxu0  ;;  %v3912_v29 = vadd.f32 %v3816_v30, %v3634_v25 }
 0x399   :  { %v3353_v61 = vpop.f32.mrf.mxu3  ;;  %v3819_v28 = vpop.f32.mrf.mxu1 }
 0x39a   :  { %v10681_v20 = vadd.f32 %v3353_v61, %v3109_v42  ;;  %v3913_v30 = vadd.f32 %v3819_v28, %v3635_v46 }
 0x39b   :  { %7752 = vmatmul.msk.f32.gmra.mxu0 %vm161_vm1, %v10595_v51 }
 0x39c   :  { %12435 = vst [vmem:[#allocation6_spill] sm:$0xff] %v10681_v20  ;;  %7808 = vmatmul.msk.f32.gmra.mxu1 %vm161_vm1, %v10490_v39  ;;  %7873 = vmatmul.msk.f32.gmra.mxu2 %vm161_vm1, %v10544_v18 }
 0x39e   :  { %7939 = vmatmul.msk.f32.gmra.mxu3 %vm161_vm1, %v7905_v0 }
 0x39f   :  { %v4094_v55 = vpop.f32.mrf.mxu2 }
 0x3a0   :  { %v4190_v19 = vadd.f32 %v4094_v55, %v3912_v29  ;;  %v10695_v42 = vpop.f32.mrf.mxu0 }
 0x3a1   :  { %v3822_v61 = vpop.f32.mrf.mxu1  ;;  %v4372_v20 = vpop.f32.mrf.mxu3 }
 0x3a2   :  { %v10697_v41 = vadd.f32 %v4372_v20, %v4190_v19  ;;  %v3914_v28 = vadd.f32 %v3822_v61, %v3636_v6 }
 0x3a3   :  { %7753 = vmatmul.msk.f32.gmra.mxu0 %vm161_vm1, %v10615_v4 }
 0x3a4   :  { %7809 = vmatmul.msk.f32.gmra.mxu1 %vm161_vm1, %v10510_v57  ;;  %7874 = vmatmul.msk.f32.gmra.mxu2 %vm161_vm1, %v10561_v37 }
 0x3a6   :  { %7940 = vmatmul.msk.f32.gmra.mxu3 %vm161_vm1, %v7906_v11 }
 0x3a7   :  { %v4097_v20 = vpop.f32.mrf.mxu2 }
 0x3a8   :  { %v4191_v0 = vadd.f32 %v4097_v20, %v3913_v30  ;;  %v10711_v25 = vpop.f32.mrf.mxu0 }
 0x3a9   :  { %v3825_v29 = vpop.f32.mrf.mxu1  ;;  %v4375_v55 = vpop.f32.mrf.mxu3 }
 0x3aa   :  { %v10713_v19 = vadd.f32 %v4375_v55, %v4191_v0  ;;  %v3915_v61 = vadd.f32 %v3825_v29, %v3637_v38 }
 0x3ab   :  { %7754 = vmatmul.msk.f32.gmra.mxu0 %vm161_vm1, %v10634_v22 }
 0x3ac   :  { %7810 = vmatmul.msk.f32.gmra.mxu1 %vm161_vm1, %v10527_v56  ;;  %7875 = vmatmul.msk.f32.gmra.mxu2 %vm161_vm1, %v10578_v58 }
 0x3ae   :  { %7941 = vmatmul.msk.f32.gmra.mxu3 %vm161_vm1, %v7907_v45 }
 0x3af   :  { %v4100_v11 = vpop.f32.mrf.mxu2 }
 0x3b0   :  { %v4192_v46 = vadd.f32 %v4100_v11, %v3914_v28  ;;  %v10727_v30 = vpop.f32.mrf.mxu0 }
 0x3b1   :  { %v3828_v20 = vpop.f32.mrf.mxu1  ;;  %v4378_v0 = vpop.f32.mrf.mxu3 }
 0x3b2   :  { %v10729_v55 = vadd.f32 %v4378_v0, %v4192_v46  ;;  %v3916_v29 = vadd.f32 %v3828_v20, %v3638_v60 }
 0x3b3   :  { %7755 = vmatmul.msk.f32.gmra.mxu0 %vm161_vm1, %v10653_v59 }
 0x3b4   :  { %7811 = vmatmul.msk.f32.gmra.mxu1 %vm161_vm1, %v10544_v18  ;;  %7876 = vmatmul.msk.f32.gmra.mxu2 %vm161_vm1, %v10595_v51 }
 0x3b6   :  { %7942 = vmatmul.msk.f32.gmra.mxu3 %vm161_vm1, %v7908_v8 }
 0x3b7   :  { %v4103_v45 = vpop.f32.mrf.mxu2 }
 0x3b8   :  { %v4193_v6 = vadd.f32 %v4103_v45, %v3915_v61  ;;  %v10743_v28 = vpop.f32.mrf.mxu0 }
 0x3b9   :  { %v3831_v11 = vpop.f32.mrf.mxu1  ;;  %v4381_v46 = vpop.f32.mrf.mxu3 }
 0x3ba   :  { %v10745_v0 = vadd.f32 %v4381_v46, %v4193_v6  ;;  %v3917_v20 = vadd.f32 %v3831_v11, %v3639_v14 }
 0x3bb   :  { %7756 = vmatmul.msk.f32.gmra.mxu0 %vm161_vm1, %v10672_v49 }
 0x3bc   :  { %7812 = vmatmul.msk.f32.gmra.mxu1 %vm161_vm1, %v10561_v37  ;;  %7877 = vmatmul.msk.f32.gmra.mxu2 %vm161_vm1, %v10615_v4 }
 0x3be   :  { %7943 = vmatmul.msk.f32.gmra.mxu3 %vm161_vm1, %v10752_v15 }
 0x3bf   :  { %v4106_v8 = vpop.f32.mrf.mxu2 }
 0x3c0   :  { %v4194_v38 = vadd.f32 %v4106_v8, %v3916_v29  ;;  %v10762_v61 = vpop.f32.mrf.mxu0 }
 0x3c1   :  { %12436 = vst [vmem:[#allocation10_spill] sm:$0xff] %v10762_v61  ;;  %v3834_v45 = vpop.f32.mrf.mxu1  ;;  %v4384_v6 = vpop.f32.mrf.mxu3 }
 0x3c2   :  { %v10764_v46 = vadd.f32 %v4384_v6, %v4194_v38  ;;  %v3918_v11 = vadd.f32 %v3834_v45, %v3640_v12 }
 0x3c3   :  { %7989 = vmatmul.msk.f32.vlgmr.msra.gmra.mxu0 %vm161_vm1, %v10465_v24 }
 0x3c4   :  { %7813 = vmatmul.msk.f32.gmra.mxu1 %vm161_vm1, %v10578_v58  ;;  %7878 = vmatmul.msk.f32.gmra.mxu2 %vm161_vm1, %v10634_v22 }
 0x3c6   :  { %7944 = vmatmul.msk.f32.gmra.mxu3 %vm161_vm1, %v10771_v63 }
 0x3c7   :  { %v4109_v60 = vpop.f32.mrf.mxu2 }
 0x3c8   :  { %v4195_v24 = vadd.f32 %v4109_v60, %v3917_v20  ;;  %v10781_v29 = vpop.f32.mrf.mxu0 }
 0x3c9   :  { %12437 = vst [vmem:[#allocation20_spill] sm:$0xff] %v10781_v29  ;;  %v3837_v8 = vpop.f32.mrf.mxu1  ;;  %v4387_v38 = vpop.f32.mrf.mxu3  ;;  %v10982_v29 = vld [vmem:[%s12321_s0 + $0x3b8] sm:$0xff] }
 0x3ca   :  { %v10783_v6 = vadd.f32 %v4387_v38, %v4195_v24  ;;  %v3919_v45 = vadd.f32 %v3837_v8, %v3641_v31  ;;  %v10837_v8 = vld [vmem:[%s12321_s0 + $0x400] sm:$0xff] }
 0x3cb   :  { %7990 = vmatmul.msk.f32.gmra.mxu0 %vm161_vm1, %v10490_v39 }
 0x3cc   :  { %7814 = vmatmul.msk.f32.gmra.mxu1 %vm161_vm1, %v10595_v51  ;;  %7879 = vmatmul.msk.f32.gmra.mxu2 %vm161_vm1, %v10653_v59 }
 0x3ce   :  { %7945 = vmatmul.msk.f32.gmra.mxu3 %vm161_vm1, %v10790_v35 }
 0x3cf   :  { %v4112_v14 = vpop.f32.mrf.mxu2 }
 0x3d0   :  { %v4196_v39 = vadd.f32 %v4112_v14, %v3918_v11  ;;  %v10800_v20 = vpop.f32.mrf.mxu0 }
 0x3d1   :  { %12438 = vst [vmem:[#allocation25_spill] sm:$0xff] %v10800_v20  ;;  %v10802_v60 = vpop.f32.mrf.mxu1  ;;  %v4390_v24 = vpop.f32.mrf.mxu3  ;;  %v10947_v20 = vld [vmem:[%s12321_s0 + $0x428] sm:$0xff] }
 0x3d2   :  { %v10804_v38 = vadd.f32 %v4390_v24, %v4196_v39 }
 0x3d3   :  { %7991 = vmatmul.msk.f32.gmra.mxu0 %vm161_vm1, %v10510_v57 }
 0x3d4   :  { %7815 = vmatmul.msk.f32.gmra.mxu1 %vm161_vm1, %v10615_v4  ;;  %7880 = vmatmul.msk.f32.gmra.mxu2 %vm161_vm1, %v10672_v49 }
 0x3d6   :  { %7946 = vmatmul.msk.f32.gmra.mxu3 %vm161_vm1, %v10811_v21 }
 0x3d7   :  { %v4115_v12 = vpop.f32.mrf.mxu2 }
 0x3d8   :  { %v4197_v57 = vadd.f32 %v4115_v12, %v3919_v45  ;;  %v10821_v11 = vpop.f32.mrf.mxu0  ;;  %v10859_v45 = vld [vmem:[%s12321_s0 + $0x408] sm:$0xff] }
 0x3d9   :  { %12439 = vst [vmem:[#allocation26_spill] sm:$0xff] %v10821_v11  ;;  %v10823_v14 = vpop.f32.mrf.mxu1  ;;  %v4393_v39 = vpop.f32.mrf.mxu3  ;;  %v10918_v11 = vld [vmem:[%s12321_s0 + $0x3a0] sm:$0xff] }
 0x3da   :  { %v10830_v52 = vadd.f32 %v4393_v39, %v4197_v57  ;;  %v10874_v39 = vld [vmem:[%s12321_s0 + $0x390] sm:$0xff] }
 0x3db   :  { %7992 = vmatmul.msk.f32.gmra.mxu0 %vm161_vm1, %v10527_v56  ;;  %v10852_v56 = vld [vmem:[%s12321_s0 + $0x388] sm:$0xff] }
 0x3dc   :  { %7816 = vmatmul.msk.f32.gmra.mxu1 %vm161_vm1, %v10634_v22  ;;  %7881 = vmatmul.msk.f32.gmra.mxu2 %vm161_vm1, %v10828_v3 }
 0x3de   :  { %7947 = vmatmul.msk.f32.gmra.mxu3 %vm161_vm1, %v10837_v8 }
 0x3e0   :  { %v10845_v24 = vpop.f32.mrf.mxu0 }
 0x3e1   :  { %12440 = vst [vmem:[#allocation27_spill] sm:$0xff] %v10845_v24  ;;  %v10847_v31 = vpop.f32.mrf.mxu1  ;;  %v10991_v24 = vld [vmem:[%s12321_s0 + $0x438] sm:$0xff] }
 0x3e3   :  { %7993 = vmatmul.msk.f32.gmra.mxu0 %vm161_vm1, %v10544_v18 }
 0x3e4   :  { %7817 = vmatmul.msk.f32.gmra.mxu1 %vm161_vm1, %v10653_v59  ;;  %7882 = vmatmul.msk.f32.gmra.mxu2 %vm161_vm1, %v10852_v56 }
 0x3e6   :  { %7948 = vmatmul.msk.f32.gmra.mxu3 %vm161_vm1, %v10859_v45 }
 0x3e8   :  { %v10867_v12 = vpop.f32.mrf.mxu0 }
 0x3e9   :  { %12441 = vst [vmem:[#allocation28_spill] sm:$0xff] %v10867_v12  ;;  %v10869_v57 = vpop.f32.mrf.mxu1  ;;  %v10962_v12 = vld [vmem:[%s12321_s0 + $0x3b0] sm:$0xff] }
 0x3eb   :  { %7994 = vmatmul.msk.f32.gmra.mxu0 %vm161_vm1, %v10561_v37 }
 0x3ec   :  { %7818 = vmatmul.msk.f32.gmra.mxu1 %vm161_vm1, %v10672_v49  ;;  %7883 = vmatmul.msk.f32.gmra.mxu2 %vm161_vm1, %v10874_v39 }
 0x3ee   :  { %7949 = vmatmul.msk.f32.gmra.mxu3 %vm161_vm1, %v10881_v33 }
 0x3f0   :  { %v10889_v13 = vpop.f32.mrf.mxu0 }
 0x3f1   :  { %12442 = vst [vmem:[#allocation29_spill] sm:$0xff] %v10889_v13  ;;  %v10891_v2 = vpop.f32.mrf.mxu1 }
 0x3f3   :  { %7995 = vmatmul.msk.f32.gmra.mxu0 %vm161_vm1, %v10578_v58 }
 0x3f4   :  { %7819 = vmatmul.msk.f32.gmra.mxu1 %vm161_vm1, %v10828_v3  ;;  %7884 = vmatmul.msk.f32.gmra.mxu2 %vm161_vm1, %v10896_v32 }
 0x3f6   :  { %7950 = vmatmul.msk.f32.gmra.mxu3 %vm161_vm1, %v10903_v16 }
 0x3f8   :  { %v10911_v5 = vpop.f32.mrf.mxu0 }
 0x3f9   :  { %12443 = vst [vmem:[#allocation30_spill] sm:$0xff] %v10911_v5  ;;  %v10913_v62 = vpop.f32.mrf.mxu1 }
 0x3fb   :  { %7996 = vmatmul.msk.f32.gmra.mxu0 %vm161_vm1, %v10595_v51 }
 0x3fc   :  { %7820 = vmatmul.msk.f32.gmra.mxu1 %vm161_vm1, %v10852_v56  ;;  %7885 = vmatmul.msk.f32.gmra.mxu2 %vm161_vm1, %v10918_v11 }
 0x3fe   :  { %7951 = vmatmul.msk.f32.gmra.mxu3 %vm161_vm1, %v10925_v36 }
 0x400   :  { %v10933_v5 = vpop.f32.mrf.mxu0 }
 0x401   :  { %12444 = vst [vmem:[#allocation31_spill] sm:$0xff] %v10933_v5  ;;  %v10935_v13 = vpop.f32.mrf.mxu1 }
 0x403   :  { %7997 = vmatmul.msk.f32.gmra.mxu0 %vm161_vm1, %v10615_v4 }
 0x404   :  { %7821 = vmatmul.msk.f32.gmra.mxu1 %vm161_vm1, %v10874_v39  ;;  %7886 = vmatmul.msk.f32.gmra.mxu2 %vm161_vm1, %v10940_v1 }
 0x406   :  { %7952 = vmatmul.msk.f32.gmra.mxu3 %vm161_vm1, %v10947_v20 }
 0x408   :  { %v10955_v5 = vpop.f32.mrf.mxu0 }
 0x409   :  { %12445 = vst [vmem:[#allocation32_spill] sm:$0xff] %v10955_v5  ;;  %v10957_v53 = vpop.f32.mrf.mxu1 }
 0x40a   :  { %12446 = vst [vmem:[#allocation33_spill] sm:$0xff] %v10957_v53 }
 0x40b   :  { %7998 = vmatmul.msk.f32.gmra.mxu0 %vm161_vm1, %v10634_v22 }
 0x40c   :  { %7822 = vmatmul.msk.f32.gmra.mxu1 %vm161_vm1, %v10896_v32  ;;  %7887 = vmatmul.msk.f32.gmra.mxu2 %vm161_vm1, %v10962_v12 }
 0x40e   :  { %7953 = vmatmul.msk.f32.gmra.mxu3 %vm161_vm1, %v10969_v10 }
 0x410   :  { %v10984_v50 = vpop.f32.mrf.mxu0 }
 0x411   :  { %v10977_v5 = vpop.f32.mrf.mxu1  ;;  %12448 = vst [vmem:[#allocation35_spill] sm:$0xff] %v10984_v50 }
 0x412   :  { %12447 = vst [vmem:[#allocation34_spill] sm:$0xff] %v10977_v5 }
 0x413   :  { %7999 = vmatmul.msk.f32.gmra.mxu0 %vm161_vm1, %v10653_v59 }
 0x414   :  { %7888 = vmatmul.msk.f32.gmra.mxu2 %vm161_vm1, %v10982_v29  ;;  %8055 = vmatmul.msk.f32.vlgmr.msrb.gmra.mxu1 %vm161_vm1, %v10544_v18 }
 0x416   :  { %7954 = vmatmul.msk.f32.gmra.mxu3 %vm161_vm1, %v10991_v24 }
 0x418   :  { %v11005_v50 = vpop.f32.mrf.mxu0 }
 0x419   :  { %v10999_v5 = vpop.f32.mrf.mxu1  ;;  %12450 = vst [vmem:[#allocation37_spill] sm:$0xff] %v11005_v50 }
 0x41a   :  { %12449 = vst [vmem:[#allocation36_spill] sm:$0xff] %v10999_v5 }
 0x41b   :  { %8000 = vmatmul.msk.f32.gmra.mxu0 %vm161_vm1, %v10672_v49 }
 0x41c   :  { %8056 = vmatmul.msk.f32.gmra.mxu1 %vm161_vm1, %v10561_v37 }
 0x420   :  { %v11013_v18 = vpop.f32.mrf.mxu0 }
 0x421   :  { %v11007_v23 = vpop.f32.mrf.mxu1  ;;  %12452 = vst [vmem:[#allocation39_spill] sm:$0xff] %v11013_v18 }
 0x422   :  { %12451 = vst [vmem:[#allocation38_spill] sm:$0xff] %v11007_v23  ;;  %v7985_v23 = vld [vmem:[%s12321_s0 + $0x450] sm:$0xff] }
 0x423   :  { %8001 = vmatmul.msk.f32.gmra.mxu0 %vm161_vm1, %v10828_v3 }
 0x424   :  { %8057 = vmatmul.msk.f32.gmra.mxu1 %vm161_vm1, %v10578_v58 }
 0x428   :  { %v11021_v37 = vpop.f32.mrf.mxu0 }
 0x429   :  { %v11015_v61 = vpop.f32.mrf.mxu1  ;;  %12454 = vst [vmem:[#allocation41_spill] sm:$0xff] %v11021_v37 }
 0x42a   :  { %12453 = vst [vmem:[#allocation40_spill] sm:$0xff] %v11015_v61 }
 0x42b   :  { %8002 = vmatmul.msk.f32.gmra.mxu0 %vm161_vm1, %v10852_v56 }
 0x42c   :  { %8058 = vmatmul.msk.f32.gmra.mxu1 %vm161_vm1, %v10595_v51 }
 0x430   :  { %v11031_v18 = vpop.f32.mrf.mxu0 }
 0x431   :  { %v11023_v50 = vpop.f32.mrf.mxu1  ;;  %12457 = vst [vmem:[#allocation44_spill] sm:$0xff] %v11031_v18 }
 0x432   :  { %12455 = vst [vmem:[#allocation42_spill] sm:$0xff] %v11023_v50 }
 0x433   :  { %8003 = vmatmul.msk.f32.gmra.mxu0 %vm161_vm1, %v10874_v39 }
 0x434   :  { %8059 = vmatmul.msk.f32.gmra.mxu1 %vm161_vm1, %v10615_v4 }
 0x438   :  { %v11043_v37 = vpop.f32.mrf.mxu0 }
 0x439   :  { %v11029_v58 = vpop.f32.mrf.mxu1  ;;  %12459 = vst [vmem:[#allocation46_spill] sm:$0xff] %v11043_v37 }
 0x43a   :  { %12456 = vst [vmem:[#allocation43_spill] sm:$0xff] %v11029_v58 }
 0x43b   :  { %8004 = vmatmul.msk.f32.gmra.mxu0 %vm161_vm1, %v10896_v32 }
 0x43c   :  { %8060 = vmatmul.msk.f32.gmra.mxu1 %vm161_vm1, %v10634_v22 }
 0x440   :  { %v4650_v18 = vpop.f32.mrf.mxu0 }
 0x441   :  { %v11037_v51 = vpop.f32.mrf.mxu1 }
 0x442   :  { %12458 = vst [vmem:[#allocation45_spill] sm:$0xff] %v11037_v51 }
 0x443   :  { %8005 = vmatmul.msk.f32.gmra.mxu0 %vm161_vm1, %v10752_v15 }
 0x444   :  { %8061 = vmatmul.msk.f32.gmra.mxu1 %vm161_vm1, %v10653_v59 }
 0x448   :  { %v11057_v59 = vpop.f32.mrf.mxu0 }
 0x449   :  { %v11045_v4 = vpop.f32.mrf.mxu1 }
 0x44a   :  { %12460 = vst [vmem:[#allocation47_spill] sm:$0xff] %v11045_v4 }
 0x44b   :  { %8006 = vmatmul.msk.f32.gmra.mxu0 %vm161_vm1, %v10771_v63  ;;  %v8087_v63 = vld [vmem:[%s12324_s3 + $0x8] sm:$0xff] }
 0x44c   :  { %8062 = vmatmul.msk.f32.gmra.mxu1 %vm161_vm1, %v10672_v49  ;;  %5231 = vmatpush.msrb.mxu2 %v8087_v63  ;;  %v5148_v49 = vld [vmem:[%s12324_s3] sm:$0xff] }
 0x44d   :  { %5344 = vmatpush.msrb.mxu3 %v5148_v49 }
 0x451   :  { %v11051_v22 = vpop.f32.mrf.mxu1 }
 0x452   :  { %12461 = vst [vmem:[#allocation48_spill] sm:$0xff] %v11051_v22  ;;  %v11144_v22 = vld [vmem:[%s12321_s0 + $0x448] sm:$0xff] }
 0x453   :  { %8007 = vmatmul.msk.f32.gmra.mxu0 %vm161_vm1, %v10790_v35 }
 0x454   :  { %8063 = vmatmul.msk.f32.gmra.mxu1 %vm161_vm1, %v10828_v3  ;;  %v11073_v3 = vpop.f32.mrf.mxu0 }
 0x459   :  { %v11059_v15 = vpop.f32.mrf.mxu1 }
 0x45a   :  { %12462 = vst [vmem:[#allocation49_spill] sm:$0xff] %v11059_v15 }
 0x45b   :  { %8008 = vmatmul.msk.f32.gmra.mxu0 %vm161_vm1, %v10811_v21 }
 0x45c   :  { %8064 = vmatmul.msk.f32.gmra.mxu1 %vm161_vm1, %v10852_v56  ;;  %v11085_v56 = vpop.f32.mrf.mxu0 }
 0x461   :  { %v11071_v35 = vpop.f32.mrf.mxu1 }
 0x462   :  { %12463 = vst [vmem:[#allocation50_spill] sm:$0xff] %v11071_v35 }
 0x463   :  { %8009 = vmatmul.msk.f32.gmra.mxu0 %vm161_vm1, %v10837_v8 }
 0x464   :  { %8065 = vmatmul.msk.f32.gmra.mxu1 %vm161_vm1, %v10874_v39  ;;  %v4662_v49 = vpop.f32.mrf.mxu0 }
 0x465   :  { %v4750_v51 = vadd.f32 %v4662_v49, %v10764_v46  ;;  %v4747_v46 = vadd.f32 %v11057_v59, %v10713_v19 }
 0x469   :  { %v11079_v21 = vpop.f32.mrf.mxu1 }
 0x46a   :  { %12464 = vst [vmem:[#allocation51_spill] sm:$0xff] %v11079_v21 }
 0x46b   :  { %8010 = vmatmul.msk.f32.gmra.mxu0 %vm161_vm1, %v10859_v45 }
 0x46c   :  { %8066 = vmatmul.msk.f32.gmra.mxu1 %vm161_vm1, %v10896_v32  ;;  %v4665_v32 = vpop.f32.mrf.mxu0 }
 0x471   :  { %v11087_v63 = vpop.f32.mrf.mxu1 }
 0x472   :  { %12465 = vst [vmem:[#allocation52_spill] sm:$0xff] %v11087_v63 }
 0x473   :  { %8011 = vmatmul.msk.f32.gmra.mxu0 %vm161_vm1, %v10881_v33 }
 0x474   :  { %8067 = vmatmul.msk.f32.gmra.mxu1 %vm161_vm1, %v10918_v11  ;;  %v4668_v11 = vpop.f32.mrf.mxu0 }
 0x475   :  { %v4752_v59 = vadd.f32 %v4668_v11, %v10804_v38  ;;  %v4749_v38 = vadd.f32 %v11085_v56, %v10745_v0 }
 0x479   :  { %v11093_v39 = vpop.f32.mrf.mxu1 }
 0x47a   :  { %12466 = vst [vmem:[#allocation53_spill] sm:$0xff] %v11093_v39  ;;  %v11128_v39 = vld [vmem:[%s12321_s0 + $0x440] sm:$0xff] }
 0x47b   :  { %8012 = vmatmul.msk.f32.gmra.mxu0 %vm161_vm1, %v10903_v16 }
 0x47c   :  { %8068 = vmatmul.msk.f32.gmra.mxu1 %vm161_vm1, %v10940_v1  ;;  %v4671_v1 = vpop.f32.mrf.mxu0 }
 0x47d   :  { %v4753_v11 = vadd.f32 %v4671_v1, %v10830_v52  ;;  %v11223_v1 = vld [vmem:[#allocation2 + $0xb0] sm:$0xff] }
 0x47e   :  { %12476 = vst [vmem:[#allocation63_spill] sm:$0xff] %v11223_v1 }
 0x481   :  { %v11099_v21 = vpop.f32.mrf.mxu1 }
 0x482   :  { %12467 = vst [vmem:[#allocation54_spill] sm:$0xff] %v11099_v21  ;;  %v11115_v21 = vpop.f32.mrf.mxu2 }
 0x483   :  { %8013 = vmatmul.msk.f32.gmra.mxu0 %vm161_vm1, %v10925_v36 }
 0x484   :  { %8069 = vmatmul.msk.f32.gmra.mxu1 %vm161_vm1, %v10962_v12 }
 0x489   :  { %v11105_v37 = vpop.f32.mrf.mxu1 }
 0x48a   :  { %12468 = vst [vmem:[#allocation55_spill] sm:$0xff] %v11105_v37  ;;  %v11121_v37 = vpop.f32.mrf.mxu3  ;;  %v11130_v15 = vpop.f32.mrf.mxu2 }
 0x48b   :  { %8014 = vmatmul.msk.f32.gmra.mxu0 %vm161_vm1, %v10947_v20 }
 0x48c   :  { %8070 = vmatmul.msk.f32.gmra.mxu1 %vm161_vm1, %v10982_v29  ;;  %v11123_v29 = vpop.f32.mrf.mxu0 }
 0x491   :  { %v4928_v35 = vpop.f32.mrf.mxu1 }
 0x492   :  { %v11139_v63 = vpop.f32.mrf.mxu3 }
 0x493   :  { %8015 = vmatmul.msk.f32.gmra.mxu0 %vm161_vm1, %v10969_v10 }
 0x494   :  { %8071 = vmatmul.msk.f32.gmra.mxu1 %vm161_vm1, %v10837_v8  ;;  %v11146_v4 = vpop.f32.mrf.mxu0 }
 0x499   :  { %v4931_v12 = vpop.f32.mrf.mxu1 }
 0x49a   :  { %v11159_v58 = vpop.f32.mrf.mxu3 }
 0x49b   :  { %8016 = vmatmul.msk.f32.gmra.mxu0 %vm161_vm1, %v10991_v24 }
 0x49c   :  { %8072 = vmatmul.msk.f32.gmra.mxu1 %vm161_vm1, %v10859_v45  ;;  %v8154_v45 = vld [vmem:[%s12324_s3 + $0x20] sm:$0xff]  ;;  %v11165_v53 = vpop.f32.mrf.mxu0 }
 0x49d   :  { %5770 = vmatpush.msrb.mxu0 %v8154_v45  ;;  %v4746_v45 = vadd.f32 %v4650_v18, %v10697_v41  ;;  %v4751_v18 = vadd.f32 %v4665_v32, %v10783_v6  ;;  %v4748_v6 = vadd.f32 %v11073_v3, %v10729_v55  ;;  %v11243_v41 = vld [vmem:[#allocation2 + $0xc0] sm:$0xff] }
 0x49f   :  { %v11161_v50 = vadd.f32 %v4928_v35, %v4746_v45  ;;  %v11180_v35 = vadd.f32 %v4931_v12, %v4747_v46 }
 0x4a1   :  { %v4934_v8 = vpop.f32.mrf.mxu1 }
 0x4a2   :  { %v11184_v45 = vpop.f32.mrf.mxu3  ;;  %v11196_v46 = vadd.f32 %v4934_v8, %v4748_v6 }
 0x4a3   :  { %8017 = vmatmul.msk.f32.gmra.mxu0 %vm161_vm1, %v11128_v39 }
 0x4a4   :  { %8073 = vmatmul.msk.f32.gmra.mxu1 %vm161_vm1, %v10881_v33  ;;  %v11152_v33 = vpop.f32.mrf.mxu2  ;;  %v11191_v19 = vpop.f32.mrf.mxu0  ;;  %12470 = vst [vmem:[#allocation57_spill] sm:$0xff] %v11196_v46 }
 0x4a9   :  { %v4937_v61 = vpop.f32.mrf.mxu1 }
 0x4aa   :  { %v4408_v55 = vpop.f32.mrf.mxu3  ;;  %v11211_v6 = vadd.f32 %v4937_v61, %v4749_v38 }
 0x4ab   :  { %8018 = vmatmul.msk.f32.gmra.mxu0 %vm161_vm1, %v11144_v22 }
 0x4ac   :  { %8074 = vmatmul.msk.f32.gmra.mxu1 %vm161_vm1, %v10903_v16  ;;  %v11172_v16 = vpop.f32.mrf.mxu2  ;;  %v4686_v3 = vpop.f32.mrf.mxu0  ;;  %12473 = vst [vmem:[#allocation60_spill] sm:$0xff] %v11211_v6 }
 0x4b1   :  { %v4940_v5 = vpop.f32.mrf.mxu1 }
 0x4b2   :  { %v11163_v34 = vadd.f32 %v4940_v5, %v4750_v51  ;;  %v7986_v5 = vld [vmem:[%s12321_s0 + $0x458] sm:$0xff]  ;;  %v4411_v0 = vpop.f32.mrf.mxu3 }
 0x4b3   :  { %8019 = vmatmul.msk.f32.gmra.mxu0 %vm161_vm1, %v7985_v23 }
 0x4b4   :  { %8075 = vmatmul.msk.f32.gmra.mxu1 %vm161_vm1, %v10925_v36  ;;  %v4130_v32 = vpop.f32.mrf.mxu2  ;;  %v4689_v56 = vpop.f32.mrf.mxu0 }
 0x4b9   :  { %v4943_v51 = vpop.f32.mrf.mxu1 }
 0x4ba   :  { %v11182_v49 = vadd.f32 %v4943_v51, %v4751_v18  ;;  %v11200_v51 = vld [vmem:[#allocation2 + $0xa0] sm:$0xff]  ;;  %v11229_v38 = vpop.f32.mrf.mxu3 }
 0x4bb   :  { %8020 = vmatmul.msk.f32.gmra.mxu0 %vm161_vm1, %v7986_v5  ;;  %12472 = vst [vmem:[#allocation59_spill] sm:$0xff] %v11200_v51 }
 0x4bc   :  { %12469 = vst [vmem:[#allocation56_spill] sm:$0xff] %v11182_v49  ;;  %8076 = vmatmul.msk.f32.gmra.mxu1 %vm161_vm1, %v10947_v20  ;;  %v4133_v36 = vpop.f32.mrf.mxu2 }
 0x4c1   :  { %v4946_v12 = vpop.f32.mrf.mxu1 }
 0x4c2   :  { %v11198_v18 = vadd.f32 %v4946_v12, %v4752_v59  ;;  %v11215_v12 = vld [vmem:[#allocation2 + $0xa8] sm:$0xff] }
 0x4c3   :  { %8155 = vmatmul.msk.f32.vlgmr.msrb.gmra.mxu0 %vm27_vm2, %v11200_v51  ;;  %12475 = vst [vmem:[#allocation62_spill] sm:$0xff] %v11215_v12 }
 0x4c4   :  { %12471 = vst [vmem:[#allocation58_spill] sm:$0xff] %v11198_v18  ;;  %8077 = vmatmul.msk.f32.gmra.mxu1 %vm161_vm1, %v10969_v10  ;;  %v4136_v61 = vpop.f32.mrf.mxu2  ;;  %v11233_v10 = vpop.f32.mrf.mxu0 }
 0x4c9   :  { %v4949_v8 = vpop.f32.mrf.mxu1 }
 0x4ca   :  { %v11213_v59 = vadd.f32 %v4949_v8, %v4753_v11  ;;  %v11231_v8 = vld [vmem:[#allocation2 + $0xb8] sm:$0xff] }
 0x4cb   :  { %8156 = vmatmul.msk.f32.gmra.mxu0 %vm27_vm2, %v11215_v12  ;;  %12477 = vst [vmem:[#allocation64_spill] sm:$0xff] %v11231_v8  ;;  %v12478_v12 = vld [vmem:[#allocation21_spill] sm:$0xff] }
 0x4cc   :  { %12474 = vst [vmem:[#allocation61_spill] sm:$0xff] %v11213_v59  ;;  %8078 = vmatmul.msk.f32.gmra.mxu1 %vm161_vm1, %v10991_v24  ;;  %v11239_v24 = vpop.f32.mrf.mxu2 }
 0x4d1   :  { %v4952_v52 = vpop.f32.mrf.mxu1 }
 0x4d3   :  { %8157 = vmatmul.msk.f32.gmra.mxu0 %vm27_vm2, %v11223_v1  ;;  %v11250_v1 = vpop.f32.mrf.mxu0 }
 0x4d4   :  { %8079 = vmatmul.msk.f32.gmra.mxu1 %vm161_vm1, %v11128_v39  ;;  %v11245_v39 = vpop.f32.mrf.mxu3  ;;  %v11258_v6 = vpop.f32.mrf.mxu2 }
 0x4d9   :  { %v4955_v11 = vpop.f32.mrf.mxu1 }
 0x4db   :  { %8158 = vmatmul.msk.f32.gmra.mxu0 %vm27_vm2, %v11231_v8  ;;  %v3642_v8 = vadd.f32 %v10622_v48, %v12478_v12 }
 0x4dc   :  { %8080 = vmatmul.msk.f32.gmra.mxu1 %vm161_vm1, %v11144_v22  ;;  %v3646_v22 = vadd.f32 %v10695_v42, %v10325_v40  ;;  %v11268_v48 = vpop.f32.mrf.mxu3  ;;  %v3643_v40 = vadd.f32 %v10641_v44, %v10186_v54  ;;  %v8049_v54 = vld [vmem:[%s12321_s0 + $0x460] sm:$0xff] }
 0x4dd   :  { %v3920_v51 = vadd.f32 %v10802_v60, %v3642_v8 }
 0x4de   :  { %v3924_v59 = vadd.f32 %v10891_v2, %v3646_v22  ;;  %v3647_v2 = vadd.f32 %v10711_v25, %v10344_v26 }
 0x4df   :  { %v4198_v46 = vadd.f32 %v11115_v21, %v3920_v51  ;;  %v11275_v21 = vpop.f32.mrf.mxu0 }
 0x4e0   :  { %v4202_v49 = vadd.f32 %v4130_v32, %v3924_v59  ;;  %v3921_v32 = vadd.f32 %v10823_v14, %v3643_v40  ;;  %v3925_v51 = vadd.f32 %v10913_v62, %v3647_v2  ;;  %v8171_v62 = vld [vmem:[%s12324_s3 + $0x28] sm:$0xff]  ;;  %v11293_v14 = vpop.f32.mrf.mxu2 }
 0x4e1   :  { %v11241_v20 = vpop.f32.mrf.mxu1  ;;  %v4476_v42 = vadd.f32 %v11121_v37, %v4198_v46  ;;  %5917 = vmatpush.msra.mxu1 %v8171_v62 }
 0x4e2   :  { %v4480_v60 = vadd.f32 %v4408_v55, %v4202_v49  ;;  %v4199_v44 = vadd.f32 %v11130_v15, %v3921_v32  ;;  %v4203_v26 = vadd.f32 %v4133_v36, %v3925_v51  ;;  %v11288_v49 = vld [vmem:[#allocation2 + $0xd0] sm:$0xff]  ;;  %v3648_v36 = vadd.f32 %v10727_v30, %v10358_v27 }
 0x4e3   :  { %8159 = vmatmul.msk.f32.gmra.mxu0 %vm27_vm2, %v11243_v41  ;;  %v4754_v59 = vadd.f32 %v11123_v29, %v4476_v42  ;;  %v3644_v29 = vadd.f32 %v10660_v17, %v10239_v47  ;;  %v8050_v47 = vld [vmem:[%s12321_s0 + $0x468] sm:$0xff] }
 0x4e4   :  { %8081 = vmatmul.msk.f32.gmra.mxu1 %vm161_vm1, %v7985_v23  ;;  %v11263_v23 = vld [vmem:[#allocation2 + $0xc8] sm:$0xff]  ;;  %v4477_v46 = vadd.f32 %v11139_v63, %v4199_v44  ;;  %v4481_v55 = vadd.f32 %v4411_v0, %v4203_v26  ;;  %v3926_v8 = vadd.f32 %v10935_v13, %v3648_v36  ;;  %v3649_v0 = vadd.f32 %v10743_v28, %v10370_v43  ;;  %v8052_v44 = vld [vmem:[%s12321_s0 + $0x478] sm:$0xff] }
 0x4e5   :  { %v11284_v25 = vadd.f32 %v4952_v52, %v4754_v59  ;;  %v3922_v52 = vadd.f32 %v10847_v31, %v3644_v29  ;;  %v11320_v31 = vld [vmem:[#allocation2 + $0xd8] sm:$0xff] }
 0x4e6   :  { %v4755_v22 = vadd.f32 %v11146_v4, %v4477_v46  ;;  %v4759_v40 = vadd.f32 %v4689_v56, %v4481_v55  ;;  %v4204_v17 = vadd.f32 %v4136_v61, %v3926_v8  ;;  %v12526_v13 = vld [vmem:[#allocation53_spill] sm:$0xff] }
 0x4e7   :  { %v11310_v2 = vpop.f32.mrf.mxu0  ;;  %v4200_v27 = vadd.f32 %v11152_v33, %v3922_v52  ;;  %v3645_v33 = vadd.f32 %v10679_v7, %v10289_v9  ;;  %v8051_v9 = vld [vmem:[%s12321_s0 + $0x470] sm:$0xff] }
 0x4e8   :  { %v11316_v30 = vadd.f32 %v4955_v11, %v4755_v22  ;;  %v11327_v4 = vpop.f32.mrf.mxu2  ;;  %v4482_v61 = vadd.f32 %v11229_v38, %v4204_v17  ;;  %v12482_v17 = vld [vmem:[#allocation23_spill] sm:$0xff] }
 0x4e9   :  { %v11260_v18 = vpop.f32.mrf.mxu1  ;;  %v4478_v56 = vadd.f32 %v11159_v58, %v4200_v27  ;;  %v3923_v11 = vadd.f32 %v10869_v57, %v3645_v33  ;;  %v12483_v33 = vld [vmem:[#allocation27_spill] sm:$0xff] }
 0x4ea   :  { %v4760_v59 = vadd.f32 %v11233_v10, %v4482_v61  ;;  %v12484_v61 = vld [vmem:[#allocation34_spill] sm:$0xff] }
 0x4eb   :  { %8160 = vmatmul.msk.f32.gmra.mxu0 %vm27_vm2, %v11263_v23  ;;  %v4756_v51 = vadd.f32 %v11165_v53, %v4478_v56  ;;  %v4201_v43 = vadd.f32 %v11172_v16, %v3923_v11  ;;  %v11389_v56 = vld [vmem:[#allocation2 + $0x20] sm:$0xff] }
 0x4ec   :  { %8082 = vmatmul.msk.f32.gmra.mxu1 %vm161_vm1, %v7986_v5  ;;  %v4758_v5 = vadd.f32 %v4686_v3, %v4480_v60  ;;  %v11305_v3 = vpop.f32.mrf.mxu3  ;;  %v12479_v60 = vld [vmem:[#allocation33_spill] sm:$0xff]  ;;  %8088 = vmatmul.msk.f32.vlgmr.msrb.gmra.mxu2 %vm27_vm2, %v11389_v56 }
 0x4ed   :  { %v3927_v32 = vadd.f32 %v12479_v60, %v3649_v0  ;;  %v11347_v28 = vadd.f32 %v11241_v20, %v4756_v51  ;;  %v4479_v10 = vadd.f32 %v11184_v45, %v4201_v43  ;;  %v3654_v0 = vadd.f32 %v12483_v33, %v12482_v17  ;;  %v12485_v60 = vld [vmem:[#allocation42_spill] sm:$0xff]  ;;  %v12491_v33 = vld [vmem:[#allocation43_spill] sm:$0xff] }
 0x4ee   :  { %v11409_v45 = vld [vmem:[#allocation2 + $0xe0] sm:$0xff] }
 0x4ef   :  { %v4205_v7 = vadd.f32 %v11239_v24, %v3927_v32  ;;  %v11351_v58 = vpop.f32.mrf.mxu0  ;;  %v4757_v16 = vadd.f32 %v11191_v19, %v4479_v10  ;;  %v3932_v32 = vadd.f32 %v12485_v60, %v3654_v0  ;;  %v12487_v10 = vld [vmem:[#allocation20_spill] sm:$0xff] }
 0x4f1   :  { %v4964_v12 = vpop.f32.mrf.mxu1  ;;  %v4483_v38 = vadd.f32 %v11245_v39, %v4205_v7  ;;  %v11366_v26 = vadd.f32 %v11260_v18, %v4757_v16  ;;  %v12486_v7 = vld [vmem:[#allocation7_spill] sm:$0xff]  ;;  %v12488_v16 = vld [vmem:[#allocation13_spill] sm:$0xff] }
 0x4f2   :  { %v11286_v37 = vadd.f32 %v4964_v12, %v4758_v5 }
 0x4f3   :  { %8161 = vmatmul.msk.f32.gmra.mxu0 %vm27_vm2, %v11288_v49  ;;  %v4761_v20 = vadd.f32 %v11250_v1, %v4483_v38  ;;  %v3651_v38 = vadd.f32 %v12487_v10, %v12486_v7 }
 0x4f4   :  { %8083 = vmatmul.msk.f32.gmra.mxu1 %vm161_vm1, %v8049_v54  ;;  %v11339_v5 = vpop.f32.mrf.mxu3  ;;  %v11358_v54 = vpop.f32.mrf.mxu2 }
 0x4f7   :  { %v11375_v19 = vpop.f32.mrf.mxu0 }
 0x4f9   :  { %v4967_v42 = vpop.f32.mrf.mxu1 }
 0x4fa   :  { %v11318_v63 = vadd.f32 %v4967_v42, %v4759_v40  ;;  %v12480_v42 = vld [vmem:[#allocation11_spill] sm:$0xff] }
 0x4fb   :  { %8162 = vmatmul.msk.f32.gmra.mxu0 %vm27_vm2, %v11320_v31 }
 0x4fc   :  { %8084 = vmatmul.msk.f32.gmra.mxu1 %vm161_vm1, %v8050_v47  ;;  %v11370_v29 = vpop.f32.mrf.mxu3  ;;  %v4154_v1 = vpop.f32.mrf.mxu2  ;;  %v12481_v47 = vld [vmem:[#allocation10_spill] sm:$0xff] }
 0x4fd   :  { %v3650_v27 = vadd.f32 %v12481_v47, %v12480_v42 }
 0x4ff   :  { %v4710_v46 = vpop.f32.mrf.mxu0  ;;  %v3928_v11 = vadd.f32 %v12484_v61, %v3650_v27  ;;  %v12490_v27 = vld [vmem:[#allocation36_spill] sm:$0xff] }
 0x500   :  { %v3929_v17 = vadd.f32 %v12490_v27, %v3651_v38  ;;  %v12494_v38 = vld [vmem:[#allocation14_spill] sm:$0xff] }
 0x501   :  { %v4970_v12 = vpop.f32.mrf.mxu1 }
 0x502   :  { %v11349_v57 = vadd.f32 %v4970_v12, %v4760_v59  ;;  %v4206_v12 = vadd.f32 %v11258_v6, %v3928_v11  ;;  %v4207_v11 = vadd.f32 %v11293_v14, %v3929_v17 }
 0x504   :  { %8085 = vmatmul.msk.f32.gmra.mxu1 %vm161_vm1, %v8051_v9  ;;  %v4432_v36 = vpop.f32.mrf.mxu3  ;;  %v4157_v55 = vpop.f32.mrf.mxu2  ;;  %v4210_v9 = vadd.f32 %v4154_v1, %v3932_v32 }
 0x506   :  { %v4488_v42 = vadd.f32 %v4432_v36, %v4210_v9  ;;  %v12493_v36 = vld [vmem:[#allocation25_spill] sm:$0xff] }
 0x507   :  { %v4713_v8 = vpop.f32.mrf.mxu0 }
 0x508   :  { %v4766_v1 = vadd.f32 %v4710_v46, %v4488_v42  ;;  %v12498_v42 = vld [vmem:[#allocation45_spill] sm:$0xff] }
 0x509   :  { %v4973_v24 = vpop.f32.mrf.mxu1 }
 0x50a   :  { %v11368_v62 = vadd.f32 %v4973_v24, %v4761_v20  ;;  %v12489_v20 = vld [vmem:[#allocation28_spill] sm:$0xff] }
 0x50b   :  { %v3655_v24 = vadd.f32 %v12489_v20, %v12488_v16  ;;  %v4485_v20 = vadd.f32 %v11305_v3, %v4207_v11 }
 0x50c   :  { %8086 = vmatmul.msk.f32.gmra.mxu1 %vm161_vm1, %v8052_v44  ;;  %v4435_v52 = vpop.f32.mrf.mxu3  ;;  %v4160_v40 = vpop.f32.mrf.mxu2  ;;  %v4484_v44 = vadd.f32 %v11268_v48, %v4206_v12  ;;  %v12492_v48 = vld [vmem:[#allocation22_spill] sm:$0xff] }
 0x50d   :  { %v3933_v0 = vadd.f32 %v12491_v33, %v3655_v24  ;;  %v3652_v12 = vadd.f32 %v12493_v36, %v12492_v48  ;;  %v12497_v24 = vld [vmem:[#allocation38_spill] sm:$0xff]  ;;  %v4763_v17 = vadd.f32 %v11310_v2, %v4485_v20 }
 0x50e   :  { %v4762_v6 = vadd.f32 %v11275_v21, %v4484_v44  ;;  %v12495_v21 = vld [vmem:[#allocation29_spill] sm:$0xff] }
 0x50f   :  { %v4716_v43 = vpop.f32.mrf.mxu0  ;;  %v4211_v60 = vadd.f32 %v4157_v55, %v3933_v0  ;;  %v3656_v46 = vadd.f32 %v12495_v21, %v12494_v38  ;;  %v3930_v44 = vadd.f32 %v12497_v24, %v3652_v12  ;;  %v11427_v0 = vld [vmem:[%s12323_s2] ss:$0 sm:$0xff]  ;;  %v12503_v12 = vld [vmem:[#allocation56_spill] sm:$0xff] }
 0x510   :  { %v12504_v38 = vmax.f32 %v11180_v35, %v12503_v12  ;;  %v12511_v12 = vld [vmem:[#allocation61_spill] sm:$0xff] }
 0x511   :  { %v4976_v39 = vpop.f32.mrf.mxu1  ;;  %v4489_v14 = vadd.f32 %v4435_v52, %v4211_v60  ;;  %v3934_v27 = vadd.f32 %v12498_v42, %v3656_v46  ;;  %v4208_v3 = vadd.f32 %v11327_v4, %v3930_v44  ;;  %v11433_v60 = vld [vmem:[#allocation2 + $0xe8] sm:$0xff]  ;;  %v12501_v4 = vld [vmem:[#allocation24_spill] sm:$0xff] }
 0x512   :  { %v5040_v32 = vadd.f32 %v4976_v39, %v4762_v6  ;;  %v12496_v39 = vmax.f32 %v11161_v50, %v11163_v34  ;;  %v12505_v46 = vld [vmem:[#allocation40_spill] sm:$0xff] }
 0x513   :  { %v4767_v33 = vadd.f32 %v4713_v8, %v4489_v14  ;;  %v4212_v50 = vadd.f32 %v4160_v40, %v3934_v27  ;;  %v12499_v8 = vld [vmem:[#allocation12_spill] sm:$0xff]  ;;  %v12502_v40 = vld [vmem:[#allocation30_spill] sm:$0xff]  ;;  %v4486_v48 = vadd.f32 %v11339_v5, %v4208_v3 }
 0x514   :  { %8172 = vmatmul.msk.f32.vlgmr.msra.gmra.mxu1 %vm27_vm2, %v11243_v41  ;;  %v4438_v51 = vpop.f32.mrf.mxu3  ;;  %v4163_v47 = vpop.f32.mrf.mxu2 }
 0x515   :  { %v4490_v36 = vadd.f32 %v4438_v51, %v4212_v50  ;;  %v4764_v24 = vadd.f32 %v11351_v58, %v4486_v48  ;;  %v12508_v50 = vld [vmem:[#allocation58_spill] sm:$0xff]  ;;  %v11490_v48 = vld [vmem:[#allocation2 + $0xf8] sm:$0xff] }
 0x517   :  { %v4719_v9 = vpop.f32.mrf.mxu0  ;;  %v4768_v44 = vadd.f32 %v4716_v43, %v4490_v36 }
 0x519   :  { %v4979_v18 = vpop.f32.mrf.mxu1 }
 0x51c   :  { %8173 = vmatmul.msk.f32.gmra.mxu1 %vm27_vm2, %v11263_v23  ;;  %v4441_v10 = vpop.f32.mrf.mxu3  ;;  %v11431_v52 = vpop.f32.mrf.mxu2 }
 0x51f   :  { %v11451_v14 = vpop.f32.mrf.mxu0 }
 0x521   :  { %v11381_v22 = vpop.f32.mrf.mxu1 }
 0x522   :  { %v5042_v35 = vadd.f32 %v11381_v22, %v4764_v24 }
 0x524   :  { %8174 = vmatmul.msk.f32.gmra.mxu1 %vm27_vm2, %v11288_v49 }
 0x529   :  { %v11395_v59 = vpop.f32.mrf.mxu1 }
 0x52c   :  { %8175 = vmatmul.msk.f32.gmra.mxu1 %vm27_vm2, %v11320_v31 }
 0x531   :  { %v4988_v61 = vpop.f32.mrf.mxu1 }
 0x532   :  { %v5044_v7 = vadd.f32 %v4988_v61, %v4766_v1  ;;  %v5041_v1 = vadd.f32 %v4979_v18, %v4763_v17  ;;  %v3657_v18 = vadd.f32 %v12502_v40, %v12501_v4 }
 0x534   :  { %v5060_v16 = vmax.f32 %v5040_v32, %v5044_v7  ;;  %8176 = vmatmul.msk.f32.gmra.mxu1 %vm27_vm2, %v11409_v45  ;;  %v12500_v32 = vld [vmem:[#allocation26_spill] sm:$0xff] }
 0x535   :  { %v3653_v7 = vadd.f32 %v12500_v32, %v12499_v8 }
 0x536   :  { %v5064_v55 = vmax.f32 %v12496_v39, %v5060_v16  ;;  %v11440_v16 = vpop.f32.mrf.mxu3  ;;  %v12506_v39 = vld [vmem:[#allocation47_spill] sm:$0xff] }
 0x537   :  { %v3931_v20 = vadd.f32 %v12505_v46, %v3653_v7 }
 0x538   :  { %v5068_v6 = vadd.f32 %v11427_v0, %v5064_v55  ;;  %v3935_v55 = vadd.f32 %v12506_v39, %v3657_v18 }
 0x539   :  { %v4991_v34 = vpop.f32.mrf.mxu1  ;;  %v4209_v51 = vadd.f32 %v11358_v54, %v3931_v20 }
 0x53a   :  { %v5072_v61 = vmax.f32 %v5068_v6, 0.0  ;;  %v5045_v11 = vadd.f32 %v4991_v34, %v4767_v33  ;;  %v4213_v27 = vadd.f32 %v4163_v47, %v3935_v55  ;;  %v11459_v6 = vpop.f32.mrf.mxu2  ;;  %v11463_v34 = vld [vmem:[#allocation2 + $0xf0] sm:$0xff]  ;;  %v12507_v47 = vld [vmem:[#allocation57_spill] sm:$0xff] }
 0x53b   :  { %v4487_v22 = vadd.f32 %v11370_v29, %v4209_v51  ;;  %v11485_v29 = vpop.f32.mrf.mxu0 }
 0x53c   :  { %5077 = vst.msk [vmem:[#allocation2 + $0x120] sm:$0xff] %vm27_vm2, %v5072_v61  ;;  %v5061_v2 = vmax.f32 %v5041_v1, %v5045_v11  ;;  %8177 = vmatmul.msk.f32.gmra.mxu1 %vm27_vm2, %v11433_v60  ;;  %v4491_v43 = vadd.f32 %v4441_v10, %v4213_v27  ;;  %v12509_v1 = vmax.f32 %v12507_v47, %v12508_v50  ;;  %v12516_v47 = vld [vmem:[#allocation31_spill] sm:$0xff] }
 0x53d   :  { %5082 = vst.msk [vmem:[#allocation2 + $0x15e] sm:$0xfc] %vm2569_vm3, %v5072_v61 }
 0x53e   :  { %5087 = vst.msk [vmem:[#allocation2 + $0x28] sm:$0xff] %vm27_vm2, %v5072_v61  ;;  %v5065_v21 = vmax.f32 %v12504_v38, %v5061_v2  ;;  %v11480_v11 = vpop.f32.mrf.mxu3  ;;  %v4765_v2 = vadd.f32 %v11375_v19, %v4487_v22  ;;  %v4769_v8 = vadd.f32 %v4719_v9, %v4491_v43  ;;  %v12510_v9 = vld [vmem:[#allocation60_spill] sm:$0xff]  ;;  %v12515_v43 = vld [vmem:[#allocation15_spill] sm:$0xff] }
 0x53f   :  { %5091 = vst.msk [vmem:[#allocation2 + $0x66] sm:$0xfc] %vm2569_vm3, %v5072_v61  ;;  %v12512_v38 = vmax.f32 %v12510_v9, %v12511_v12  ;;  %v3658_v50 = vadd.f32 %v12516_v47, %v12515_v43  ;;  %v8137_v12 = vld [vmem:[%s12324_s3 + $0x18] sm:$0xff]  ;;  %v12521_v43 = vld [vmem:[#allocation18_spill] sm:$0xff] }
 0x540   :  { %v5069_v5 = vadd.f32 %v11427_v0, %v5065_v21  ;;  %v5043_v7 = vadd.f32 %v11395_v59, %v4765_v2  ;;  %5623 = vmatpush.msra.mxu3 %v8137_v12  ;;  %v12522_v47 = vld [vmem:[#allocation32_spill] sm:$0xff] }
 0x541   :  { %v4994_v42 = vpop.f32.mrf.mxu1 }
 0x542   :  { %v5073_v17 = vmax.f32 %v5069_v5, 0.0  ;;  %v5046_v33 = vadd.f32 %v4994_v42, %v4768_v44  ;;  %v11497_v19 = vpop.f32.mrf.mxu2 }
 0x543   :  { %v11461_v3 = vld [vmem:[#allocation2 + $0x120] sm:$0xff]  ;;  %v11512_v24 = vpop.f32.mrf.mxu0 }
 0x544   :  { %5078 = vst.msk [vmem:[#allocation2 + $0x128] sm:$0xff] %vm27_vm2, %v5073_v17  ;;  %v5062_v58 = vmax.f32 %v5042_v35, %v5046_v33  ;;  %8163 = vmatmul.msk.f32.gmra.mxu0 %vm27_vm2, %v11461_v3  ;;  %8178 = vmatmul.msk.f32.gmra.mxu1 %vm27_vm2, %v11463_v34 }
 0x545   :  { %5083 = vst.msk [vmem:[#allocation2 + $0x166] sm:$0xfc] %vm2569_vm3, %v5073_v17  ;;  %v11471_v54 = vld [vmem:[#allocation2 + $0x28] sm:$0xff] }
 0x546   :  { %5088 = vst.msk [vmem:[#allocation2 + $0x30] sm:$0xff] %vm27_vm2, %v5073_v17  ;;  %v5066_v61 = vmax.f32 %v12509_v1, %v5062_v58  ;;  %8089 = vmatmul.msk.f32.gmra.mxu2 %vm27_vm2, %v11471_v54  ;;  %v11510_v20 = vpop.f32.mrf.mxu3  ;;  %v12517_v1 = vld [vmem:[#allocation19_spill] sm:$0xff] }
 0x547   :  { %5092 = vst.msk [vmem:[#allocation2 + $0x6e] sm:$0xfc] %vm2569_vm3, %v5073_v17 }
 0x548   :  { %v5070_v32 = vadd.f32 %v11427_v0, %v5066_v61  ;;  %v12518_v61 = vld [vmem:[#allocation39_spill] sm:$0xff] }
 0x549   :  { %v4997_v10 = vpop.f32.mrf.mxu1  ;;  %v3662_v2 = vadd.f32 %v12518_v61, %v12517_v1  ;;  %v12523_v1 = vld [vmem:[#allocation9_spill] sm:$0xff] }
 0x54a   :  { %v5074_v4 = vmax.f32 %v5070_v32, 0.0  ;;  %v5047_v40 = vadd.f32 %v4997_v10, %v4769_v8  ;;  %v11524_v51 = vpop.f32.mrf.mxu2  ;;  %v5132_v32 = vld [vmem:[#allocation2] sm:$0xff]  ;;  %v8120_v10 = vld [vmem:[%s12324_s3 + $0x10] sm:$0xff] }
 0x54b   :  { %v11488_v18 = vld [vmem:[#allocation2 + $0x128] sm:$0xff]  ;;  %v11532_v17 = vpop.f32.mrf.mxu0  ;;  %8104 = vmatmul.msk.f32.vlgmr.msrb.gmra.mxu3 %vm27_vm2, %v5132_v32  ;;  %5476 = vmatpush.msra.mxu2 %v8120_v10  ;;  %v12524_v61 = vld [vmem:[#allocation41_spill] sm:$0xff] }
 0x54c   :  { %5079 = vst.msk [vmem:[#allocation2 + $0x130] sm:$0xff] %vm27_vm2, %v5074_v4  ;;  %v5063_v36 = vmax.f32 %v5043_v7, %v5047_v40  ;;  %8164 = vmatmul.msk.f32.gmra.mxu0 %vm27_vm2, %v11488_v18  ;;  %8179 = vmatmul.msk.f32.gmra.mxu1 %vm27_vm2, %v11490_v48  ;;  %v11543_v7 = vld [vmem:[#allocation2 + $0x40] sm:$0xff] }
 0x54d   :  { %5084 = vst.msk [vmem:[#allocation2 + $0x16e] sm:$0xfc] %vm2569_vm3, %v5074_v4  ;;  %v11500_v59 = vld [vmem:[#allocation2 + $0x30] sm:$0xff] }
 0x54e   :  { %5089 = vst.msk [vmem:[#allocation2 + $0x38] sm:$0xff] %vm27_vm2, %v5074_v4  ;;  %v5067_v21 = vmax.f32 %v12512_v38, %v5063_v36  ;;  %8090 = vmatmul.msk.f32.gmra.mxu2 %vm27_vm2, %v11500_v59  ;;  %v11526_v27 = vpop.f32.mrf.mxu3  ;;  %v12520_v36 = vld [vmem:[#allocation52_spill] sm:$0xff] }
 0x54f   :  { %5093 = vst.msk [vmem:[#allocation2 + $0x76] sm:$0xfc] %vm2569_vm3, %v5074_v4  ;;  %v12519_v4 = vld [vmem:[#allocation48_spill] sm:$0xff]  ;;  %v3940_v9 = vadd.f32 %v12520_v36, %v3662_v2  ;;  %v3663_v2 = vadd.f32 %v12524_v61, %v12523_v1  ;;  %v12525_v36 = vld [vmem:[#allocation49_spill] sm:$0xff]  ;;  %v12528_v61 = vld [vmem:[#allocation35_spill] sm:$0xff] }
 0x550   :  { %v5071_v46 = vadd.f32 %v11427_v0, %v5067_v21  ;;  %v3936_v40 = vadd.f32 %v12519_v4, %v3658_v50  ;;  %v3659_v50 = vadd.f32 %v12522_v47, %v12521_v43  ;;  %v12527_v1 = vld [vmem:[#allocation8_spill] sm:$0xff] }
 0x551   :  { %v5000_v39 = vpop.f32.mrf.mxu1  ;;  %v3941_v15 = vadd.f32 %v12526_v13, %v3663_v2 }
 0x552   :  { %v5075_v55 = vmax.f32 %v5071_v46, 0.0  ;;  %v4178_v33 = vpop.f32.mrf.mxu2  ;;  %v4214_v21 = vadd.f32 %v11431_v52, %v3936_v40  ;;  %v3937_v53 = vadd.f32 %v12525_v36, %v3659_v50 }
 0x553   :  { %v11514_v44 = vld [vmem:[#allocation2 + $0x130] sm:$0xff]  ;;  %v4734_v8 = vpop.f32.mrf.mxu0  ;;  %v4218_v46 = vadd.f32 %v4178_v33, %v3940_v9 }
 0x554   :  { %12513 = vst [vmem:[#allocation21_spill] sm:$0xff] %v11514_v44  ;;  %8165 = vmatmul.msk.f32.gmra.mxu0 %vm27_vm2, %v11514_v44  ;;  %v4492_v32 = vadd.f32 %v11440_v16, %v4214_v21  ;;  %v4215_v40 = vadd.f32 %v11459_v6, %v3937_v53  ;;  %v3660_v16 = vadd.f32 %v12528_v61, %v12527_v1  ;;  %v12529_v21 = vld [vmem:[#allocation17_spill] sm:$0xff] }
 0x555   :  { %5080 = vst.msk [vmem:[#allocation2 + $0x138] sm:$0xff] %vm27_vm2, %v5075_v55  ;;  %v11520_v5 = vld [vmem:[#allocation2 + $0x38] sm:$0xff] }
 0x556   :  { %5085 = vst.msk [vmem:[#allocation2 + $0x176] sm:$0xfc] %vm2569_vm3, %v5075_v55  ;;  %8091 = vmatmul.msk.f32.gmra.mxu2 %vm27_vm2, %v11520_v5  ;;  %v4456_v22 = vpop.f32.mrf.mxu3  ;;  %v4770_v12 = vadd.f32 %v11451_v14, %v4492_v32  ;;  %v4493_v13 = vadd.f32 %v11480_v11, %v4215_v40  ;;  %v12531_v14 = vmax.f32 %v11284_v25, %v11286_v37  ;;  %v12532_v32 = vld [vmem:[#allocation50_spill] sm:$0xff]  ;;  %v12534_v37 = vld [vmem:[#allocation16_spill] sm:$0xff] }
 0x557   :  { %v4496_v10 = vadd.f32 %v4456_v22, %v4218_v46  ;;  %v12530_v46 = vld [vmem:[#allocation44_spill] sm:$0xff]  ;;  %v3938_v53 = vadd.f32 %v12532_v32, %v3660_v16  ;;  %v12539_v16 = vld [vmem:[#allocation51_spill] sm:$0xff] }
 0x558   :  { %v5048_v43 = vadd.f32 %v5000_v39, %v4770_v12  ;;  %v3664_v50 = vadd.f32 %v12530_v46, %v12529_v21  ;;  %v4771_v39 = vadd.f32 %v11485_v29, %v4493_v13  ;;  %v12536_v29 = vld [vmem:[#allocation6_spill] sm:$0xff]  ;;  %v12540_v46 = vld [vmem:[#allocation55_spill] sm:$0xff] }
 0x559   :  { %v5003_v42 = vpop.f32.mrf.mxu1 }
 0x55a   :  { %v4181_v55 = vpop.f32.mrf.mxu2  ;;  %v5049_v11 = vadd.f32 %v5003_v42, %v4771_v39  ;;  %v12538_v42 = vmax.f32 %v11316_v30, %v11318_v63  ;;  %v8222_v30 = vld [vmem:[%s12324_s3 + $0x40] sm:$0xff] }
 0x55b   :  { %v4737_v52 = vpop.f32.mrf.mxu0  ;;  %v4219_v9 = vadd.f32 %v4181_v55, %v3941_v15  ;;  %v12533_v15 = vld [vmem:[#allocation54_spill] sm:$0xff]  ;;  %6358 = vmatpush.msra.mxu0 %v8222_v30 }
 0x55c   :  { %v11528_v35 = vld [vmem:[#allocation2 + $0x138] sm:$0xff]  ;;  %v3942_v6 = vadd.f32 %v12533_v15, %v3664_v50 }
 0x55d   :  { %12514 = vst [vmem:[#allocation33_spill] sm:$0xff] %v11528_v35  ;;  %8166 = vmatmul.msk.f32.gmra.mxu0 %vm27_vm2, %v11528_v35  ;;  %v4774_v35 = vadd.f32 %v4734_v8, %v4496_v10  ;;  %v4216_v10 = vadd.f32 %v11497_v19, %v3938_v53 }
 0x55e   :  { %8092 = vmatmul.msk.f32.gmra.mxu2 %vm27_vm2, %v11543_v7  ;;  %v4459_v4 = vpop.f32.mrf.mxu3 }
 0x55f   :  { %v4497_v2 = vadd.f32 %v4459_v4, %v4219_v9  ;;  %v4494_v19 = vadd.f32 %v11510_v20, %v4216_v10  ;;  %v12541_v10 = vmax.f32 %v11347_v28, %v11349_v57 }
 0x561   :  { %v11534_v58 = vpop.f32.mrf.mxu1  ;;  %v4772_v13 = vadd.f32 %v11512_v24, %v4494_v19  ;;  %v5848_v19 = vld [vmem:[#allocation2 + $0x160] sm:$0xff] }
 0x562   :  { %v4184_v22 = vpop.f32.mrf.mxu2 }
 0x563   :  { %v4740_v9 = vpop.f32.mrf.mxu0  ;;  %v5050_v32 = vadd.f32 %v11534_v58, %v4772_v13 }
 0x566   :  { %v4462_v36 = vpop.f32.mrf.mxu3 }
 0x569   :  { %v11551_v38 = vpop.f32.mrf.mxu1 }
 0x56a   :  { %v4187_v21 = vpop.f32.mrf.mxu2 }
 0x571   :  { %v5012_v33 = vpop.f32.mrf.mxu1 }
 0x572   :  { %v5052_v47 = vadd.f32 %v5012_v33, %v4774_v35  ;;  %v4775_v35 = vadd.f32 %v4737_v52, %v4497_v2  ;;  %v4220_v33 = vadd.f32 %v4184_v22, %v3942_v6  ;;  %v12537_v52 = vld [vmem:[#allocation46_spill] sm:$0xff]  ;;  %v4465_v6 = vpop.f32.mrf.mxu3  ;;  %v11707_v13 = vpop.f32.mrf.mxu2 }
 0x574   :  { %v5098_v44 = vmax.f32 %v5048_v43, %v5052_v47  ;;  %v3665_v47 = vadd.f32 %v12537_v52, %v12536_v29  ;;  %v4498_v1 = vadd.f32 %v4462_v36, %v4220_v33 }
 0x576   :  { %v5102_v8 = vmax.f32 %v12531_v14, %v5098_v44  ;;  %v12535_v44 = vld [vmem:[#allocation37_spill] sm:$0xff]  ;;  %v3943_v50 = vadd.f32 %v12540_v46, %v3665_v47  ;;  %v4776_v2 = vadd.f32 %v4740_v9, %v4498_v1  ;;  %v12543_v47 = vld [vmem:[#allocation59_spill] sm:$0xff]  ;;  %v12544_v1 = vld [vmem:[#allocation62_spill] sm:$0xff] }
 0x577   :  { %v3661_v43 = vadd.f32 %v12535_v44, %v12534_v37  ;;  %v8188_v46 = vld [vmem:[%s12324_s3 + $0x30] sm:$0xff] }
 0x578   :  { %v5106_v55 = vadd.f32 %v11427_v0, %v5102_v8  ;;  %v4221_v63 = vadd.f32 %v4187_v21, %v3943_v50  ;;  %v5143_v21 = vld [vmem:[#allocation2 + $0x98] sm:$0xff]  ;;  %6064 = vmatpush.msrb.mxu2 %v8188_v46 }
 0x579   :  { %v5015_v12 = vpop.f32.mrf.mxu1  ;;  %v3939_v22 = vadd.f32 %v12539_v16, %v3661_v43  ;;  %v12546_v16 = vld [vmem:[#allocation64_spill] sm:$0xff] }
 0x57a   :  { %v5110_v4 = vmax.f32 %v5106_v55, 0.0  ;;  %v5053_v40 = vadd.f32 %v5015_v12, %v4775_v35  ;;  %v4499_v55 = vadd.f32 %v4465_v6, %v4221_v63  ;;  %v11753_v6 = vld [vmem:[#allocation2 + $0x1d8] sm:$0xff] }
 0x57b   :  { %v4217_v20 = vadd.f32 %v11524_v51, %v3939_v22  ;;  %v4743_v51 = vpop.f32.mrf.mxu0  ;;  %v5141_v22 = vld [vmem:[#allocation2 + $0x88] sm:$0xff] }
 0x57c   :  { %5115 = vst.msk [vmem:[#allocation2 + $0x140] sm:$0xff] %vm27_vm2, %v5110_v4  ;;  %v5099_v25 = vmax.f32 %v5049_v11, %v5053_v40  ;;  %v4777_v11 = vadd.f32 %v4743_v51, %v4499_v55  ;;  %v6289_v55 = vld [vmem:[#allocation2 + $0x1e0] sm:$0xff] }
 0x57d   :  { %5120 = vst.msk [vmem:[#allocation2 + $0x102] sm:$0x3f] %vm2608_vm4, %v5110_v4  ;;  %v4495_v58 = vadd.f32 %v11526_v27, %v4217_v20 }
 0x57e   :  { %5125 = vst.msk [vmem:[#allocation2 + $0x48] sm:$0xff] %vm27_vm2, %v5110_v4  ;;  %v5103_v61 = vmax.f32 %v12538_v42, %v5099_v25  ;;  %v5849_v42 = vld [vmem:[#allocation2 + $0x168] sm:$0xff] }
 0x57f   :  { %5129 = vst.msk [vmem:[#allocation2 + $0xa] sm:$0x3f] %vm2608_vm4, %v5110_v4  ;;  %v4773_v33 = vadd.f32 %v11532_v17, %v4495_v58 }
 0x580   :  { %v5107_v14 = vadd.f32 %v11427_v0, %v5103_v61  ;;  %v12545_v61 = vld [vmem:[#allocation63_spill] sm:$0xff] }
 0x581   :  { %v5018_v8 = vpop.f32.mrf.mxu1  ;;  %v5051_v40 = vadd.f32 %v11551_v38, %v4773_v33  ;;  %v12542_v38 = vmax.f32 %v11366_v26, %v11368_v62 }
 0x582   :  { %v5111_v53 = vmax.f32 %v5107_v14, 0.0  ;;  %v5054_v15 = vadd.f32 %v5018_v8, %v4776_v2  ;;  %v8205_v2 = vld [vmem:[%s12324_s3 + $0x38] sm:$0xff]  ;;  %v11721_v8 = vld [vmem:[#allocation2 + $0x1c0] sm:$0xff] }
 0x583   :  { %v11599_v39 = vld [vmem:[#allocation2 + $0x140] sm:$0xff]  ;;  %v11705_v50 = vpop.f32.mrf.mxu0  ;;  %6211 = vmatpush.msrb.mxu3 %v8205_v2 }
 0x584   :  { %5116 = vst.msk [vmem:[#allocation2 + $0x148] sm:$0xff] %vm27_vm2, %v5111_v53  ;;  %v5100_v24 = vmax.f32 %v5050_v32, %v5054_v15  ;;  %8167 = vmatmul.msk.f32.gmra.mxu0 %vm27_vm2, %v11599_v39  ;;  %8180 = vmatmul.msk.f32.gmra.mxu1 %vm27_vm2, %v11599_v39  ;;  %v11741_v32 = vld [vmem:[#allocation2 + $0x1d0] sm:$0xff] }
 0x585   :  { %5121 = vst.msk [vmem:[#allocation2 + $0x10a] sm:$0x3f] %vm2608_vm4, %v5111_v53  ;;  %v11607_v35 = vld [vmem:[#allocation2 + $0x48] sm:$0xff] }
 0x586   :  { %5126 = vst.msk [vmem:[#allocation2 + $0x50] sm:$0xff] %vm27_vm2, %v5111_v53  ;;  %v5104_v36 = vmax.f32 %v12541_v10, %v5100_v24  ;;  %8093 = vmatmul.msk.f32.gmra.mxu2 %vm27_vm2, %v11607_v35  ;;  %v5133_v12 = vld [vmem:[#allocation2 + $0x8] sm:$0xff]  ;;  %v5399_v24 = vld [vmem:[#allocation2 + $0x60] sm:$0xff] }
 0x587   :  { %5130 = vst.msk [vmem:[#allocation2 + $0x12] sm:$0x3f] %vm2608_vm4, %v5111_v53  ;;  %8105 = vmatmul.msk.f32.gmra.mxu3 %vm27_vm2, %v5133_v12  ;;  %v5400_v10 = vld [vmem:[#allocation2 + $0x68] sm:$0xff] }
 0x588   :  { %v5108_v27 = vadd.f32 %v11427_v0, %v5104_v36 }
 0x589   :  { %v5021_v4 = vpop.f32.mrf.mxu1 }
 0x58a   :  { %v5112_v9 = vmax.f32 %v5108_v27, 0.0  ;;  %v5055_v25 = vadd.f32 %v5021_v4, %v4777_v11  ;;  %v6290_v11 = vld [vmem:[#allocation2 + $0x1e8] sm:$0xff]  ;;  %v5401_v27 = vld [vmem:[#allocation2 + $0x70] sm:$0xff] }
 0x58b   :  { %v11621_v28 = vld [vmem:[#allocation2 + $0x148] sm:$0xff]  ;;  %v11717_v14 = vpop.f32.mrf.mxu0 }
 0x58c   :  { %5117 = vst.msk [vmem:[#allocation2 + $0x150] sm:$0xff] %vm27_vm2, %v5112_v9  ;;  %v5101_v57 = vmax.f32 %v5051_v40, %v5055_v25  ;;  %8168 = vmatmul.msk.f32.gmra.mxu0 %vm27_vm2, %v11621_v28  ;;  %8181 = vmatmul.msk.f32.gmra.mxu1 %vm27_vm2, %v11621_v28 }
 0x58d   :  { %5122 = vst.msk [vmem:[#allocation2 + $0x112] sm:$0x3f] %vm2608_vm4, %v5112_v9  ;;  %v11629_v17 = vld [vmem:[#allocation2 + $0x50] sm:$0xff] }
 0x58e   :  { %5127 = vst.msk [vmem:[#allocation2 + $0x58] sm:$0xff] %vm27_vm2, %v5112_v9  ;;  %v5105_v37 = vmax.f32 %v12542_v38, %v5101_v57  ;;  %8094 = vmatmul.msk.f32.gmra.mxu2 %vm27_vm2, %v11629_v17  ;;  %v5134_v44 = vld [vmem:[#allocation2 + $0x10] sm:$0xff]  ;;  %v5402_v57 = vld [vmem:[#allocation2 + $0x78] sm:$0xff] }
 0x58f   :  { %5131 = vst.msk [vmem:[#allocation2 + $0x1a] sm:$0x3f] %vm2608_vm4, %v5112_v9  ;;  %8106 = vmatmul.msk.f32.gmra.mxu3 %vm27_vm2, %v5134_v44  ;;  %v6291_v9 = vld [vmem:[#allocation2 + $0x1f0] sm:$0xff] }
 0x590   :  { %v5109_v43 = vadd.f32 %v11427_v0, %v5105_v37 }
 0x592   :  { %v5113_v29 = vmax.f32 %v5109_v43, 0.0 }
 0x593   :  { %v11640_v52 = vld [vmem:[#allocation2 + $0x150] sm:$0xff]  ;;  %v11731_v30 = vpop.f32.mrf.mxu0 }
 0x594   :  { %5118 = vst.msk [vmem:[#allocation2 + $0x158] sm:$0xff] %vm27_vm2, %v5113_v29  ;;  %8169 = vmatmul.msk.f32.gmra.mxu0 %vm27_vm2, %v11640_v52  ;;  %8182 = vmatmul.msk.f32.gmra.mxu1 %vm27_vm2, %v11640_v52 }
 0x595   :  { %5123 = vst.msk [vmem:[#allocation2 + $0x11a] sm:$0x3f] %vm2608_vm4, %v5113_v29  ;;  %v11648_v26 = vld [vmem:[#allocation2 + $0x58] sm:$0xff] }
 0x596   :  { %8095 = vmatmul.msk.f32.gmra.mxu2 %vm27_vm2, %v11648_v26  ;;  %v5135_v62 = vld [vmem:[#allocation2 + $0x18] sm:$0xff] }
 0x597   :  { %8107 = vmatmul.msk.f32.gmra.mxu3 %vm27_vm2, %v5135_v62 }
 0x59b   :  { %v11653_v0 = vld [vmem:[#allocation2 + $0x158] sm:$0xff]  ;;  %v11745_v53 = vpop.f32.mrf.mxu0 }
 0x59c   :  { %8170 = vmatmul.msk.f32.gmra.mxu0 %vm27_vm2, %v11653_v0  ;;  %8183 = vmatmul.msk.f32.gmra.mxu1 %vm27_vm2, %v11653_v0 }
 0x59e   :  { %8096 = vmatmul.msk.f32.gmra.mxu2 %vm27_vm2, %v12543_v47 }
 0x59f   :  { %8108 = vmatmul.msk.f32.gmra.mxu3 %vm27_vm2, %v11389_v56  ;;  %v5850_v56 = vld [vmem:[#allocation2 + $0x170] sm:$0xff] }
 0x5a4   :  { %8184 = vmatmul.msk.f32.gmra.mxu1 %vm27_vm2, %v5848_v19  ;;  %8223 = vmatmul.msk.f32.vlgmr.msra.gmra.mxu0 %vm27_vm2, %v11599_v39 }
 0x5a6   :  { %8097 = vmatmul.msk.f32.gmra.mxu2 %vm27_vm2, %v12544_v1 }
 0x5a7   :  { %8109 = vmatmul.msk.f32.gmra.mxu3 %vm27_vm2, %v11471_v54  ;;  %v5851_v54 = vld [vmem:[#allocation2 + $0x178] sm:$0xff] }
 0x5ac   :  { %8185 = vmatmul.msk.f32.gmra.mxu1 %vm27_vm2, %v5849_v42  ;;  %8224 = vmatmul.msk.f32.gmra.mxu0 %vm27_vm2, %v11621_v28 }
 0x5ae   :  { %8098 = vmatmul.msk.f32.gmra.mxu2 %vm27_vm2, %v12545_v61 }
 0x5af   :  { %8110 = vmatmul.msk.f32.gmra.mxu3 %vm27_vm2, %v11500_v59  ;;  %v5140_v59 = vld [vmem:[#allocation2 + $0x80] sm:$0xff] }
 0x5b4   :  { %8186 = vmatmul.msk.f32.gmra.mxu1 %vm27_vm2, %v5850_v56  ;;  %8225 = vmatmul.msk.f32.gmra.mxu0 %vm27_vm2, %v11640_v52 }
 0x5b6   :  { %8099 = vmatmul.msk.f32.gmra.mxu2 %vm27_vm2, %v12546_v16 }
 0x5b7   :  { %8111 = vmatmul.msk.f32.gmra.mxu3 %vm27_vm2, %v11520_v5  ;;  %v5142_v5 = vld [vmem:[#allocation2 + $0x90] sm:$0xff] }
 0x5bc   :  { %8187 = vmatmul.msk.f32.gmra.mxu1 %vm27_vm2, %v5851_v54  ;;  %8226 = vmatmul.msk.f32.gmra.mxu0 %vm27_vm2, %v11653_v0 }
 0x5be   :  { %8100 = vmatmul.msk.f32.gmra.mxu2 %vm27_vm2, %v11243_v41 }
 0x5bf   :  { %8112 = vmatmul.msk.f32.gmra.mxu3 %vm27_vm2, %v5140_v59 }
 0x5c4   :  { %8227 = vmatmul.msk.f32.gmra.mxu0 %vm27_vm2, %v5848_v19 }
 0x5c6   :  { %8101 = vmatmul.msk.f32.gmra.mxu2 %vm27_vm2, %v11263_v23 }
 0x5c7   :  { %8113 = vmatmul.msk.f32.gmra.mxu3 %vm27_vm2, %v5141_v22 }
 0x5c9   :  { %v11719_v20 = vpop.f32.mrf.mxu2 }
 0x5cc   :  { %8228 = vmatmul.msk.f32.gmra.mxu0 %vm27_vm2, %v5849_v42 }
 0x5ce   :  { %8102 = vmatmul.msk.f32.gmra.mxu2 %vm27_vm2, %v11288_v49  ;;  %v11761_v58 = vpop.f32.mrf.mxu3 }
 0x5cf   :  { %8114 = vmatmul.msk.f32.gmra.mxu3 %vm27_vm2, %v5142_v5 }
 0x5d1   :  { %v11735_v63 = vpop.f32.mrf.mxu2 }
 0x5d4   :  { %8229 = vmatmul.msk.f32.gmra.mxu0 %vm27_vm2, %v5850_v56 }
 0x5d6   :  { %8103 = vmatmul.msk.f32.gmra.mxu2 %vm27_vm2, %v11320_v31 }
 0x5d7   :  { %8115 = vmatmul.msk.f32.gmra.mxu3 %vm27_vm2, %v5143_v21 }
 0x5d9   :  { %v11749_v15 = vpop.f32.mrf.mxu2 }
 0x5dc   :  { %8230 = vmatmul.msk.f32.gmra.mxu0 %vm27_vm2, %v5851_v54 }
 0x5de   :  { %8121 = vmatmul.msk.f32.vlgmr.msra.gmra.mxu2 %vm27_vm2, %v11543_v7  ;;  %v11729_v7 = vld [vmem:[#allocation2 + $0x1c8] sm:$0xff] }
 0x5df   :  { %8116 = vmatmul.msk.f32.gmra.mxu3 %vm27_vm2, %v12543_v47 }
 0x5e1   :  { %v5245_v51 = vpop.f32.mrf.mxu2 }
 0x5e4   :  { %8231 = vmatmul.msk.f32.gmra.mxu0 %vm27_vm2, %v11721_v8 }
 0x5e6   :  { %8122 = vmatmul.msk.f32.gmra.mxu2 %vm27_vm2, %v11607_v35  ;;  %v11759_v35 = vpop.f32.mrf.mxu0 }
 0x5e7   :  { %8117 = vmatmul.msk.f32.gmra.mxu3 %vm27_vm2, %v12544_v1 }
 0x5ec   :  { %8232 = vmatmul.msk.f32.gmra.mxu0 %vm27_vm2, %v11729_v7 }
 0x5ee   :  { %8123 = vmatmul.msk.f32.gmra.mxu2 %vm27_vm2, %v11629_v17  ;;  %v11766_v12 = vpop.f32.mrf.mxu0 }
 0x5ef   :  { %8118 = vmatmul.msk.f32.gmra.mxu3 %vm27_vm2, %v12545_v61 }
 0x5f4   :  { %8233 = vmatmul.msk.f32.gmra.mxu0 %vm27_vm2, %v11741_v32 }
 0x5f6   :  { %8124 = vmatmul.msk.f32.gmra.mxu2 %vm27_vm2, %v11648_v26  ;;  %v11775_v25 = vpop.f32.mrf.mxu0 }
 0x5f7   :  { %8119 = vmatmul.msk.f32.gmra.mxu3 %vm27_vm2, %v12546_v16 }
 0x5fc   :  { %8234 = vmatmul.msk.f32.gmra.mxu0 %vm27_vm2, %v11753_v6 }
 0x5fe   :  { %8125 = vmatmul.msk.f32.gmra.mxu2 %vm27_vm2, %v5399_v24 }
 0x5ff   :  { %8138 = vmatmul.msk.f32.vlgmr.msra.gmra.mxu3 %vm27_vm2, %v5140_v59 }
 0x604   :  { %8235 = vmatmul.msk.f32.gmra.mxu0 %vm27_vm2, %v6289_v55 }
 0x606   :  { %8126 = vmatmul.msk.f32.gmra.mxu2 %vm27_vm2, %v5400_v10 }
 0x607   :  { %8139 = vmatmul.msk.f32.gmra.mxu3 %vm27_vm2, %v5141_v22 }
 0x609   :  { %v5248_v36 = vpop.f32.mrf.mxu2 }
 0x60a   :  { %v11768_v33 = vpop.f32.mrf.mxu3 }
 0x60c   :  { %8236 = vmatmul.msk.f32.gmra.mxu0 %vm27_vm2, %v6290_v11 }
 0x60e   :  { %8127 = vmatmul.msk.f32.gmra.mxu2 %vm27_vm2, %v5401_v27 }
 0x60f   :  { %8140 = vmatmul.msk.f32.gmra.mxu3 %vm27_vm2, %v5142_v5 }
 0x611   :  { %v5251_v4 = vpop.f32.mrf.mxu2 }
 0x612   :  { %v11773_v40 = vpop.f32.mrf.mxu3 }
 0x614   :  { %8237 = vmatmul.msk.f32.gmra.mxu0 %vm27_vm2, %v6291_v9  ;;  %v12547_v9 = vld [vmem:[#allocation21_spill] sm:$0xff] }
 0x616   :  { %8128 = vmatmul.msk.f32.gmra.mxu2 %vm27_vm2, %v5402_v57  ;;  %v5353_v57 = vadd.f32 %v11773_v40, %v11735_v63  ;;  %v5347_v63 = vadd.f32 %v11761_v58, %v11707_v13 }
 0x617   :  { %8141 = vmatmul.msk.f32.gmra.mxu3 %vm27_vm2, %v5143_v21 }
 0x619   :  { %v5254_v17 = vpop.f32.mrf.mxu2 }
 0x61a   :  { %v11780_v38 = vpop.f32.mrf.mxu3 }
 0x61e   :  { %8129 = vmatmul.msk.f32.gmra.mxu2 %vm27_vm2, %v11243_v41 }
 0x61f   :  { %8142 = vmatmul.msk.f32.gmra.mxu3 %vm27_vm2, %v12543_v47 }
 0x621   :  { %v5257_v37 = vpop.f32.mrf.mxu2 }
 0x622   :  { %v5358_v44 = vpop.f32.mrf.mxu3 }
 0x623   :  { %v11786_v43 = vadd.f32 %v5358_v44, %v5245_v51 }
 0x626   :  { %8130 = vmatmul.msk.f32.gmra.mxu2 %vm27_vm2, %v11263_v23 }
 0x627   :  { %8143 = vmatmul.msk.f32.gmra.mxu3 %vm27_vm2, %v12544_v1 }
 0x629   :  { %v5260_v29 = vpop.f32.mrf.mxu2 }
 0x62a   :  { %v5361_v26 = vpop.f32.mrf.mxu3 }
 0x62b   :  { %v11792_v62 = vadd.f32 %v5361_v26, %v5248_v36  ;;  %v5356_v26 = vadd.f32 %v11780_v38, %v11749_v15 }
 0x62e   :  { %8131 = vmatmul.msk.f32.gmra.mxu2 %vm27_vm2, %v11288_v49  ;;  %v5550_v49 = vld [vmem:[#allocation2 + $0x100] sm:$0xff] }
 0x62f   :  { %8144 = vmatmul.msk.f32.gmra.mxu3 %vm27_vm2, %v12545_v61 }
 0x631   :  { %v5263_v41 = vpop.f32.mrf.mxu2 }
 0x632   :  { %v5364_v47 = vpop.f32.mrf.mxu3 }
 0x633   :  { %v11798_v19 = vadd.f32 %v5364_v47, %v5251_v4 }
 0x636   :  { %8132 = vmatmul.msk.f32.gmra.mxu2 %vm27_vm2, %v11320_v31  ;;  %v5551_v31 = vld [vmem:[#allocation2 + $0x108] sm:$0xff] }
 0x637   :  { %8145 = vmatmul.msk.f32.gmra.mxu3 %vm27_vm2, %v12546_v16 }
 0x639   :  { %v5266_v23 = vpop.f32.mrf.mxu2 }
 0x63a   :  { %v5367_v1 = vpop.f32.mrf.mxu3 }
 0x63b   :  { %v11804_v42 = vadd.f32 %v5367_v1, %v5254_v17 }
 0x63e   :  { %8133 = vmatmul.msk.f32.gmra.mxu2 %vm27_vm2, %v11409_v45  ;;  %v5552_v45 = vld [vmem:[#allocation2 + $0x110] sm:$0xff] }
 0x63f   :  { %8146 = vmatmul.msk.f32.gmra.mxu3 %vm27_vm2, %v5550_v49 }
 0x641   :  { %v5269_v61 = vpop.f32.mrf.mxu2 }
 0x642   :  { %v5370_v56 = vpop.f32.mrf.mxu3 }
 0x643   :  { %v11809_v54 = vadd.f32 %v5370_v56, %v5257_v37 }
 0x646   :  { %8134 = vmatmul.msk.f32.gmra.mxu2 %vm27_vm2, %v11433_v60  ;;  %v5553_v60 = vld [vmem:[#allocation2 + $0x118] sm:$0xff] }
 0x647   :  { %8147 = vmatmul.msk.f32.gmra.mxu3 %vm27_vm2, %v5551_v31 }
 0x649   :  { %v5272_v16 = vpop.f32.mrf.mxu2 }
 0x64a   :  { %v5373_v59 = vpop.f32.mrf.mxu3 }
 0x64b   :  { %v11814_v22 = vadd.f32 %v5373_v59, %v5260_v29 }
 0x64e   :  { %8135 = vmatmul.msk.f32.gmra.mxu2 %vm27_vm2, %v11463_v34 }
 0x64f   :  { %8148 = vmatmul.msk.f32.gmra.mxu3 %vm27_vm2, %v5552_v45 }
 0x651   :  { %v5275_v5 = vpop.f32.mrf.mxu2 }
 0x652   :  { %v5376_v21 = vpop.f32.mrf.mxu3 }
 0x653   :  { %v11819_v46 = vadd.f32 %v5376_v21, %v5263_v41 }
 0x656   :  { %8136 = vmatmul.msk.f32.gmra.mxu2 %vm27_vm2, %v11490_v48  ;;  %v5350_v48 = vadd.f32 %v11768_v33, %v11719_v20  ;;  %v12548_v20 = vld [vmem:[#allocation33_spill] sm:$0xff]  ;;  %v11848_v33 = vpop.f32.mrf.mxu1 }
 0x657   :  { %8149 = vmatmul.msk.f32.gmra.mxu3 %vm27_vm2, %v5553_v60 }
 0x659   :  { %v5278_v2 = vpop.f32.mrf.mxu2 }
 0x65a   :  { %v5379_v24 = vpop.f32.mrf.mxu3 }
 0x65b   :  { %v11824_v51 = vadd.f32 %v5379_v24, %v5266_v23 }
 0x65e   :  { %8189 = vmatmul.msk.f32.vlgmr.msrb.gmra.mxu2 %vm27_vm2, %v5550_v49 }
 0x65f   :  { %8150 = vmatmul.msk.f32.gmra.mxu3 %vm27_vm2, %v11461_v3 }
 0x661   :  { %v5478_v34 = vpop.f32.mrf.mxu2 }
 0x662   :  { %v5382_v55 = vpop.f32.mrf.mxu3  ;;  %v5526_v40 = vadd.f32 %v5478_v34, %v5347_v63  ;;  %v5994_v63 = vld [vmem:[#allocation2 + $0x198] sm:$0xff] }
 0x663   :  { %v11829_v10 = vadd.f32 %v5382_v55, %v5269_v61  ;;  %v11860_v61 = vpop.f32.mrf.mxu1 }
 0x666   :  { %8190 = vmatmul.msk.f32.gmra.mxu2 %vm27_vm2, %v5551_v31 }
 0x667   :  { %8151 = vmatmul.msk.f32.gmra.mxu3 %vm27_vm2, %v11488_v18 }
 0x669   :  { %v5481_v36 = vpop.f32.mrf.mxu2 }
 0x66a   :  { %v5385_v11 = vpop.f32.mrf.mxu3  ;;  %v5527_v27 = vadd.f32 %v5481_v36, %v5350_v48 }
 0x66b   :  { %v11836_v4 = vadd.f32 %v5385_v11, %v5272_v16  ;;  %v11872_v16 = vpop.f32.mrf.mxu1 }
 0x66e   :  { %8191 = vmatmul.msk.f32.gmra.mxu2 %vm27_vm2, %v5552_v45 }
 0x66f   :  { %8152 = vmatmul.msk.f32.gmra.mxu3 %vm27_vm2, %v12547_v9 }
 0x671   :  { %v5484_v17 = vpop.f32.mrf.mxu2 }
 0x672   :  { %v5388_v37 = vpop.f32.mrf.mxu3  ;;  %v5528_v44 = vadd.f32 %v5484_v17, %v5353_v57  ;;  %v5992_v57 = vld [vmem:[#allocation2 + $0x188] sm:$0xff] }
 0x673   :  { %v11843_v29 = vadd.f32 %v5388_v37, %v5275_v5  ;;  %v11881_v21 = vpop.f32.mrf.mxu1 }
 0x676   :  { %8192 = vmatmul.msk.f32.gmra.mxu2 %vm27_vm2, %v5553_v60 }
 0x677   :  { %8153 = vmatmul.msk.f32.gmra.mxu3 %vm27_vm2, %v12548_v20 }
 0x679   :  { %v5487_v41 = vpop.f32.mrf.mxu2 }
 0x67a   :  { %v5391_v47 = vpop.f32.mrf.mxu3  ;;  %v5529_v23 = vadd.f32 %v5487_v41, %v5356_v26  ;;  %v5993_v41 = vld [vmem:[#allocation2 + $0x190] sm:$0xff] }
 0x67b   :  { %v11852_v1 = vadd.f32 %v5391_v47, %v5278_v2  ;;  %v5931_v55 = vpop.f32.mrf.mxu1 }
 0x67e   :  { %8193 = vmatmul.msk.f32.gmra.mxu2 %vm27_vm2, %v11461_v3 }
 0x67f   :  { %8206 = vmatmul.msk.f32.vlgmr.msrb.gmra.mxu3 %vm27_vm2, %v11461_v3 }
 0x681   :  { %v5490_v49 = vpop.f32.mrf.mxu2 }
 0x682   :  { %v5530_v15 = vadd.f32 %v5490_v49, %v11786_v43  ;;  %v5625_v38 = vpop.f32.mrf.mxu3  ;;  %v5793_v43 = vpop.f32.mrf.mxu0 }
 0x683   :  { %v11863_v56 = vadd.f32 %v5625_v38, %v5526_v40 }
 0x686   :  { %8194 = vmatmul.msk.f32.gmra.mxu2 %vm27_vm2, %v11488_v18 }
 0x687   :  { %8207 = vmatmul.msk.f32.gmra.mxu3 %vm27_vm2, %v11488_v18 }
 0x689   :  { %v5493_v31 = vpop.f32.mrf.mxu2 }
 0x68a   :  { %v5531_v13 = vadd.f32 %v5493_v31, %v11792_v62  ;;  %v5628_v58 = vpop.f32.mrf.mxu3  ;;  %v11887_v62 = vpop.f32.mrf.mxu0 }
 0x68b   :  { %v11870_v3 = vadd.f32 %v5628_v58, %v5527_v27  ;;  %v5995_v58 = vld [vmem:[#allocation2 + $0x1a0] sm:$0xff] }
 0x68e   :  { %8195 = vmatmul.msk.f32.gmra.mxu2 %vm27_vm2, %v12547_v9 }
 0x68f   :  { %8208 = vmatmul.msk.f32.gmra.mxu3 %vm27_vm2, %v12547_v9 }
 0x691   :  { %v5496_v59 = vpop.f32.mrf.mxu2 }
 0x692   :  { %v5532_v45 = vadd.f32 %v5496_v59, %v11798_v19  ;;  %v5631_v5 = vpop.f32.mrf.mxu3  ;;  %v5991_v19 = vld [vmem:[#allocation2 + $0x180] sm:$0xff]  ;;  %v11897_v36 = vpop.f32.mrf.mxu0 }
 0x693   :  { %v11879_v18 = vadd.f32 %v5631_v5, %v5528_v44 }
 0x696   :  { %8196 = vmatmul.msk.f32.gmra.mxu2 %vm27_vm2, %v12548_v20 }
 0x697   :  { %8209 = vmatmul.msk.f32.gmra.mxu3 %vm27_vm2, %v12548_v20 }
 0x699   :  { %v5499_v60 = vpop.f32.mrf.mxu2 }
 0x69a   :  { %v5533_v2 = vadd.f32 %v5499_v60, %v11804_v42  ;;  %v5634_v24 = vpop.f32.mrf.mxu3  ;;  %v11907_v20 = vpop.f32.mrf.mxu0  ;;  %v5996_v60 = vld [vmem:[#allocation2 + $0x1a8] sm:$0xff] }
 0x69b   :  { %v11890_v34 = vadd.f32 %v5634_v24, %v5529_v23 }
 0x69e   :  { %8197 = vmatmul.msk.f32.gmra.mxu2 %vm27_vm2, %v5991_v19 }
 0x69f   :  { %8210 = vmatmul.msk.f32.gmra.mxu3 %vm27_vm2, %v11599_v39  ;;  %v5934_v39 = vpop.f32.mrf.mxu1 }
 0x6a1   :  { %v11895_v48 = vpop.f32.mrf.mxu2 }
 0x6a2   :  { %v5637_v11 = vpop.f32.mrf.mxu3 }
 0x6a3   :  { %v5677_v27 = vadd.f32 %v5637_v11, %v5530_v15  ;;  %v11918_v15 = vpop.f32.mrf.mxu0  ;;  %v6451_v11 = vld [vmem:[%s12326_s5 + $0x18] sm:$0xff] }
 0x6a4   :  { %6496 = vmatpush.msra.mxu2 %v6451_v11 }
 0x6a5   :  { %v5824_v9 = vadd.f32 %v11759_v35, %v5677_v27  ;;  %v8242_v27 = vld [vmem:[%s12326_s5 + $0x38] sm:$0xff] }
 0x6a6   :  { %8198 = vmatmul.msk.f32.gmra.mxu2 %vm27_vm2, %v5992_v57  ;;  %6474 = vmatpush.msrb.mxu1 %v8242_v27 }
 0x6a7   :  { %8211 = vmatmul.msk.f32.gmra.mxu3 %vm27_vm2, %v11621_v28  ;;  %v11903_v42 = vadd.f32 %v5931_v55, %v5824_v9  ;;  %v5937_v40 = vpop.f32.mrf.mxu1  ;;  %v5997_v55 = vld [vmem:[#allocation2 + $0x1b0] sm:$0xff]  ;;  %v8248_v9 = vld [vmem:[%s12326_s5 + $0x58] sm:$0xff] }
 0x6a8   :  { %6524 = vmatpush.msra.mxu3 %v8248_v9 }
 0x6a9   :  { %v11905_v17 = vpop.f32.mrf.mxu2 }
 0x6aa   :  { %v5640_v37 = vpop.f32.mrf.mxu3 }
 0x6ab   :  { %v5678_v44 = vadd.f32 %v5640_v37, %v5531_v13 }
 0x6ad   :  { %v5825_v26 = vadd.f32 %v11766_v12, %v5678_v44  ;;  %v5998_v44 = vld [vmem:[#allocation2 + $0x1b8] sm:$0xff] }
 0x6ae   :  { %8199 = vmatmul.msk.f32.gmra.mxu2 %vm27_vm2, %v5993_v41 }
 0x6af   :  { %8212 = vmatmul.msk.f32.gmra.mxu3 %vm27_vm2, %v11640_v52  ;;  %v11913_v35 = vadd.f32 %v5934_v39, %v5825_v26  ;;  %v5940_v59 = vpop.f32.mrf.mxu1 }
 0x6b1   :  { %v11915_v28 = vpop.f32.mrf.mxu2 }
 0x6b2   :  { %v5643_v47 = vpop.f32.mrf.mxu3 }
 0x6b3   :  { %v5679_v23 = vadd.f32 %v5643_v47, %v5532_v45  ;;  %v11927_v45 = vpop.f32.mrf.mxu0 }
 0x6b5   :  { %v5826_v49 = vadd.f32 %v11775_v25, %v5679_v23 }
 0x6b6   :  { %8200 = vmatmul.msk.f32.gmra.mxu2 %vm27_vm2, %v5994_v63  ;;  %v5820_v63 = vadd.f32 %v11705_v50, %v11863_v56 }
 0x6b7   :  { %8213 = vmatmul.msk.f32.gmra.mxu3 %vm27_vm2, %v11653_v0  ;;  %v11923_v12 = vadd.f32 %v5937_v40, %v5826_v49  ;;  %v6292_v40 = vld [vmem:[#allocation2 + $0x1f8] sm:$0xff] }
 0x6b8   :  { %8238 = vmatmul.msk.f32.gmra.mxu0 %vm27_vm2, %v6292_v40 }
 0x6b9   :  { %v11925_v52 = vpop.f32.mrf.mxu2 }
 0x6ba   :  { %v5646_v38 = vpop.f32.mrf.mxu3 }
 0x6bb   :  { %v5680_v31 = vadd.f32 %v5646_v38, %v5533_v2 }
 0x6bd   :  { %v5827_v13 = vadd.f32 %v5793_v43, %v5680_v31  ;;  %v11939_v43 = vpop.f32.mrf.mxu0 }
 0x6be   :  { %8201 = vmatmul.msk.f32.gmra.mxu2 %vm27_vm2, %v5995_v58 }
 0x6bf   :  { %8214 = vmatmul.msk.f32.gmra.mxu3 %vm27_vm2, %v5995_v58  ;;  %v11931_v25 = vadd.f32 %v5940_v59, %v5827_v13 }
 0x6c1   :  { %v11933_v5 = vpop.f32.mrf.mxu2 }
 0x6c2   :  { %v11935_v0 = vpop.f32.mrf.mxu3 }
 0x6c5   :  { %v11955_v57 = vpop.f32.mrf.mxu0 }
 0x6c6   :  { %8202 = vmatmul.msk.f32.gmra.mxu2 %vm27_vm2, %v5996_v60 }
 0x6c7   :  { %8215 = vmatmul.msk.f32.gmra.mxu3 %vm27_vm2, %v5996_v60 }
 0x6c9   :  { %v5517_v2 = vpop.f32.mrf.mxu2 }
 0x6ca   :  { %v5539_v24 = vadd.f32 %v5517_v2, %v11836_v4  ;;  %v11942_v19 = vpop.f32.mrf.mxu3 }
 0x6cd   :  { %v11965_v23 = vpop.f32.mrf.mxu0 }
 0x6ce   :  { %8203 = vmatmul.msk.f32.gmra.mxu2 %vm27_vm2, %v5997_v55 }
 0x6cf   :  { %8216 = vmatmul.msk.f32.gmra.mxu3 %vm27_vm2, %v5997_v55  ;;  %v5823_v55 = vadd.f32 %v11745_v53, %v11890_v34 }
 0x6d1   :  { %v5520_v4 = vpop.f32.mrf.mxu2  ;;  %v5970_v11 = vadd.f32 %v11881_v21, %v5823_v55  ;;  %v6449_v21 = vld [vmem:[%s12326_s5 + $0x8] sm:$0xff] }
 0x6d2   :  { %v5540_v39 = vadd.f32 %v5520_v4, %v11843_v29  ;;  %v11958_v37 = vpop.f32.mrf.mxu3  ;;  %v5967_v29 = vadd.f32 %v11848_v33, %v5820_v63  ;;  %v6450_v33 = vld [vmem:[%s12326_s5 + $0x10] sm:$0xff] }
 0x6d3   :  { %6497 = vmatpush.msra.mxu2 %v6450_v33 }
 0x6d5   :  { %v6360_v13 = vpop.f32.mrf.mxu0  ;;  %6498 = vmatpush.msra.mxu2 %v6449_v21 }
 0x6d6   :  { %8204 = vmatmul.msk.f32.gmra.mxu2 %vm27_vm2, %v5998_v44 }
 0x6d7   :  { %8217 = vmatmul.msk.f32.gmra.mxu3 %vm27_vm2, %v5998_v44 }
 0x6d9   :  { %v5523_v26 = vpop.f32.mrf.mxu2 }
 0x6da   :  { %v5541_v41 = vadd.f32 %v5523_v26, %v11852_v1  ;;  %v11963_v47 = vpop.f32.mrf.mxu3  ;;  %v5821_v1 = vadd.f32 %v11717_v14, %v11870_v3  ;;  %v8241_v14 = vld [vmem:[%s12326_s5 + $0x30] sm:$0xff] }
 0x6db   :  { %6475 = vmatpush.msrb.mxu1 %v8241_v14 }
 0x6dc   :  { %v5968_v50 = vadd.f32 %v11860_v61, %v5821_v1 }
 0x6dd   :  { %v6363_v61 = vpop.f32.mrf.mxu0 }
 0x6df   :  { %8218 = vmatmul.msk.f32.gmra.mxu3 %vm27_vm2, %v11721_v8  ;;  %v5822_v8 = vadd.f32 %v11731_v30, %v11879_v18 }
 0x6e1   :  { %v6066_v49 = vpop.f32.mrf.mxu2  ;;  %v5969_v30 = vadd.f32 %v11872_v16, %v5822_v8 }
 0x6e2   :  { %v11973_v38 = vpop.f32.mrf.mxu3  ;;  %v6114_v31 = vadd.f32 %v6066_v49, %v5967_v29 }
 0x6e5   :  { %v6366_v9 = vpop.f32.mrf.mxu0 }
 0x6e7   :  { %8219 = vmatmul.msk.f32.gmra.mxu3 %vm27_vm2, %v11729_v7  ;;  %v8247_v7 = vld [vmem:[%s12326_s5 + $0x50] sm:$0xff] }
 0x6e8   :  { %6525 = vmatpush.msra.mxu3 %v8247_v7 }
 0x6e9   :  { %v6069_v56 = vpop.f32.mrf.mxu2 }
 0x6ea   :  { %v5664_v58 = vpop.f32.mrf.mxu3  ;;  %v6115_v59 = vadd.f32 %v6069_v56, %v5968_v50 }
 0x6eb   :  { %v11980_v60 = vadd.f32 %v5664_v58, %v5539_v24 }
 0x6ed   :  { %v6369_v40 = vpop.f32.mrf.mxu0 }
 0x6ef   :  { %8220 = vmatmul.msk.f32.gmra.mxu3 %vm27_vm2, %v11741_v32 }
 0x6f1   :  { %v6072_v3 = vpop.f32.mrf.mxu2 }
 0x6f2   :  { %v5667_v18 = vpop.f32.mrf.mxu3  ;;  %v6116_v2 = vadd.f32 %v6072_v3, %v5969_v30 }
 0x6f3   :  { %v11996_v24 = vadd.f32 %v5667_v18, %v5540_v39 }
 0x6f7   :  { %8221 = vmatmul.msk.f32.gmra.mxu3 %vm27_vm2, %v11753_v6  ;;  %v6372_v6 = vpop.f32.mrf.mxu0 }
 0x6f9   :  { %v6075_v27 = vpop.f32.mrf.mxu2 }
 0x6fa   :  { %v5670_v32 = vpop.f32.mrf.mxu3  ;;  %v6117_v4 = vadd.f32 %v6075_v27, %v5970_v11 }
 0x6fb   :  { %v12003_v44 = vadd.f32 %v5670_v32, %v5541_v41  ;;  %v8240_v41 = vld [vmem:[%s12326_s5 + $0x28] sm:$0xff] }
 0x6fc   :  { %6476 = vmatpush.msrb.mxu1 %v8240_v41 }
 0x6ff   :  { %v6375_v56 = vpop.f32.mrf.mxu0 }
 0x701   :  { %v6078_v16 = vpop.f32.mrf.mxu2 }
 0x702   :  { %v6118_v26 = vadd.f32 %v6078_v16, %v11903_v42  ;;  %v6213_v63 = vpop.f32.mrf.mxu3  ;;  %v8246_v42 = vld [vmem:[%s12326_s5 + $0x48] sm:$0xff]  ;;  %v5943_v16 = vpop.f32.mrf.mxu1 }
 0x703   :  { %v6261_v39 = vadd.f32 %v6213_v63, %v6114_v31  ;;  %6526 = vmatpush.msra.mxu3 %v8246_v42 }
 0x705   :  { %v12018_v3 = vadd.f32 %v6360_v13, %v6261_v39  ;;  %v8239_v13 = vld [vmem:[%s12326_s5 + $0x20] sm:$0xff] }
 0x706   :  { %6477 = vmatpush.msrb.mxu1 %v8239_v13  ;;  %v8258_v13 = vld [vmem:[%s12326_s5 + $0x98] sm:$0xff] }
 0x707   :  { %v6378_v14 = vpop.f32.mrf.mxu0 }
 0x709   :  { %v6081_v29 = vpop.f32.mrf.mxu2 }
 0x70a   :  { %v6119_v53 = vadd.f32 %v6081_v29, %v11913_v35  ;;  %v6216_v34 = vpop.f32.mrf.mxu3 }
 0x70b   :  { %v6262_v49 = vadd.f32 %v6216_v34, %v6115_v59 }
 0x70f   :  { %v6381_v27 = vpop.f32.mrf.mxu0 }
 0x711   :  { %v6084_v31 = vpop.f32.mrf.mxu2 }
 0x712   :  { %v6120_v35 = vadd.f32 %v6084_v31, %v11923_v12  ;;  %v6219_v1 = vpop.f32.mrf.mxu3 }
 0x713   :  { %v6263_v50 = vadd.f32 %v6219_v1, %v6116_v2  ;;  %v12024_v2 = vadd.f32 %v6363_v61, %v6262_v49 }
 0x715   :  { %v12039_v29 = vadd.f32 %v6366_v9, %v6263_v50 }
 0x717   :  { %v12043_v34 = vpop.f32.mrf.mxu0 }
 0x719   :  { %v6087_v58 = vpop.f32.mrf.mxu2 }
 0x71a   :  { %v6121_v59 = vadd.f32 %v6087_v58, %v11931_v25  ;;  %v6222_v8 = vpop.f32.mrf.mxu3  ;;  %v6448_v25 = vld [vmem:[%s12326_s5] sm:$0xff] }
 0x71b   :  { %v6264_v33 = vadd.f32 %v6222_v8, %v6117_v4  ;;  %v8245_v4 = vld [vmem:[%s12326_s5 + $0x40] sm:$0xff]  ;;  %6499 = vmatpush.msra.mxu2 %v6448_v25 }
 0x71c   :  { %6527 = vmatpush.msra.mxu3 %v8245_v4  ;;  %v8253_v4 = vld [vmem:[%s12326_s5 + $0x78] sm:$0xff] }
 0x71d   :  { %v12051_v31 = vadd.f32 %v6369_v40, %v6264_v33  ;;  %v5534_v33 = vadd.f32 %v11895_v48, %v11809_v54  ;;  %v8257_v54 = vld [vmem:[%s12326_s5 + $0x90] sm:$0xff]  ;;  %6582 = vmatpush.msrb.mxu2 %v8258_v13  ;;  %6553 = vmatpush.msra.mxu1 %v8253_v4 }
 0x71e   :  { %v8252_v13 = vld [vmem:[%s12326_s5 + $0x70] sm:$0xff] }
 0x71f   :  { %6583 = vmatpush.msrb.mxu2 %v8257_v54  ;;  %6554 = vmatpush.msra.mxu1 %v8252_v13 }
 0x722   :  { %v6225_v7 = vpop.f32.mrf.mxu3 }
 0x723   :  { %v6265_v30 = vadd.f32 %v6225_v7, %v6118_v26  ;;  %v6090_v26 = vpop.f32.mrf.mxu2 }
 0x725   :  { %v12020_v18 = vadd.f32 %v6372_v6, %v6265_v30  ;;  %v12047_v6 = vpop.f32.mrf.mxu1 }
 0x727   :  { %v6424_v55 = vmax.f32 %v12018_v3, %v12020_v18 }
 0x72a   :  { %v6228_v11 = vpop.f32.mrf.mxu3 }
 0x72b   :  { %v6266_v12 = vadd.f32 %v6228_v11, %v6119_v53  ;;  %v12049_v21 = vpop.f32.mrf.mxu2  ;;  %v5538_v11 = vadd.f32 %v11933_v5, %v11829_v10  ;;  %v8263_v10 = vld [vmem:[%s12326_s5 + $0xb8] sm:$0xff] }
 0x72c   :  { %6611 = vmatpush.msrb.mxu3 %v8263_v10  ;;  %v8260_v10 = vld [vmem:[%s12326_s5 + $0xa0] sm:$0xff] }
 0x72d   :  { %v12026_v32 = vadd.f32 %v6375_v56, %v6266_v12  ;;  %v12059_v56 = vpop.f32.mrf.mxu1  ;;  %v5681_v12 = vadd.f32 %v11935_v0, %v5534_v33  ;;  %v5685_v25 = vadd.f32 %v11973_v38, %v5538_v11  ;;  %v5535_v38 = vadd.f32 %v11905_v17, %v11814_v22  ;;  %v8262_v22 = vld [vmem:[%s12326_s5 + $0xb0] sm:$0xff]  ;;  %v8251_v17 = vld [vmem:[%s12326_s5 + $0x68] sm:$0xff] }
 0x72e   :  { %6612 = vmatpush.msrb.mxu3 %v8262_v22  ;;  %6555 = vmatpush.msra.mxu1 %v8251_v17 }
 0x72f   :  { %v6425_v61 = vmax.f32 %v12024_v2, %v12026_v32  ;;  %v5828_v5 = vadd.f32 %v11887_v62, %v5681_v12  ;;  %v8256_v62 = vld [vmem:[%s12326_s5 + $0x88] sm:$0xff]  ;;  %v8277_v2 = vld [vmem:[%s12326_s5 + $0x110] sm:$0xff] }
 0x730   :  { %6584 = vmatpush.msrb.mxu2 %v8256_v62 }
 0x732   :  { %v6231_v63 = vpop.f32.mrf.mxu3 }
 0x733   :  { %v6267_v39 = vadd.f32 %v6231_v63, %v6120_v35  ;;  %v12057_v35 = vpop.f32.mrf.mxu0  ;;  %v12061_v58 = vpop.f32.mrf.mxu2  ;;  %v5832_v63 = vadd.f32 %v11927_v45, %v5685_v25  ;;  %v8255_v45 = vld [vmem:[%s12326_s5 + $0x80] sm:$0xff] }
 0x734   :  { %v8250_v25 = vld [vmem:[%s12326_s5 + $0x60] sm:$0xff]  ;;  %6585 = vmatpush.msrb.mxu2 %v8255_v45 }
 0x735   :  { %v12041_v53 = vadd.f32 %v6378_v14, %v6267_v39  ;;  %v12067_v7 = vpop.f32.mrf.mxu1  ;;  %v5682_v39 = vadd.f32 %v11942_v19, %v5535_v38  ;;  %v8261_v19 = vld [vmem:[%s12326_s5 + $0xa8] sm:$0xff]  ;;  %6556 = vmatpush.msra.mxu1 %v8250_v25 }
 0x736   :  { %6613 = vmatpush.msrb.mxu3 %v8261_v19 }
 0x737   :  { %v6426_v49 = vmax.f32 %v12039_v29, %v12041_v53  ;;  %v8292_v29 = vld [vmem:[%s12326_s5 + $0x170] sm:$0xff] }
 0x738   :  { %6614 = vmatpush.msrb.mxu3 %v8260_v10  ;;  %v8270_v10 = vld [vmem:[%s12326_s5 + $0xe0] sm:$0xff] }
 0x73a   :  { %v6234_v41 = vpop.f32.mrf.mxu3 }
 0x73b   :  { %v6268_v42 = vadd.f32 %v6234_v41, %v6121_v59  ;;  %v12063_v8 = vpop.f32.mrf.mxu0  ;;  %v12069_v40 = vpop.f32.mrf.mxu2  ;;  %v5975_v41 = vadd.f32 %v5943_v16, %v5828_v5  ;;  %v5536_v5 = vadd.f32 %v11915_v28, %v11819_v46  ;;  %v12136_v46 = vld [vmem:[%s12325_s4] ss:$0 sm:$0xff] }
 0x73d   :  { %v12053_v1 = vadd.f32 %v6381_v27, %v6268_v42  ;;  %v5955_v27 = vpop.f32.mrf.mxu1  ;;  %v6122_v33 = vadd.f32 %v6090_v26, %v5975_v41  ;;  %v5829_v26 = vadd.f32 %v11897_v36, %v5682_v39  ;;  %v5833_v36 = vadd.f32 %v11939_v43, %v11980_v60 }
 0x73e   :  { %v5979_v11 = vadd.f32 %v5955_v27, %v5832_v63 }
 0x73f   :  { %v6427_v9 = vmax.f32 %v12051_v31, %v12053_v1  ;;  %v5976_v38 = vadd.f32 %v12047_v6, %v5829_v26  ;;  %v5537_v6 = vadd.f32 %v11925_v52, %v11824_v51  ;;  %v8273_v51 = vld [vmem:[%s12326_s5 + $0xf8] sm:$0xff]  ;;  %v8301_v31 = vld [vmem:[%s12326_s5 + $0x1a8] sm:$0xff] }
 0x740   :  { %v8296_v1 = vld [vmem:[%s12326_s5 + $0x188] sm:$0xff] }
 0x741   :  { %v6123_v41 = vadd.f32 %v12049_v21, %v5976_v38  ;;  %v5834_v21 = vadd.f32 %v11955_v57, %v11996_v24  ;;  %v8265_v38 = vld [vmem:[%s12326_s5 + $0xc0] sm:$0xff] }
 0x742   :  { %v6237_v50 = vpop.f32.mrf.mxu3 }
 0x743   :  { %v12075_v30 = vpop.f32.mrf.mxu0  ;;  %v6102_v48 = vpop.f32.mrf.mxu2  ;;  %v6269_v27 = vadd.f32 %v6237_v50, %v6122_v33 }
 0x744   :  { %v6126_v12 = vadd.f32 %v6102_v48, %v5979_v11  ;;  %v5683_v48 = vadd.f32 %v11958_v37, %v5536_v5 }
 0x745   :  { %v5958_v16 = vpop.f32.mrf.mxu1  ;;  %v6416_v63 = vadd.f32 %v12043_v34, %v6269_v27  ;;  %v8271_v27 = vld [vmem:[%s12326_s5 + $0xe8] sm:$0xff] }
 0x746   :  { %v5980_v33 = vadd.f32 %v5958_v16, %v5833_v36  ;;  %v5830_v43 = vadd.f32 %v11907_v20, %v5683_v48  ;;  %v5684_v20 = vadd.f32 %v11963_v47, %v5537_v6 }
 0x748   :  { %v5831_v19 = vadd.f32 %v11918_v15, %v5684_v20  ;;  %v8267_v15 = vld [vmem:[%s12326_s5 + $0xd0] sm:$0xff] }
 0x74a   :  { %v12065_v14 = vpop.f32.mrf.mxu3  ;;  %v5978_v5 = vadd.f32 %v12067_v7, %v5831_v19  ;;  %v8307_v19 = vld [vmem:[%s12326_s5 + $0x1d0] sm:$0xff] }
 0x74b   :  { %v6396_v42 = vpop.f32.mrf.mxu0  ;;  %v6105_v4 = vpop.f32.mrf.mxu2  ;;  %v6270_v37 = vadd.f32 %v12065_v14, %v6123_v41  ;;  %v5977_v14 = vadd.f32 %v12059_v56, %v5830_v43  ;;  %v8272_v56 = vld [vmem:[%s12326_s5 + $0xf0] sm:$0xff]  ;;  %v8283_v43 = vld [vmem:[%s12326_s5 + $0x138] sm:$0xff] }
 0x74c   :  { %v6127_v60 = vadd.f32 %v6105_v4, %v5980_v33  ;;  %v6125_v33 = vadd.f32 %v12069_v40, %v5978_v5  ;;  %v8287_v40 = vld [vmem:[%s12326_s5 + $0x150] sm:$0xff] }
 0x74d   :  { %v5961_v13 = vpop.f32.mrf.mxu1  ;;  %v6417_v3 = vadd.f32 %v12057_v35, %v6270_v37  ;;  %v6124_v57 = vadd.f32 %v12061_v58, %v5977_v14  ;;  %v8268_v35 = vld [vmem:[%s12326_s5 + $0xd8] sm:$0xff] }
 0x74e   :  { %v5981_v52 = vadd.f32 %v5961_v13, %v5834_v21  ;;  %v8278_v58 = vld [vmem:[%s12326_s5 + $0x118] sm:$0xff]  ;;  %v8282_v21 = vld [vmem:[%s12326_s5 + $0x130] sm:$0xff] }
 0x752   :  { %v12071_v59 = vpop.f32.mrf.mxu3 }
 0x753   :  { %v6399_v28 = vpop.f32.mrf.mxu0  ;;  %v6108_v17 = vpop.f32.mrf.mxu2  ;;  %v6271_v26 = vadd.f32 %v12071_v59, %v6124_v57  ;;  %v5835_v59 = vadd.f32 %v11965_v23, %v12003_v44  ;;  %v8276_v23 = vld [vmem:[%s12326_s5 + $0x108] sm:$0xff]  ;;  %v8303_v57 = vld [vmem:[%s12326_s5 + $0x1b8] sm:$0xff] }
 0x754   :  { %v6128_v16 = vadd.f32 %v6108_v17, %v5981_v52 }
 0x755   :  { %v5964_v44 = vpop.f32.mrf.mxu1  ;;  %v6418_v36 = vadd.f32 %v12063_v8, %v6271_v26  ;;  %v8306_v26 = vld [vmem:[%s12326_s5 + $0x1c8] sm:$0xff] }
 0x75a   :  { %v12094_v0 = vpop.f32.mrf.mxu3 }
 0x75b   :  { %v6402_v25 = vpop.f32.mrf.mxu0  ;;  %v6111_v41 = vpop.f32.mrf.mxu2 }
 0x762   :  { %v6249_v54 = vpop.f32.mrf.mxu3 }
 0x763   :  { %v6273_v50 = vadd.f32 %v6249_v54, %v6126_v12  ;;  %v8266_v54 = vld [vmem:[%s12326_s5 + $0xc8] sm:$0xff]  ;;  %v6405_v13 = vpop.f32.mrf.mxu0 }
 0x765   :  { %v6420_v39 = vadd.f32 %v6396_v42, %v6273_v50 }
 0x767   :  { %v6428_v11 = vmax.f32 %v6416_v63, %v6420_v39  ;;  %v8288_v63 = vld [vmem:[%s12326_s5 + $0x158] sm:$0xff]  ;;  %v5982_v39 = vadd.f32 %v5964_v44, %v5835_v59 }
 0x769   :  { %v6432_v34 = vmax.f32 %v6424_v55, %v6428_v11  ;;  %v6129_v37 = vadd.f32 %v6111_v41, %v5982_v39 }
 0x76a   :  { %v6252_v42 = vpop.f32.mrf.mxu3 }
 0x76b   :  { %v6440_v62 = vadd.f32 %v12136_v46, %v6432_v34  ;;  %v6274_v22 = vadd.f32 %v6252_v42, %v6127_v60  ;;  %v8293_v60 = vld [vmem:[%s12326_s5 + $0x178] sm:$0xff]  ;;  %v6272_v34 = vadd.f32 %v12094_v0, %v6125_v33  ;;  %v8286_v0 = vld [vmem:[%s12326_s5 + $0x148] sm:$0xff] }
 0x76d   :  { %v12151_v18 = vmax.f32 %v6440_v62, 0.0  ;;  %v6421_v55 = vadd.f32 %v6399_v28, %v6274_v22  ;;  %v8275_v28 = vld [vmem:[%s12326_s5 + $0x100] sm:$0xff]  ;;  %v8281_v62 = vld [vmem:[%s12326_s5 + $0x128] sm:$0xff]  ;;  %v6419_v20 = vadd.f32 %v12075_v30, %v6272_v34 }
 0x76e   :  { %v8291_v22 = vld [vmem:[%s12326_s5 + $0x168] sm:$0xff]  ;;  %v8290_v30 = vld [vmem:[%s12326_s5 + $0x160] sm:$0xff] }
 0x76f   :  { %v6458_v24 = vrot.slane %v12151_v18, 2  ;;  %v6509_v47 = vrot.slane %v12151_v18, 4  ;;  %v6429_v45 = vmax.f32 %v6417_v3, %v6421_v55  ;;  %8244 = vmatmul.msk.f32.vlgmr.msra.gmra.mxu2 %vm6459_vm5, %v12151_v18  ;;  %v6538_v7 = vrot.slane %v12151_v18, 6  ;;  %v8285_v3 = vld [vmem:[%s12326_s5 + $0x140] sm:$0xff] }
 0x770   :  { %6669 = vmatpush.msra.mxu2 %v8273_v51  ;;  %v8280_v18 = vld [vmem:[%s12326_s5 + $0x120] sm:$0xff] }
 0x771   :  { %v6433_v12 = vmax.f32 %v6425_v61, %v6429_v45  ;;  %8243 = vmatmul.msk.f32.vlgmr.msrb.gmra.mxu1 %vm6459_vm5, %v6458_v24  ;;  %8249 = vmatmul.msk.f32.vlgmr.msra.gmra.mxu3 %vm6459_vm5, %v6509_v47  ;;  %v8298_v24 = vld [vmem:[%s12326_s5 + $0x198] sm:$0xff] }
 0x772   :  { %v6255_v4 = vpop.f32.mrf.mxu3  ;;  %6640 = vmatpush.msrb.mxu1 %v8268_v35  ;;  %6670 = vmatpush.msra.mxu2 %v8272_v56  ;;  %v8308_v47 = vld [vmem:[%s12326_s5 + $0x1d8] sm:$0xff]  ;;  %v8302_v35 = vld [vmem:[%s12326_s5 + $0x1b0] sm:$0xff] }
 0x773   :  { %v6441_v32 = vadd.f32 %v12136_v46, %v6433_v12  ;;  %v6275_v61 = vadd.f32 %v6255_v4, %v6128_v16  ;;  %6698 = vmatpush.msra.mxu3 %v8278_v58  ;;  %v8297_v56 = vld [vmem:[%s12326_s5 + $0x190] sm:$0xff]  ;;  %v8300_v16 = vld [vmem:[%s12326_s5 + $0x1a0] sm:$0xff] }
 0x774   :  { %6641 = vmatpush.msrb.mxu1 %v8267_v15  ;;  %6671 = vmatpush.msra.mxu2 %v8271_v27  ;;  %v8305_v27 = vld [vmem:[%s12326_s5 + $0x1c0] sm:$0xff]  ;;  %v8312_v4 = vld [vmem:[%s12326_s5 + $0x1f0] sm:$0xff] }
 0x775   :  { %v6445_v50 = vmax.f32 %v6441_v32, 0.0  ;;  %v6422_v48 = vadd.f32 %v6402_v25, %v6275_v61  ;;  %6699 = vmatpush.msra.mxu3 %v8277_v2  ;;  %v8313_v25 = vld [vmem:[%s12326_s5 + $0x1f8] sm:$0xff]  ;;  %v8311_v2 = vld [vmem:[%s12326_s5 + $0x1e8] sm:$0xff] }
 0x776   :  { %6642 = vmatpush.msrb.mxu1 %v8266_v54  ;;  %6672 = vmatpush.msra.mxu2 %v8270_v10  ;;  %v8310_v54 = vld [vmem:[%s12326_s5 + $0x1e0] sm:$0xff] }
 0x777   :  { %v6596_v8 = vrot.slane %v6445_v50, 2  ;;  %v6430_v11 = vmax.f32 %v6418_v36, %v6422_v48  ;;  %8259 = vmatmul.msk.f32.vlgmr.msrb.gmra.mxu2 %vm6459_vm5, %v6445_v50  ;;  %6700 = vmatpush.msra.mxu3 %v8276_v23  ;;  %v6654_v17 = vrot.slane %v6445_v50, 6  ;;  %v6625_v55 = vrot.slane %v6445_v50, 4 }
 0x778   :  { %6643 = vmatpush.msrb.mxu1 %v8265_v38  ;;  %6756 = vmatpush.msrb.mxu2 %v8288_v63 }
 0x779   :  { %v6434_v6 = vmax.f32 %v6426_v49, %v6430_v11  ;;  %8254 = vmatmul.msk.f32.vlgmr.msra.gmra.mxu1 %vm6459_vm5, %v6538_v7  ;;  %8264 = vmatmul.msk.f32.vlgmr.msrb.gmra.mxu3 %vm6459_vm5, %v6596_v8 }
 0x77a   :  { %v6258_v42 = vpop.f32.mrf.mxu3  ;;  %6701 = vmatpush.msra.mxu3 %v8275_v28  ;;  %6727 = vmatpush.msra.mxu1 %v8283_v43 }
 0x77b   :  { %v6442_v53 = vadd.f32 %v12136_v46, %v6434_v6  ;;  %v6276_v49 = vadd.f32 %v6258_v42, %v6129_v37  ;;  %6757 = vmatpush.msrb.mxu2 %v8287_v40 }
 0x77c   :  { %6785 = vmatpush.msrb.mxu3 %v8293_v60  ;;  %6728 = vmatpush.msra.mxu1 %v8282_v21 }
 0x77d   :  { %v6423_v14 = vadd.f32 %v6405_v13, %v6276_v49  ;;  %6758 = vmatpush.msrb.mxu2 %v8286_v0  ;;  %v6446_v51 = vmax.f32 %v6442_v53, 0.0 }
 0x77e   :  { %6786 = vmatpush.msrb.mxu3 %v8292_v29  ;;  %6729 = vmatpush.msra.mxu1 %v8281_v62 }
 0x77f   :  { %v6431_v52 = vmax.f32 %v6419_v20, %v6423_v14  ;;  %8274 = vmatmul.msk.f32.vlgmr.msra.gmra.mxu2 %vm6459_vm5, %v6654_v17  ;;  %v6712_v12 = vrot.slane %v6446_v51, 2  ;;  %v6770_v15 = vrot.slane %v6446_v51, 6 }
 0x780   :  { %6787 = vmatpush.msrb.mxu3 %v8291_v22  ;;  %6759 = vmatpush.msrb.mxu2 %v8285_v3  ;;  %v8322_v22 = vld [vmem:[%s12327_s6] ss:$0 sm:$0xff] }
 0x781   :  { %6730 = vmatpush.msra.mxu1 %v8280_v18  ;;  %v6435_v45 = vmax.f32 %v6427_v9, %v6431_v52  ;;  %8279 = vmatmul.msk.f32.vlgmr.msra.gmra.mxu3 %vm6459_vm5, %v6446_v51  ;;  %v6741_v9 = vrot.slane %v6446_v51, 4 }
 0x782   :  { %8269 = vmatmul.msk.f32.vlgmr.msrb.gmra.mxu1 %vm6459_vm5, %v6625_v55  ;;  %6788 = vmatpush.msrb.mxu3 %v8290_v30 }
 0x783   :  { %6843 = vmatpush.msra.mxu2 %v8303_v57  ;;  %6814 = vmatpush.msrb.mxu1 %v8298_v24  ;;  %v6443_v58 = vadd.f32 %v12136_v46, %v6435_v45  ;;  %v8295_v46 = vld [vmem:[%s12326_s5 + $0x180] sm:$0xff] }
 0x784   :  { %6872 = vmatpush.msra.mxu3 %v8308_v47 }
 0x785   :  { %6844 = vmatpush.msra.mxu2 %v8302_v35  ;;  %6815 = vmatpush.msrb.mxu1 %v8297_v56  ;;  %v6447_v59 = vmax.f32 %v6443_v58, 0.0 }
 0x786   :  { %6873 = vmatpush.msra.mxu3 %v8307_v19 }
 0x787   :  { %6845 = vmatpush.msra.mxu2 %v8301_v31  ;;  %6816 = vmatpush.msrb.mxu1 %v8296_v1  ;;  %v6828_v32 = vrot.slane %v6447_v59, 2  ;;  %v6857_v61 = vrot.slane %v6447_v59, 4  ;;  %v6886_v10 = vrot.slane %v6447_v59, 6 }
 0x788   :  { %8289 = vmatmul.msk.f32.vlgmr.msrb.gmra.mxu2 %vm6459_vm5, %v6741_v9  ;;  %6874 = vmatpush.msra.mxu3 %v8306_v26 }
 0x789   :  { %6846 = vmatpush.msra.mxu2 %v8300_v16  ;;  %8294 = vmatmul.msk.f32.vlgmr.msrb.gmra.mxu3 %vm6459_vm5, %v6770_v15 }
 0x78a   :  { %8284 = vmatmul.msk.f32.vlgmr.msra.gmra.mxu1 %vm6459_vm5, %v6712_v12  ;;  %6875 = vmatpush.msra.mxu3 %v8305_v27 }
 0x78b   :  { %6817 = vmatpush.msrb.mxu1 %v8295_v46 }
 0x78d   :  { %6901 = vmatpush.msra.mxu1 %v8313_v25 }
 0x78f   :  { %6902 = vmatpush.msra.mxu1 %v8312_v4 }
 0x790   :  { %8304 = vmatmul.msk.f32.vlgmr.msra.gmra.mxu2 %vm6459_vm5, %v6828_v32 }
 0x791   :  { %6903 = vmatpush.msra.mxu1 %v8311_v2  ;;  %8309 = vmatmul.msk.f32.vlgmr.msra.gmra.mxu3 %vm6459_vm5, %v6857_v61 }
 0x792   :  { %8299 = vmatmul.msk.f32.vlgmr.msrb.gmra.mxu1 %vm6459_vm5, %v6447_v59 }
 0x793   :  { %6904 = vmatpush.msra.mxu1 %v8310_v54 }
 0x79a   :  { %8314 = vmatmul.msk.f32.vlgmr.msra.gmra.mxu1 %vm6459_vm5, %v6886_v10 }
 0x7ee   :  { %v6479_v23 = vpop.f32.mrf.mxu1 }
 0x7f2   :  { %v6501_v44 = vpop.f32.mrf.mxu2 }
 0x7f3   :  { %v6502_v5 = vadd.f32 %v6501_v44, %v6479_v23 }
 0x7f4   :  { %v6529_v36 = vpop.f32.mrf.mxu3 }
 0x7f5   :  { %v6532_v50 = vadd.f32 %v6529_v36, %v6502_v5 }
 0x7f6   :  { %v6558_v48 = vpop.f32.mrf.mxu1 }
 0x7f7   :  { %v6561_v38 = vadd.f32 %v6558_v48, %v6532_v50 }
 0x7fa   :  { %v6587_v63 = vpop.f32.mrf.mxu2 }
 0x7fb   :  { %v6590_v39 = vadd.f32 %v6587_v63, %v6561_v38 }
 0x7fc   :  { %v6616_v41 = vpop.f32.mrf.mxu3 }
 0x7fd   :  { %v6619_v33 = vadd.f32 %v6616_v41, %v6590_v39 }
 0x7ff   :  { %v6645_v7 = vpop.f32.mrf.mxu1 }
 0x800   :  { %v6648_v8 = vadd.f32 %v6645_v7, %v6619_v33 }
 0x802   :  { %v6674_v11 = vpop.f32.mrf.mxu2 }
 0x803   :  { %v6677_v28 = vadd.f32 %v6674_v11, %v6648_v8 }
 0x804   :  { %v6703_v43 = vpop.f32.mrf.mxu3 }
 0x805   :  { %v6706_v40 = vadd.f32 %v6703_v43, %v6677_v28 }
 0x807   :  { %v6732_v60 = vpop.f32.mrf.mxu1 }
 0x808   :  { %v6735_v37 = vadd.f32 %v6732_v60, %v6706_v40 }
 0x80b   :  { %v6761_v34 = vpop.f32.mrf.mxu2 }
 0x80c   :  { %v6764_v6 = vadd.f32 %v6761_v34, %v6735_v37  ;;  %v6790_v21 = vpop.f32.mrf.mxu3 }
 0x80e   :  { %v6793_v42 = vadd.f32 %v6790_v21, %v6764_v6 }
 0x80f   :  { %v6819_v13 = vpop.f32.mrf.mxu1 }
 0x810   :  { %v6822_v0 = vadd.f32 %v6819_v13, %v6793_v42 }
 0x813   :  { %v6848_v29 = vpop.f32.mrf.mxu2 }
 0x814   :  { %v6851_v53 = vadd.f32 %v6848_v29, %v6822_v0  ;;  %v6877_v49 = vpop.f32.mrf.mxu3 }
 0x816   :  { %v6880_v62 = vadd.f32 %v6877_v49, %v6851_v53 }
 0x817   :  { %v6906_v20 = vpop.f32.mrf.mxu1 }
 0x818   :  { %v6909_v17 = vadd.f32 %v6906_v20, %v6880_v62 }
 0x81a   :  { %v6914_v14 = vadd.f32 %v8322_v22, %v6909_v17 }
 0x81c   :  { %6916 = vst.msk [vmem:[#allocation3] sm:$0x3] %vm6915_vm6, %v6914_v14 }
 0x81d   :  { %6927 = dma.vmem_to_hbm [thread:$0]  %s6923_s1, 32, %s6925_s9, [#allocation4]  }
 0x81e   :  { %8348 = dma.done.wait [#allocation4], 32  }
 0x81f   :  { %8349 = vsyncadd [#allocation4], 4294967264 }
 0x820   :  { %6932 = vsyncpa [#allocation4], 1 }

</bundles_post_ra>
